<compile_context>
chip_gen: v5e
topology: v5e:2x2
jax: 0.10.0
libtpu: 0.0.40
codegen_flags: <defaults>
</compile_context>

<pallas_src>
import numpy as np

import jax
import jax.numpy as jnp
from jax.experimental import pallas as pl
from jax.experimental.pallas import tpu as pltpu


# ----------------------------------------------------------------------------
# Host-side parameter preparation (one-time)
# ----------------------------------------------------------------------------
def _conv_pool_band(w_oihw, w_in, pool=2):
    """Band weights for one conv layer: (KH, W_in*Cin, 2*OWp*Cout).

    With activations laid out as A[y, x*Cin + ci], the kernel computes
        acc[y, dx*half + ox*Cout + co] = sum_i A[y+i, :] @ band[i]
    which equals the (pre-bias) conv output at spatial (y, 2*ox + dx), channel co,
    i.e. the two x-parity taps of the subsequent 2x2 max-pool sit in the two
    column halves of the result.
    """
    w = np.asarray(w_oihw, dtype=np.float32)            # torch OIHW
    cout, cin, kh, kw = w.shape
    ow = w_in - kw + 1
    owp = ow // pool
    half = owp * cout
    w_hwio = np.transpose(w, (2, 3, 1, 0))              # (kh, kw, cin, cout)
    band = np.zeros((kh, w_in * cin, pool * half), dtype=np.float32)
    for i in range(kh):
        for dx in range(pool):
            for ox in range(owp):
                xo = pool * ox + dx                     # conv output column
                for j in range(kw):
                    xin = xo + j                        # input column
                    band[i,
                         xin * cin:(xin + 1) * cin,
                         dx * half + ox * cout: dx * half + (ox + 1) * cout] = w_hwio[i, j]
    return band


def init_torch_style_params(key):
    """Deterministic synthetic parameters in the exact PyTorch layouts of CNN_Net."""
    ks = jax.random.split(key, 10)

    def normal(k, shape, scale=0.05):
        return (scale * jax.random.normal(k, shape)).astype(jnp.float32)

    return {
        "conv1_w": normal(ks[0], (32, 1, 5, 5)),    # Conv2d(1, 32, 5)  OIHW
        "conv1_b": normal(ks[1], (32,)),
        "conv2_w": normal(ks[2], (64, 32, 5, 5)),   # Conv2d(32, 64, 5) OIHW
        "conv2_b": normal(ks[3], (64,)),
        "fc1_w": normal(ks[4], (200, 1024)),        # Linear weights are (out, in)
        "fc1_b": normal(ks[5], (200,)),
        "fc21_w": normal(ks[6], (200, 200)),
        "fc21_b": normal(ks[7], (200,)),
        "fc24_w": normal(ks[8], (10, 200)),
        "fc24_b": normal(ks[9], (10,)),
    }


def prepare_params(tp):
    """PyTorch-layout parameters -> kernel-layout parameters."""
    wb1 = _conv_pool_band(tp["conv1_w"], w_in=28)   # (5, 28, 768)
    wb2 = _conv_pool_band(tp["conv2_w"], w_in=12)   # (5, 384, 512)
    bt1 = np.tile(np.asarray(tp["conv1_b"], np.float32), 12)[None, :]   # (1, 384)
    bt2 = np.tile(np.asarray(tp["conv2_b"], np.float32), 4)[None, :]    # (1, 256)

    # torch.flatten(x, 1) flattens NCHW (c, y, x); the feature kernel emits
    # NHWC-flattened (y, x, c) features, so permute fc1's input rows once here
    # instead of transposing the activation at runtime.
    nchw_idx = np.arange(1024).reshape(64, 4, 4)                 # [c, y, x] -> nchw index
    perm = np.transpose(nchw_idx, (1, 2, 0)).reshape(-1)         # nhwc position -> nchw index
    fc1_w = np.asarray(tp["fc1_w"], np.float32).T[perm, :]       # (1024, 200), NHWC rows

    return {
        "wb1": jnp.asarray(wb1, jnp.float32),
        "bt1": jnp.asarray(bt1, jnp.float32),
        "wb2": jnp.asarray(wb2, jnp.bfloat16),      # large operand -> bf16 (f32 accum)
        "bt2": jnp.asarray(bt2, jnp.float32),
        "fc1_w": jnp.asarray(fc1_w, jnp.bfloat16),
        "fc1_b": jnp.asarray(np.asarray(tp["fc1_b"], np.float32)[None, :]),
        "fc21_w": jnp.asarray(np.asarray(tp["fc21_w"], np.float32).T, jnp.bfloat16),
        "fc21_b": jnp.asarray(np.asarray(tp["fc21_b"], np.float32)[None, :]),
        "fc24_w": jnp.asarray(np.asarray(tp["fc24_w"], np.float32).T, jnp.bfloat16),
        "fc24_b": jnp.asarray(np.asarray(tp["fc24_b"], np.float32)[None, :]),
    }


# ----------------------------------------------------------------------------
# Pallas kernels
# ----------------------------------------------------------------------------
def _pool_rows(act, oh):
    """Row half of the 2x2 max-pool: (2*oh, C) -> (oh, C) via 0/1 selection matmuls."""
    rows = jax.lax.broadcasted_iota(jnp.int32, (oh, 2 * oh), 0)
    cols = jax.lax.broadcasted_iota(jnp.int32, (oh, 2 * oh), 1)
    sel_e = (cols == 2 * rows).astype(jnp.float32)
    sel_o = (cols == 2 * rows + 1).astype(jnp.float32)
    return jnp.maximum(
        jnp.dot(sel_e, act, preferred_element_type=jnp.float32),
        jnp.dot(sel_o, act, preferred_element_type=jnp.float32),
    )


def _feature_kernel(x_ref, wb1_ref, bt1_ref, wb2_ref, bt2_ref, o_ref):
    """conv1 + ReLU + pool1 + conv2 + ReLU + pool2 for one image, fully in VMEM."""
    # ---- conv1: 5 band matmuls; cols [0:384]=even-x conv taps, [384:768]=odd-x ----
    acc1 = jnp.zeros((24, 768), jnp.float32)
    for i in range(5):
        acc1 = acc1 + jnp.dot(x_ref[0, i:i + 24, :], wb1_ref[i],
                              preferred_element_type=jnp.float32)
    a1 = jnp.maximum(acc1[:, :384], acc1[:, 384:]) + bt1_ref[...]   # x-pool + bias
    a1 = jnp.maximum(a1, 0.0)                                       # ReLU (commutes w/ max)
    p1 = _pool_rows(a1, 12)                                         # (12, 384): pool1, cols=x*32+c

    # ---- conv2: same trick, bf16 operands with f32 accumulation ----
    acc2 = jnp.zeros((8, 512), jnp.float32)
    for i in range(5):
        acc2 = acc2 + jnp.dot(p1[i:i + 8, :].astype(jnp.bfloat16), wb2_ref[i],
                              preferred_element_type=jnp.float32)
    a2 = jnp.maximum(acc2[:, :256], acc2[:, 256:]) + bt2_ref[...]
    a2 = jnp.maximum(a2, 0.0)
    p2 = _pool_rows(a2, 4)                                          # (4, 256): pool2, cols=x*64+c

    o_ref[0] = p2                                                   # lane-dense 256-wide store


def conv_features(x_nhw, prep):
    """x: (N, 28, 28) f32 -> (N, 4, 256) pooled features in NHWC (y, x, c) order."""
    n = x_nhw.shape[0]
    return pl.pallas_call(
        _feature_kernel,
        out_shape=jax.ShapeDtypeStruct((n, 4, 256), jnp.float32),
        grid=(n,),
        in_specs=[
            pl.BlockSpec((1, 28, 28), lambda i: (i, 0, 0)),
            pl.BlockSpec((5, 28, 768), lambda i: (0, 0, 0)),    # resident conv1 band
            pl.BlockSpec((1, 384), lambda i: (0, 0)),
            pl.BlockSpec((5, 384, 512), lambda i: (0, 0, 0)),   # resident conv2 band (bf16)
            pl.BlockSpec((1, 256), lambda i: (0, 0)),
        ],
        out_specs=pl.BlockSpec((1, 4, 256), lambda i: (i, 0, 0)),
        compiler_params=pltpu.CompilerParams(
            dimension_semantics=("parallel",),      # shard batch across TCs on v7x
            vmem_limit_bytes=32 * 1024 * 1024,
        ),
    )(x_nhw, prep["wb1"], prep["bt1"], prep["wb2"], prep["bt2"])


def _fc_stack_kernel(x_ref, w1_ref, b1_ref, w2_ref, b2_ref, w3_ref, b3_ref, o_ref):
    """fc1 + ReLU + fc21 + ReLU + fc24 fused; intermediates never leave VMEM."""
    h = x_ref[...].astype(jnp.bfloat16)                                   # (TM, 1024)
    h = jnp.dot(h, w1_ref[...], preferred_element_type=jnp.float32) + b1_ref[...]
    h = jnp.maximum(h, 0.0).astype(jnp.bfloat16)                          # (TM, 200)
    h = jnp.dot(h, w2_ref[...], preferred_element_type=jnp.float32) + b2_ref[...]
    h = jnp.maximum(h, 0.0).astype(jnp.bfloat16)                          # (TM, 200)
    o_ref[...] = (jnp.dot(h, w3_ref[...], preferred_element_type=jnp.float32)
                  + b3_ref[...])                                          # (TM, 10)


def _round_up(v, m):
    return (v + m - 1) // m * m


def fc_stack(feats, prep):
    """feats: (N, 1024) f32 -> logits (N, 10) f32."""
    n = feats.shape[0]
    tm = min(128, _round_up(n, 8))          # row tile (>= 8 sublanes)
    n_pad = _round_up(n, tm)
    if n_pad != n:
        feats = jnp.pad(feats, ((0, n_pad - n), (0, 0)))
    out = pl.pallas_call(
        _fc_stack_kernel,
        out_shape=jax.ShapeDtypeStruct((n_pad, 10), jnp.float32),
        grid=(n_pad // tm,),
        in_specs=[
            pl.BlockSpec((tm, 1024), lambda m: (m, 0)),
            pl.BlockSpec((1024, 200), lambda m: (0, 0)),   # resident fc weights (bf16)
            pl.BlockSpec((1, 200), lambda m: (0, 0)),
            pl.BlockSpec((200, 200), lambda m: (0, 0)),
            pl.BlockSpec((1, 200), lambda m: (0, 0)),
            pl.BlockSpec((200, 10), lambda m: (0, 0)),
            pl.BlockSpec((1, 10), lambda m: (0, 0)),
        ],
        out_specs=pl.BlockSpec((tm, 10), lambda m: (m, 0)),
        compiler_params=pltpu.CompilerParams(
            dimension_semantics=("parallel",),
            vmem_limit_bytes=32 * 1024 * 1024,
        ),
    )(feats, prep["fc1_w"], prep["fc1_b"], prep["fc21_w"], prep["fc21_b"],
      prep["fc24_w"], prep["fc24_b"])
    return out[:n]


# ----------------------------------------------------------------------------
# Forward pass
# ----------------------------------------------------------------------------
def cnn_net_forward(x_nchw, prep):
    n, c, h, w = x_nchw.shape
    assert (c, h, w) == (1, 28, 28), "fc1 = Linear(1024, .) pins the input to 1x28x28"
    x = x_nchw.reshape(n, h, w).astype(jnp.float32)   # Cin=1 -> pure metadata reshape
    feats = conv_features(x, prep)                    # (N, 4, 256)
    feats = feats.reshape(n, 1024)                    # NHWC (y, x, c) flatten order
    return fc_stack(feats, prep)                      # (N, 10)


# ----------------------------------------------------------------------------
if __name__ == "__main__":
    key = jax.random.PRNGKey(0)
    k_param, k_x = jax.random.split(key)

    torch_params = init_torch_style_params(k_param)
    prep = prepare_params(torch_params)

    # fc1 expects 1024 = 64*4*4 features, which pins the input to 1x28x28 (MNIST-style).
    x = jax.random.normal(k_x, (2, 1, 28, 28), dtype=jnp.float32)

    fwd = jax.jit(cnn_net_forward)
    out = jax.block_until_ready(fwd(x, prep))

    assert out.shape == (2, 10), out.shape
    assert out.dtype == jnp.float32
    assert bool(jnp.all(jnp.isfinite(out)))
    print("KERNEL_OK")
</pallas_src>

<mosaic_0001>
module attributes {stable_mosaic.version = 11 : i64} {
  func.func @_feature_kernel(%arg0: i32, %arg1: memref<1x28x28xf32, #tpu.memory_space<vmem>>, %arg2: memref<5x28x768xf32, #tpu.memory_space<vmem>>, %arg3: memref<1x384xf32, #tpu.memory_space<vmem>>, %arg4: memref<5x384x512xbf16, #tpu.memory_space<vmem>>, %arg5: memref<1x256xf32, #tpu.memory_space<vmem>>, %arg6: memref<1x4x256xf32, #tpu.memory_space<vmem>>) attributes {dimension_semantics = [#tpu.dimension_semantics<parallel>], iteration_bounds = array<i64: 2>, scalar_prefetch = 0 : i64, scratch_operands = 0 : i64, tpu.core_type = #tpu.core_type<tc>, window_params = [{transform_indices = @transform_0, window_bounds = array<i64: 1, 28, 28>}, {pipeline_mode = #tpu.pipeline_mode<synchronous>, transform_indices = @transform_1, window_bounds = array<i64: 5, 28, 768>}, {pipeline_mode = #tpu.pipeline_mode<synchronous>, transform_indices = @transform_2, window_bounds = array<i64: 1, 384>}, {pipeline_mode = #tpu.pipeline_mode<synchronous>, transform_indices = @transform_3, window_bounds = array<i64: 5, 384, 512>}, {pipeline_mode = #tpu.pipeline_mode<synchronous>, transform_indices = @transform_4, window_bounds = array<i64: 1, 256>}, {transform_indices = @transform_5, window_bounds = array<i64: 1, 4, 256>}]} {
    %cst = arith.constant 0.000000e+00 : f32
    %0 = vector.broadcast %cst : f32 to vector<24x768xf32>
    %c0 = arith.constant 0 : index
    %c0_0 = arith.constant 0 : index
    %c0_1 = arith.constant 0 : index
    %1 = vector.load %arg1[%c0, %c0_0, %c0_1] : memref<1x28x28xf32, #tpu.memory_space<vmem>>, vector<1x24x28xf32>
    %2 = vector.shape_cast %1 : vector<1x24x28xf32> to vector<24x28xf32>
    %c0_2 = arith.constant 0 : index
    %c0_3 = arith.constant 0 : index
    %c0_4 = arith.constant 0 : index
    %3 = vector.load %arg2[%c0_2, %c0_3, %c0_4] : memref<5x28x768xf32, #tpu.memory_space<vmem>>, vector<1x28x768xf32>
    %4 = vector.shape_cast %3 : vector<1x28x768xf32> to vector<28x768xf32>
    %cst_5 = arith.constant dense<0.000000e+00> : vector<24x768xf32>
    %5 = tpu.matmul %2, %4, %cst_5 {dimension_numbers = #tpu.dot_dimension_numbers<[1], [0], [0], [1], [0, 0, 1, 1], [], []>} : vector<24x28xf32>, vector<28x768xf32>, vector<24x768xf32> -> vector<24x768xf32>
    %6 = arith.addf %0, %5 : vector<24x768xf32>
    %c0_6 = arith.constant 0 : index
    %c1 = arith.constant 1 : index
    %c0_7 = arith.constant 0 : index
    %7 = vector.load %arg1[%c0_6, %c1, %c0_7] : memref<1x28x28xf32, #tpu.memory_space<vmem>>, vector<1x24x28xf32>
    %8 = vector.shape_cast %7 : vector<1x24x28xf32> to vector<24x28xf32>
    %c1_8 = arith.constant 1 : index
    %c0_9 = arith.constant 0 : index
    %c0_10 = arith.constant 0 : index
    %9 = vector.load %arg2[%c1_8, %c0_9, %c0_10] : memref<5x28x768xf32, #tpu.memory_space<vmem>>, vector<1x28x768xf32>
    %10 = vector.shape_cast %9 : vector<1x28x768xf32> to vector<28x768xf32>
    %cst_11 = arith.constant dense<0.000000e+00> : vector<24x768xf32>
    %11 = tpu.matmul %8, %10, %cst_11 {dimension_numbers = #tpu.dot_dimension_numbers<[1], [0], [0], [1], [0, 0, 1, 1], [], []>} : vector<24x28xf32>, vector<28x768xf32>, vector<24x768xf32> -> vector<24x768xf32>
    %12 = arith.addf %6, %11 : vector<24x768xf32>
    %c0_12 = arith.constant 0 : index
    %c2 = arith.constant 2 : index
    %c0_13 = arith.constant 0 : index
    %13 = vector.load %arg1[%c0_12, %c2, %c0_13] : memref<1x28x28xf32, #tpu.memory_space<vmem>>, vector<1x24x28xf32>
    %14 = vector.shape_cast %13 : vector<1x24x28xf32> to vector<24x28xf32>
    %c2_14 = arith.constant 2 : index
    %c0_15 = arith.constant 0 : index
    %c0_16 = arith.constant 0 : index
    %15 = vector.load %arg2[%c2_14, %c0_15, %c0_16] : memref<5x28x768xf32, #tpu.memory_space<vmem>>, vector<1x28x768xf32>
    %16 = vector.shape_cast %15 : vector<1x28x768xf32> to vector<28x768xf32>
    %cst_17 = arith.constant dense<0.000000e+00> : vector<24x768xf32>
    %17 = tpu.matmul %14, %16, %cst_17 {dimension_numbers = #tpu.dot_dimension_numbers<[1], [0], [0], [1], [0, 0, 1, 1], [], []>} : vector<24x28xf32>, vector<28x768xf32>, vector<24x768xf32> -> vector<24x768xf32>
    %18 = arith.addf %12, %17 : vector<24x768xf32>
    %c0_18 = arith.constant 0 : index
    %c3 = arith.constant 3 : index
    %c0_19 = arith.constant 0 : index
    %19 = vector.load %arg1[%c0_18, %c3, %c0_19] : memref<1x28x28xf32, #tpu.memory_space<vmem>>, vector<1x24x28xf32>
    %20 = vector.shape_cast %19 : vector<1x24x28xf32> to vector<24x28xf32>
    %c3_20 = arith.constant 3 : index
    %c0_21 = arith.constant 0 : index
    %c0_22 = arith.constant 0 : index
    %21 = vector.load %arg2[%c3_20, %c0_21, %c0_22] : memref<5x28x768xf32, #tpu.memory_space<vmem>>, vector<1x28x768xf32>
    %22 = vector.shape_cast %21 : vector<1x28x768xf32> to vector<28x768xf32>
    %cst_23 = arith.constant dense<0.000000e+00> : vector<24x768xf32>
    %23 = tpu.matmul %20, %22, %cst_23 {dimension_numbers = #tpu.dot_dimension_numbers<[1], [0], [0], [1], [0, 0, 1, 1], [], []>} : vector<24x28xf32>, vector<28x768xf32>, vector<24x768xf32> -> vector<24x768xf32>
    %24 = arith.addf %18, %23 : vector<24x768xf32>
    %c0_24 = arith.constant 0 : index
    %c4 = arith.constant 4 : index
    %c0_25 = arith.constant 0 : index
    %25 = vector.load %arg1[%c0_24, %c4, %c0_25] : memref<1x28x28xf32, #tpu.memory_space<vmem>>, vector<1x24x28xf32>
    %26 = vector.shape_cast %25 : vector<1x24x28xf32> to vector<24x28xf32>
    %c4_26 = arith.constant 4 : index
    %c0_27 = arith.constant 0 : index
    %c0_28 = arith.constant 0 : index
    %27 = vector.load %arg2[%c4_26, %c0_27, %c0_28] : memref<5x28x768xf32, #tpu.memory_space<vmem>>, vector<1x28x768xf32>
    %28 = vector.shape_cast %27 : vector<1x28x768xf32> to vector<28x768xf32>
    %cst_29 = arith.constant dense<0.000000e+00> : vector<24x768xf32>
    %29 = tpu.matmul %26, %28, %cst_29 {dimension_numbers = #tpu.dot_dimension_numbers<[1], [0], [0], [1], [0, 0, 1, 1], [], []>} : vector<24x28xf32>, vector<28x768xf32>, vector<24x768xf32> -> vector<24x768xf32>
    %30 = arith.addf %24, %29 : vector<24x768xf32>
    %31 = vector.extract_strided_slice %30 {offsets = [0, 0], sizes = [24, 384], strides = [1, 1]} : vector<24x768xf32> to vector<24x384xf32>
    %32 = vector.extract_strided_slice %30 {offsets = [0, 384], sizes = [24, 384], strides = [1, 1]} : vector<24x768xf32> to vector<24x384xf32>
    %33 = arith.maximumf %31, %32 : vector<24x384xf32>
    %c0_30 = arith.constant 0 : index
    %c0_31 = arith.constant 0 : index
    %34 = vector.load %arg3[%c0_30, %c0_31] : memref<1x384xf32, #tpu.memory_space<vmem>>, vector<1x384xf32>
    %35 = vector.broadcast %34 : vector<1x384xf32> to vector<24x384xf32>
    %36 = arith.addf %33, %35 : vector<24x384xf32>
    %cst_32 = arith.constant 0.000000e+00 : f32
    %37 = vector.broadcast %cst_32 : f32 to vector<24x384xf32>
    %38 = arith.maximumf %36, %37 : vector<24x384xf32>
    %39 = tpu.iota {dimensions = array<i32: 0>} : vector<12x24xi32>
    %40 = tpu.iota {dimensions = array<i32: 1>} : vector<12x24xi32>
    %c2_i32 = arith.constant 2 : i32
    %41 = vector.broadcast %c2_i32 : i32 to vector<12x24xi32>
    %42 = arith.muli %41, %39 : vector<12x24xi32>
    %43 = arith.cmpi eq, %40, %42 : vector<12x24xi32>
    %44 = arith.extui %43 : vector<12x24xi1> to vector<12x24xi32>
    %45 = arith.sitofp %44 : vector<12x24xi32> to vector<12x24xf32>
    %c2_i32_33 = arith.constant 2 : i32
    %46 = vector.broadcast %c2_i32_33 : i32 to vector<12x24xi32>
    %47 = arith.muli %46, %39 : vector<12x24xi32>
    %c1_i32 = arith.constant 1 : i32
    %48 = vector.broadcast %c1_i32 : i32 to vector<12x24xi32>
    %49 = arith.addi %47, %48 : vector<12x24xi32>
    %50 = arith.cmpi eq, %40, %49 : vector<12x24xi32>
    %51 = arith.extui %50 : vector<12x24xi1> to vector<12x24xi32>
    %52 = arith.sitofp %51 : vector<12x24xi32> to vector<12x24xf32>
    %cst_34 = arith.constant dense<0.000000e+00> : vector<12x384xf32>
    %53 = tpu.matmul %45, %38, %cst_34 {dimension_numbers = #tpu.dot_dimension_numbers<[1], [0], [0], [1], [0, 0, 1, 1], [], []>} : vector<12x24xf32>, vector<24x384xf32>, vector<12x384xf32> -> vector<12x384xf32>
    %cst_35 = arith.constant dense<0.000000e+00> : vector<12x384xf32>
    %54 = tpu.matmul %52, %38, %cst_35 {dimension_numbers = #tpu.dot_dimension_numbers<[1], [0], [0], [1], [0, 0, 1, 1], [], []>} : vector<12x24xf32>, vector<24x384xf32>, vector<12x384xf32> -> vector<12x384xf32>
    %55 = arith.maximumf %53, %54 : vector<12x384xf32>
    %cst_36 = arith.constant 0.000000e+00 : f32
    %56 = vector.broadcast %cst_36 : f32 to vector<8x512xf32>
    %57 = vector.extract_strided_slice %55 {offsets = [0, 0], sizes = [8, 384], strides = [1, 1]} : vector<12x384xf32> to vector<8x384xf32>
    %58 = arith.truncf %57 : vector<8x384xf32> to vector<8x384xbf16>
    %c0_37 = arith.constant 0 : index
    %c0_38 = arith.constant 0 : index
    %c0_39 = arith.constant 0 : index
    %59 = vector.load %arg4[%c0_37, %c0_38, %c0_39] : memref<5x384x512xbf16, #tpu.memory_space<vmem>>, vector<1x384x512xbf16>
    %60 = vector.shape_cast %59 : vector<1x384x512xbf16> to vector<384x512xbf16>
    %cst_40 = arith.constant dense<0.000000e+00> : vector<8x512xf32>
    %61 = tpu.matmul %58, %60, %cst_40 {dimension_numbers = #tpu.dot_dimension_numbers<[1], [0], [0], [1], [0, 0, 1, 1], [], []>} : vector<8x384xbf16>, vector<384x512xbf16>, vector<8x512xf32> -> vector<8x512xf32>
    %62 = arith.addf %56, %61 : vector<8x512xf32>
    %63 = vector.extract_strided_slice %55 {offsets = [1, 0], sizes = [8, 384], strides = [1, 1]} : vector<12x384xf32> to vector<8x384xf32>
    %64 = arith.truncf %63 : vector<8x384xf32> to vector<8x384xbf16>
    %c1_41 = arith.constant 1 : index
    %c0_42 = arith.constant 0 : index
    %c0_43 = arith.constant 0 : index
    %65 = vector.load %arg4[%c1_41, %c0_42, %c0_43] : memref<5x384x512xbf16, #tpu.memory_space<vmem>>, vector<1x384x512xbf16>
    %66 = vector.shape_cast %65 : vector<1x384x512xbf16> to vector<384x512xbf16>
    %cst_44 = arith.constant dense<0.000000e+00> : vector<8x512xf32>
    %67 = tpu.matmul %64, %66, %cst_44 {dimension_numbers = #tpu.dot_dimension_numbers<[1], [0], [0], [1], [0, 0, 1, 1], [], []>} : vector<8x384xbf16>, vector<384x512xbf16>, vector<8x512xf32> -> vector<8x512xf32>
    %68 = arith.addf %62, %67 : vector<8x512xf32>
    %69 = vector.extract_strided_slice %55 {offsets = [2, 0], sizes = [8, 384], strides = [1, 1]} : vector<12x384xf32> to vector<8x384xf32>
    %70 = arith.truncf %69 : vector<8x384xf32> to vector<8x384xbf16>
    %c2_45 = arith.constant 2 : index
    %c0_46 = arith.constant 0 : index
    %c0_47 = arith.constant 0 : index
    %71 = vector.load %arg4[%c2_45, %c0_46, %c0_47] : memref<5x384x512xbf16, #tpu.memory_space<vmem>>, vector<1x384x512xbf16>
    %72 = vector.shape_cast %71 : vector<1x384x512xbf16> to vector<384x512xbf16>
    %cst_48 = arith.constant dense<0.000000e+00> : vector<8x512xf32>
    %73 = tpu.matmul %70, %72, %cst_48 {dimension_numbers = #tpu.dot_dimension_numbers<[1], [0], [0], [1], [0, 0, 1, 1], [], []>} : vector<8x384xbf16>, vector<384x512xbf16>, vector<8x512xf32> -> vector<8x512xf32>
    %74 = arith.addf %68, %73 : vector<8x512xf32>
    %75 = vector.extract_strided_slice %55 {offsets = [3, 0], sizes = [8, 384], strides = [1, 1]} : vector<12x384xf32> to vector<8x384xf32>
    %76 = arith.truncf %75 : vector<8x384xf32> to vector<8x384xbf16>
    %c3_49 = arith.constant 3 : index
    %c0_50 = arith.constant 0 : index
    %c0_51 = arith.constant 0 : index
    %77 = vector.load %arg4[%c3_49, %c0_50, %c0_51] : memref<5x384x512xbf16, #tpu.memory_space<vmem>>, vector<1x384x512xbf16>
    %78 = vector.shape_cast %77 : vector<1x384x512xbf16> to vector<384x512xbf16>
    %cst_52 = arith.constant dense<0.000000e+00> : vector<8x512xf32>
    %79 = tpu.matmul %76, %78, %cst_52 {dimension_numbers = #tpu.dot_dimension_numbers<[1], [0], [0], [1], [0, 0, 1, 1], [], []>} : vector<8x384xbf16>, vector<384x512xbf16>, vector<8x512xf32> -> vector<8x512xf32>
    %80 = arith.addf %74, %79 : vector<8x512xf32>
    %81 = vector.extract_strided_slice %55 {offsets = [4, 0], sizes = [8, 384], strides = [1, 1]} : vector<12x384xf32> to vector<8x384xf32>
    %82 = arith.truncf %81 : vector<8x384xf32> to vector<8x384xbf16>
    %c4_53 = arith.constant 4 : index
    %c0_54 = arith.constant 0 : index
    %c0_55 = arith.constant 0 : index
    %83 = vector.load %arg4[%c4_53, %c0_54, %c0_55] : memref<5x384x512xbf16, #tpu.memory_space<vmem>>, vector<1x384x512xbf16>
    %84 = vector.shape_cast %83 : vector<1x384x512xbf16> to vector<384x512xbf16>
    %cst_56 = arith.constant dense<0.000000e+00> : vector<8x512xf32>
    %85 = tpu.matmul %82, %84, %cst_56 {dimension_numbers = #tpu.dot_dimension_numbers<[1], [0], [0], [1], [0, 0, 1, 1], [], []>} : vector<8x384xbf16>, vector<384x512xbf16>, vector<8x512xf32> -> vector<8x512xf32>
    %86 = arith.addf %80, %85 : vector<8x512xf32>
    %87 = vector.extract_strided_slice %86 {offsets = [0, 0], sizes = [8, 256], strides = [1, 1]} : vector<8x512xf32> to vector<8x256xf32>
    %88 = vector.extract_strided_slice %86 {offsets = [0, 256], sizes = [8, 256], strides = [1, 1]} : vector<8x512xf32> to vector<8x256xf32>
    %89 = arith.maximumf %87, %88 : vector<8x256xf32>
    %c0_57 = arith.constant 0 : index
    %c0_58 = arith.constant 0 : index
    %90 = vector.load %arg5[%c0_57, %c0_58] : memref<1x256xf32, #tpu.memory_space<vmem>>, vector<1x256xf32>
    %91 = vector.broadcast %90 : vector<1x256xf32> to vector<8x256xf32>
    %92 = arith.addf %89, %91 : vector<8x256xf32>
    %cst_59 = arith.constant 0.000000e+00 : f32
    %93 = vector.broadcast %cst_59 : f32 to vector<8x256xf32>
    %94 = arith.maximumf %92, %93 : vector<8x256xf32>
    %95 = tpu.iota {dimensions = array<i32: 0>} : vector<4x8xi32>
    %96 = tpu.iota {dimensions = array<i32: 1>} : vector<4x8xi32>
    %c2_i32_60 = arith.constant 2 : i32
    %97 = vector.broadcast %c2_i32_60 : i32 to vector<4x8xi32>
    %98 = arith.muli %97, %95 : vector<4x8xi32>
    %99 = arith.cmpi eq, %96, %98 : vector<4x8xi32>
    %100 = arith.extui %99 : vector<4x8xi1> to vector<4x8xi32>
    %101 = arith.sitofp %100 : vector<4x8xi32> to vector<4x8xf32>
    %c2_i32_61 = arith.constant 2 : i32
    %102 = vector.broadcast %c2_i32_61 : i32 to vector<4x8xi32>
    %103 = arith.muli %102, %95 : vector<4x8xi32>
    %c1_i32_62 = arith.constant 1 : i32
    %104 = vector.broadcast %c1_i32_62 : i32 to vector<4x8xi32>
    %105 = arith.addi %103, %104 : vector<4x8xi32>
    %106 = arith.cmpi eq, %96, %105 : vector<4x8xi32>
    %107 = arith.extui %106 : vector<4x8xi1> to vector<4x8xi32>
    %108 = arith.sitofp %107 : vector<4x8xi32> to vector<4x8xf32>
    %cst_63 = arith.constant dense<0.000000e+00> : vector<4x256xf32>
    %109 = tpu.matmul %101, %94, %cst_63 {dimension_numbers = #tpu.dot_dimension_numbers<[1], [0], [0], [1], [0, 0, 1, 1], [], []>} : vector<4x8xf32>, vector<8x256xf32>, vector<4x256xf32> -> vector<4x256xf32>
    %cst_64 = arith.constant dense<0.000000e+00> : vector<4x256xf32>
    %110 = tpu.matmul %108, %94, %cst_64 {dimension_numbers = #tpu.dot_dimension_numbers<[1], [0], [0], [1], [0, 0, 1, 1], [], []>} : vector<4x8xf32>, vector<8x256xf32>, vector<4x256xf32> -> vector<4x256xf32>
    %111 = arith.maximumf %109, %110 : vector<4x256xf32>
    %c0_65 = arith.constant 0 : index
    %c0_66 = arith.constant 0 : index
    %c0_67 = arith.constant 0 : index
    %112 = vector.load %arg6[%c0_65, %c0_66, %c0_67] : memref<1x4x256xf32, #tpu.memory_space<vmem>>, vector<1x4x256xf32>
    %113 = vector.shape_cast %112 : vector<1x4x256xf32> to vector<4x256xf32>
    %114 = vector.shape_cast %111 : vector<4x256xf32> to vector<1x4x256xf32>
    tpu.vector_store %arg6[%c0_65, %c0_66, %c0_67], %114 {strides = array<i32>} : memref<1x4x256xf32, #tpu.memory_space<vmem>>, vector<1x4x256xf32>,
    return
  }
  func.func @transform_0(%arg0: i32) -> (i32, i32, i32) {
    %c0_i32 = arith.constant 0 : i32
    %c0_i32_0 = arith.constant 0 : i32
    %c0_i32_1 = arith.constant 0 : i32
    return %arg0, %c0_i32, %c0_i32_0 : i32, i32, i32
  }
  func.func @transform_1(%arg0: i32) -> (i32, i32, i32) {
    %c0_i32 = arith.constant 0 : i32
    %c0_i32_0 = arith.constant 0 : i32
    %c0_i32_1 = arith.constant 0 : i32
    %c0_i32_2 = arith.constant 0 : i32
    return %c0_i32, %c0_i32_0, %c0_i32_1 : i32, i32, i32
  }
  func.func @transform_2(%arg0: i32) -> (i32, i32) {
    %c0_i32 = arith.constant 0 : i32
    %c0_i32_0 = arith.constant 0 : i32
    %c0_i32_1 = arith.constant 0 : i32
    return %c0_i32, %c0_i32_0 : i32, i32
  }
  func.func @transform_3(%arg0: i32) -> (i32, i32, i32) {
    %c0_i32 = arith.constant 0 : i32
    %c0_i32_0 = arith.constant 0 : i32
    %c0_i32_1 = arith.constant 0 : i32
    %c0_i32_2 = arith.constant 0 : i32
    return %c0_i32, %c0_i32_0, %c0_i32_1 : i32, i32, i32
  }
  func.func @transform_4(%arg0: i32) -> (i32, i32) {
    %c0_i32 = arith.constant 0 : i32
    %c0_i32_0 = arith.constant 0 : i32
    %c0_i32_1 = arith.constant 0 : i32
    return %c0_i32, %c0_i32_0 : i32, i32
  }
  func.func @transform_5(%arg0: i32) -> (i32, i32, i32) {
    %c0_i32 = arith.constant 0 : i32
    %c0_i32_0 = arith.constant 0 : i32
    %c0_i32_1 = arith.constant 0 : i32
    return %arg0, %c0_i32, %c0_i32_0 : i32, i32, i32
  }
}

module attributes {stable_mosaic.version = 11 : i64} {
  func.func @_fc_stack_kernel(%arg0: i32, %arg1: memref<8x1024xf32, #tpu.memory_space<vmem>>, %arg2: memref<1024x200xbf16, #tpu.memory_space<vmem>>, %arg3: memref<1x200xf32, #tpu.memory_space<vmem>>, %arg4: memref<200x200xbf16, #tpu.memory_space<vmem>>, %arg5: memref<1x200xf32, #tpu.memory_space<vmem>>, %arg6: memref<200x10xbf16, #tpu.memory_space<vmem>>, %arg7: memref<1x10xf32, #tpu.memory_space<vmem>>, %arg8: memref<8x10xf32, #tpu.memory_space<vmem>>) attributes {dimension_semantics = [#tpu.dimension_semantics<parallel>], iteration_bounds = array<i64: 1>, scalar_prefetch = 0 : i64, scratch_operands = 0 : i64, tpu.core_type = #tpu.core_type<tc>, window_params = [{transform_indices = @transform_0, window_bounds = array<i64: 8, 1024>}, {pipeline_mode = #tpu.pipeline_mode<synchronous>, transform_indices = @transform_1, window_bounds = array<i64: 1024, 200>}, {pipeline_mode = #tpu.pipeline_mode<synchronous>, transform_indices = @transform_2, window_bounds = array<i64: 1, 200>}, {pipeline_mode = #tpu.pipeline_mode<synchronous>, transform_indices = @transform_3, window_bounds = array<i64: 200, 200>}, {pipeline_mode = #tpu.pipeline_mode<synchronous>, transform_indices = @transform_4, window_bounds = array<i64: 1, 200>}, {pipeline_mode = #tpu.pipeline_mode<synchronous>, transform_indices = @transform_5, window_bounds = array<i64: 200, 10>}, {pipeline_mode = #tpu.pipeline_mode<synchronous>, transform_indices = @transform_6, window_bounds = array<i64: 1, 10>}, {transform_indices = @transform_7, window_bounds = array<i64: 8, 10>}]} {
    %c0 = arith.constant 0 : index
    %c0_0 = arith.constant 0 : index
    %0 = vector.load %arg1[%c0, %c0_0] : memref<8x1024xf32, #tpu.memory_space<vmem>>, vector<8x1024xf32>
    %1 = arith.truncf %0 : vector<8x1024xf32> to vector<8x1024xbf16>
    %c0_1 = arith.constant 0 : index
    %c0_2 = arith.constant 0 : index
    %2 = vector.load %arg2[%c0_1, %c0_2] : memref<1024x200xbf16, #tpu.memory_space<vmem>>, vector<1024x200xbf16>
    %cst = arith.constant dense<0.000000e+00> : vector<8x200xf32>
    %3 = tpu.matmul %1, %2, %cst {dimension_numbers = #tpu.dot_dimension_numbers<[1], [0], [0], [1], [0, 0, 1, 1], [], []>} : vector<8x1024xbf16>, vector<1024x200xbf16>, vector<8x200xf32> -> vector<8x200xf32>
    %c0_3 = arith.constant 0 : index
    %c0_4 = arith.constant 0 : index
    %4 = vector.load %arg3[%c0_3, %c0_4] : memref<1x200xf32, #tpu.memory_space<vmem>>, vector<1x200xf32>
    %5 = vector.broadcast %4 : vector<1x200xf32> to vector<8x200xf32>
    %6 = arith.addf %3, %5 : vector<8x200xf32>
    %cst_5 = arith.constant 0.000000e+00 : f32
    %7 = vector.broadcast %cst_5 : f32 to vector<8x200xf32>
    %8 = arith.maximumf %6, %7 : vector<8x200xf32>
    %9 = arith.truncf %8 : vector<8x200xf32> to vector<8x200xbf16>
    %c0_6 = arith.constant 0 : index
    %c0_7 = arith.constant 0 : index
    %10 = vector.load %arg4[%c0_6, %c0_7] : memref<200x200xbf16, #tpu.memory_space<vmem>>, vector<200x200xbf16>
    %cst_8 = arith.constant dense<0.000000e+00> : vector<8x200xf32>
    %11 = tpu.matmul %9, %10, %cst_8 {dimension_numbers = #tpu.dot_dimension_numbers<[1], [0], [0], [1], [0, 0, 1, 1], [], []>} : vector<8x200xbf16>, vector<200x200xbf16>, vector<8x200xf32> -> vector<8x200xf32>
    %c0_9 = arith.constant 0 : index
    %c0_10 = arith.constant 0 : index
    %12 = vector.load %arg5[%c0_9, %c0_10] : memref<1x200xf32, #tpu.memory_space<vmem>>, vector<1x200xf32>
    %13 = vector.broadcast %12 : vector<1x200xf32> to vector<8x200xf32>
    %14 = arith.addf %11, %13 : vector<8x200xf32>
    %cst_11 = arith.constant 0.000000e+00 : f32
    %15 = vector.broadcast %cst_11 : f32 to vector<8x200xf32>
    %16 = arith.maximumf %14, %15 : vector<8x200xf32>
    %17 = arith.truncf %16 : vector<8x200xf32> to vector<8x200xbf16>
    %c0_12 = arith.constant 0 : index
    %c0_13 = arith.constant 0 : index
    %18 = vector.load %arg6[%c0_12, %c0_13] : memref<200x10xbf16, #tpu.memory_space<vmem>>, vector<200x10xbf16>
    %cst_14 = arith.constant dense<0.000000e+00> : vector<8x10xf32>
    %19 = tpu.matmul %17, %18, %cst_14 {dimension_numbers = #tpu.dot_dimension_numbers<[1], [0], [0], [1], [0, 0, 1, 1], [], []>} : vector<8x200xbf16>, vector<200x10xbf16>, vector<8x10xf32> -> vector<8x10xf32>
    %c0_15 = arith.constant 0 : index
    %c0_16 = arith.constant 0 : index
    %20 = vector.load %arg7[%c0_15, %c0_16] : memref<1x10xf32, #tpu.memory_space<vmem>>, vector<1x10xf32>
    %21 = vector.broadcast %20 : vector<1x10xf32> to vector<8x10xf32>
    %22 = arith.addf %19, %21 : vector<8x10xf32>
    %c0_17 = arith.constant 0 : index
    %c0_18 = arith.constant 0 : index
    %23 = vector.load %arg8[%c0_17, %c0_18] : memref<8x10xf32, #tpu.memory_space<vmem>>, vector<8x10xf32>
    tpu.vector_store %arg8[%c0_17, %c0_18], %22 {strides = array<i32>} : memref<8x10xf32, #tpu.memory_space<vmem>>, vector<8x10xf32>,
    return
  }
  func.func @transform_0(%arg0: i32) -> (i32, i32) {
    %c0_i32 = arith.constant 0 : i32
    %c0_i32_0 = arith.constant 0 : i32
    return %arg0, %c0_i32 : i32, i32
  }
  func.func @transform_1(%arg0: i32) -> (i32, i32) {
    %c0_i32 = arith.constant 0 : i32
    %c0_i32_0 = arith.constant 0 : i32
    %c0_i32_1 = arith.constant 0 : i32
    return %c0_i32, %c0_i32_0 : i32, i32
  }
  func.func @transform_2(%arg0: i32) -> (i32, i32) {
    %c0_i32 = arith.constant 0 : i32
    %c0_i32_0 = arith.constant 0 : i32
    %c0_i32_1 = arith.constant 0 : i32
    return %c0_i32, %c0_i32_0 : i32, i32
  }
  func.func @transform_3(%arg0: i32) -> (i32, i32) {
    %c0_i32 = arith.constant 0 : i32
    %c0_i32_0 = arith.constant 0 : i32
    %c0_i32_1 = arith.constant 0 : i32
    return %c0_i32, %c0_i32_0 : i32, i32
  }
  func.func @transform_4(%arg0: i32) -> (i32, i32) {
    %c0_i32 = arith.constant 0 : i32
    %c0_i32_0 = arith.constant 0 : i32
    %c0_i32_1 = arith.constant 0 : i32
    return %c0_i32, %c0_i32_0 : i32, i32
  }
  func.func @transform_5(%arg0: i32) -> (i32, i32) {
    %c0_i32 = arith.constant 0 : i32
    %c0_i32_0 = arith.constant 0 : i32
    %c0_i32_1 = arith.constant 0 : i32
    return %c0_i32, %c0_i32_0 : i32, i32
  }
  func.func @transform_6(%arg0: i32) -> (i32, i32) {
    %c0_i32 = arith.constant 0 : i32
    %c0_i32_0 = arith.constant 0 : i32
    %c0_i32_1 = arith.constant 0 : i32
    return %c0_i32, %c0_i32_0 : i32, i32
  }
  func.func @transform_7(%arg0: i32) -> (i32, i32) {
    %c0_i32 = arith.constant 0 : i32
    %c0_i32_0 = arith.constant 0 : i32
    return %arg0, %c0_i32 : i32, i32
  }
}

</mosaic_0001>

<bundles_post_ra>
// kernel: cnn_net_forward.3
= control target key start
LH: loop header
LB: loop body
LE: loop exit
PB: predicated region body
PF: predicated region fallthrough
CT: control target
= control target key end

     0   :  { %12 = vsyncpa [#allocation3], 0  ;;  %s3320_s0 = inlined_call_operand.vmem [shape: f32[8,1024], index: 0, kind: input, shape index: {}]   ;;  %s3321_s1 = inlined_call_operand.vmem [shape: bf16[1024,200], index: 1, kind: input, shape index: {}]   ;;  %s3322_s2 = inlined_call_operand.hbm [shape: f32[1,200], index: 2, kind: input, shape index: {}]   ;;  %s3323_s3 = inlined_call_operand.hbm [shape: bf16[200,200], index: 3, kind: input, shape index: {}]   ;;  %s3324_s4 = inlined_call_operand.hbm [shape: f32[1,200], index: 4, kind: input, shape index: {}]   ;;  %s3325_s5 = inlined_call_operand.vmem [shape: bf16[200,10], index: 5, kind: input, shape index: {}]   ;;  %s3326_s6 = inlined_call_operand.hbm [shape: f32[1,10], index: 6, kind: input, shape index: {}]   ;;  %s3327_s7 = inlined_call_operand.vmem [shape: f32[8,10], index: 7, kind: output, shape index: {}]  }
   0x1   :  { %13 = vsyncpa [#allocation5], 0  ;;  %s34_s26 = sshll.u32 %s3323_s3, 4  ;;  %s35_s26 = int_to_ptr.hbm [resolvable:$true] %s34_s26 }
   0x2   :  { %14 = vsyncpa [#allocation8], 0  ;;  %s2386_s27 = smov [#allocation4]   ;;  %s24_s8 = sshll.u32 %s3322_s2, 4  ;;  %s25_s8 = int_to_ptr.hbm [resolvable:$true] %s24_s8 }
   0x3   :  { %s36_s28 = sshll.u32 %s2386_s27, 4  ;;  %s2387_s9 = smov 128   ;;  %s37_s28 = int_to_ptr.vmem [resolvable:$true] %s36_s28 }
   0x4   :  { %s2388_s10 = smov 8   ;;  %s2389_s11 = smov [#allocation2]  }
   0x5   :  { %42 = dma.hbm_to_vmem [thread:$0]  %s35_s26, 3200, %s37_s28, [#allocation5], %s2387_s9, %s2387_s9, %s2388_s10  }
   0x6   :  { %s26_s12 = sshll.u32 %s2389_s11, 4  ;;  %s48_s15 = sshll.u32 %s3324_s4, 4  ;;  %s27_s12 = int_to_ptr.vmem [resolvable:$true] %s26_s12  ;;  %s49_s15 = int_to_ptr.hbm [resolvable:$true] %s48_s15 }
   0x7   :  { %29 = dma.hbm_to_vmem [thread:$0]  %s25_s8, 32, %s27_s12, [#allocation3]  }
   0x8   :  { %s61_s17 = sshll.u32 %s3326_s6, 4  ;;  %s2390_s18 = smov [#allocation6]   ;;  %s62_s17 = int_to_ptr.hbm [resolvable:$true] %s61_s17 }
   0x9   :  { %s50_s19 = sshll.u32 %s2390_s18, 4  ;;  %s2391_s2 = smov [#allocation7]   ;;  %s51_s19 = int_to_ptr.vmem [resolvable:$true] %s50_s19 }
   0xa   :  { %53 = dma.hbm_to_vmem [thread:$0]  %s49_s15, 32, %s51_s19, [#allocation5]  }
   0xb   :  { %s63_s20 = sshll.u32 %s2391_s2, 4  ;;  %s64_s20 = int_to_ptr.vmem [resolvable:$true] %s63_s20 }
   0xc   :  { %66 = dma.hbm_to_vmem [thread:$0]  %s62_s17, 16, %s64_s20, [#allocation8]  }
   0xd   :  { %2380 = dma.done.wait [#allocation3], 32  }
   0xe   :  { %2381 = vsyncadd [#allocation3], 4294967264 }
   0xf   :  { %2382 = dma.done.wait [#allocation5], 3232  }
  0x10   :  { %2383 = vsyncadd [#allocation5], 4294964064 }
  0x11   :  { %2384 = dma.done.wait [#allocation8], 16  }
  0x12   :  { %2385 = vsyncadd [#allocation8], 4294967280  ;;  %v1512_v0 = vld [vmem:[%s3321_s1 + $0x70] sm:$0xf]  ;;  %v2128_v1 = vld [vmem:[%s3321_s1 + $0x74] sm:$0xf0] }
  0x13   :  { %v1576_v2 = vld [vmem:[%s3321_s1 + $0xf0] sm:$0xf]  ;;  %v1513_v3 = vor.u32 %v2128_v1, %v1512_v0  ;;  %v2144_v4 = vld [vmem:[%s3321_s1 + $0xf4] sm:$0xf0]  ;;  %v1504_v11 = vld [vmem:[%s3321_s1 + $0x60] sm:$0xf] }
  0x14   :  { %v1640_v5 = vld [vmem:[%s3321_s1 + $0x170] sm:$0xf]  ;;  %v2160_v6 = vld [vmem:[%s3321_s1 + $0x174] sm:$0xf0]  ;;  %v1577_v7 = vor.u32 %v2144_v4, %v1576_v2  ;;  %v2126_v13 = vld [vmem:[%s3321_s1 + $0x64] sm:$0xf0] }
  0x15   :  { %v1641_v8 = vor.u32 %v2160_v6, %v1640_v5  ;;  %v1704_v9 = vld [vmem:[%s3321_s1 + $0x1f0] sm:$0xf]  ;;  %v2176_v10 = vld [vmem:[%s3321_s1 + $0x1f4] sm:$0xf0]  ;;  %874 = vmatpush.bf16.msra.mxu0 %v1513_v3  ;;  %v1568_v14 = vld [vmem:[%s3321_s1 + $0xe0] sm:$0xf]  ;;  %v1505_v16 = vor.u32 %v2126_v13, %v1504_v11 }
  0x16   :  { %v1705_v12 = vor.u32 %v2176_v10, %v1704_v9  ;;  %v2142_v15 = vld [vmem:[%s3321_s1 + $0xe4] sm:$0xf0]  ;;  %887 = vmatpush.bf16.msra.mxu1 %v1577_v7  ;;  %v1632_v18 = vld [vmem:[%s3321_s1 + $0x160] sm:$0xf]  ;;  %v1496_v23 = vld [vmem:[%s3321_s1 + $0x50] sm:$0xf] }
  0x17   :  { %900 = vmatpush.bf16.msra.mxu2 %v1641_v8  ;;  %v1569_v17 = vor.u32 %v2142_v15, %v1568_v14  ;;  %v2158_v19 = vld [vmem:[%s3321_s1 + $0x164] sm:$0xf0]  ;;  %v1696_v20 = vld [vmem:[%s3321_s1 + $0x1e0] sm:$0xf]  ;;  %v2124_v24 = vld [vmem:[%s3321_s1 + $0x54] sm:$0xf0] }
  0x18   :  { %913 = vmatpush.bf16.msra.mxu3 %v1705_v12  ;;  %v1633_v21 = vor.u32 %v2158_v19, %v1632_v18  ;;  %v2174_v22 = vld [vmem:[%s3321_s1 + $0x1e4] sm:$0xf0]  ;;  %v1560_v26 = vld [vmem:[%s3321_s1 + $0xd0] sm:$0xf]  ;;  %v2140_v27 = vld [vmem:[%s3321_s1 + $0xd4] sm:$0xf0]  ;;  %v1497_v29 = vor.u32 %v2124_v24, %v1496_v23 }
  0x19   :  { %v1697_v25 = vor.u32 %v2174_v22, %v1696_v20  ;;  %v1624_v28 = vld [vmem:[%s3321_s1 + $0x150] sm:$0xf]  ;;  %875 = vmatpush.bf16.msra.mxu0 %v1505_v16  ;;  %v2156_v30 = vld [vmem:[%s3321_s1 + $0x154] sm:$0xf0]  ;;  %v1561_v33 = vor.u32 %v2140_v27, %v1560_v26  ;;  %v1488_v35 = vld [vmem:[%s3321_s1 + $0x40] sm:$0xf] }
  0x1a   :  { %v1688_v31 = vld [vmem:[%s3321_s1 + $0x1d0] sm:$0xf]  ;;  %v2172_v32 = vld [vmem:[%s3321_s1 + $0x1d4] sm:$0xf0]  ;;  %888 = vmatpush.bf16.msra.mxu1 %v1569_v17  ;;  %v1625_v34 = vor.u32 %v2156_v30, %v1624_v28  ;;  %v2122_v36 = vld [vmem:[%s3321_s1 + $0x44] sm:$0xf0] }
  0x1b   :  { %901 = vmatpush.bf16.msra.mxu2 %v1633_v21  ;;  %v1552_v37 = vld [vmem:[%s3321_s1 + $0xc0] sm:$0xf]  ;;  %v1689_v38 = vor.u32 %v2172_v32, %v1688_v31  ;;  %v2138_v39 = vld [vmem:[%s3321_s1 + $0xc4] sm:$0xf0]  ;;  %v1489_v44 = vor.u32 %v2122_v36, %v1488_v35  ;;  %v1480_v47 = vld [vmem:[%s3321_s1 + $0x30] sm:$0xf] }
  0x1c   :  { %914 = vmatpush.bf16.msra.mxu3 %v1697_v25  ;;  %v1616_v40 = vld [vmem:[%s3321_s1 + $0x140] sm:$0xf]  ;;  %v2154_v41 = vld [vmem:[%s3321_s1 + $0x144] sm:$0xf0]  ;;  %v1553_v45 = vor.u32 %v2138_v39, %v1552_v37  ;;  %v2120_v48 = vld [vmem:[%s3321_s1 + $0x34] sm:$0xf0] }
  0x1d   :  { %v1680_v42 = vld [vmem:[%s3321_s1 + $0x1c0] sm:$0xf]  ;;  %v2170_v43 = vld [vmem:[%s3321_s1 + $0x1c4] sm:$0xf0]  ;;  %876 = vmatpush.bf16.msra.mxu0 %v1497_v29  ;;  %v1617_v46 = vor.u32 %v2154_v41, %v1616_v40  ;;  %v1544_v49 = vld [vmem:[%s3321_s1 + $0xb0] sm:$0xf]  ;;  %v1481_v56 = vor.u32 %v2120_v48, %v1480_v47 }
  0x1e   :  { %889 = vmatpush.bf16.msra.mxu1 %v1561_v33  ;;  %v1681_v50 = vor.u32 %v2170_v43, %v1680_v42  ;;  %v2136_v51 = vld [vmem:[%s3321_s1 + $0xb4] sm:$0xf0]  ;;  %v1608_v52 = vld [vmem:[%s3321_s1 + $0x130] sm:$0xf]  ;;  %v1472_v59 = vld [vmem:[%s3321_s1 + $0x20] sm:$0xf] }
  0x1f   :  { %902 = vmatpush.bf16.msra.mxu2 %v1625_v34  ;;  %v2152_v53 = vld [vmem:[%s3321_s1 + $0x134] sm:$0xf0]  ;;  %v1672_v54 = vld [vmem:[%s3321_s1 + $0x1b0] sm:$0xf]  ;;  %v1545_v57 = vor.u32 %v2136_v51, %v1544_v49  ;;  %v2118_v60 = vld [vmem:[%s3321_s1 + $0x24] sm:$0xf0] }
  0x20   :  { %915 = vmatpush.bf16.msra.mxu3 %v1689_v38  ;;  %v2168_v55 = vld [vmem:[%s3321_s1 + $0x1b4] sm:$0xf0]  ;;  %v1609_v58 = vor.u32 %v2152_v53, %v1608_v52  ;;  %v1536_v61 = vld [vmem:[%s3321_s1 + $0xa0] sm:$0xf]  ;;  %v2134_v63 = vld [vmem:[%s3321_s1 + $0xa4] sm:$0xf0]  ;;  %v1473_v4 = vor.u32 %v2118_v60, %v1472_v59 }
  0x21   :  { %877 = vmatpush.bf16.msra.mxu0 %v1489_v44  ;;  %v1673_v62 = vor.u32 %v2168_v55, %v1672_v54  ;;  %v1600_v0 = vld [vmem:[%s3321_s1 + $0x120] sm:$0xf]  ;;  %v2150_v1 = vld [vmem:[%s3321_s1 + $0x124] sm:$0xf0]  ;;  %v1537_v5 = vor.u32 %v2134_v63, %v1536_v61  ;;  %v1464_v7 = vld [vmem:[%s3321_s1 + $0x10] sm:$0xf] }
  0x22   :  { %890 = vmatpush.bf16.msra.mxu1 %v1553_v45  ;;  %v1664_v2 = vld [vmem:[%s3321_s1 + $0x1a0] sm:$0xf]  ;;  %v2166_v3 = vld [vmem:[%s3321_s1 + $0x1a4] sm:$0xf0]  ;;  %v1601_v6 = vor.u32 %v2150_v1, %v1600_v0  ;;  %v2116_v8 = vld [vmem:[%s3321_s1 + $0x14] sm:$0xf0] }
  0x23   :  { %903 = vmatpush.bf16.msra.mxu2 %v1617_v46  ;;  %v1528_v9 = vld [vmem:[%s3321_s1 + $0x90] sm:$0xf]  ;;  %v1665_v10 = vor.u32 %v2166_v3, %v1664_v2  ;;  %v2132_v11 = vld [vmem:[%s3321_s1 + $0x94] sm:$0xf0]  ;;  %v1465_v16 = vor.u32 %v2116_v8, %v1464_v7  ;;  %v1456_v17 = vld [vmem:[%s3321_s1] sm:$0xf] }
  0x24   :  { %916 = vmatpush.bf16.msra.mxu3 %v1681_v50  ;;  %v1592_v12 = vld [vmem:[%s3321_s1 + $0x110] sm:$0xf]  ;;  %v2148_v13 = vld [vmem:[%s3321_s1 + $0x114] sm:$0xf0]  ;;  %v2114_v18 = vld [vmem:[%s3321_s1 + $0x4] sm:$0xf0]  ;;  %v1529_v19 = vor.u32 %v2132_v11, %v1528_v9 }
  0x25   :  { %878 = vmatpush.bf16.msra.mxu0 %v1481_v56  ;;  %v1656_v14 = vld [vmem:[%s3321_s1 + $0x190] sm:$0xf]  ;;  %v2164_v15 = vld [vmem:[%s3321_s1 + $0x194] sm:$0xf0]  ;;  %v1593_v20 = vor.u32 %v2148_v13, %v1592_v12  ;;  %v1520_v21 = vld [vmem:[%s3321_s1 + $0x80] sm:$0xf]  ;;  %v1457_v31 = vor.u32 %v2114_v18, %v1456_v17 }
  0x26   :  { %891 = vmatpush.bf16.msra.mxu1 %v1545_v57  ;;  %v2130_v22 = vld [vmem:[%s3321_s1 + $0x84] sm:$0xf0]  ;;  %v1584_v23 = vld [vmem:[%s3321_s1 + $0x100] sm:$0xf]  ;;  %v1657_v24 = vor.u32 %v2164_v15, %v1656_v14  ;;  %v1768_v28 = vld [vmem:[%s3321_s1 + $0x270] sm:$0xf] }
  0x27   :  { %904 = vmatpush.bf16.msra.mxu2 %v1609_v58  ;;  %v2146_v25 = vld [vmem:[%s3321_s1 + $0x104] sm:$0xf0]  ;;  %v1648_v26 = vld [vmem:[%s3321_s1 + $0x180] sm:$0xf]  ;;  %v2192_v29 = vld [vmem:[%s3321_s1 + $0x274] sm:$0xf0]  ;;  %v1521_v35 = vor.u32 %v2130_v22, %v1520_v21 }
  0x28   :  { %917 = vmatpush.bf16.msra.mxu3 %v1673_v62  ;;  %v2162_v27 = vld [vmem:[%s3321_s1 + $0x184] sm:$0xf0]  ;;  %v1832_v30 = vld [vmem:[%s3321_s1 + $0x2f0] sm:$0xf]  ;;  %v2208_v32 = vld [vmem:[%s3321_s1 + $0x2f4] sm:$0xf0]  ;;  %v1585_v36 = vor.u32 %v2146_v25, %v1584_v23  ;;  %v1769_v40 = vor.u32 %v2192_v29, %v1768_v28 }
  0x29   :  { %879 = vmatpush.bf16.msra.mxu0 %v1473_v4  ;;  %v1896_v33 = vld [vmem:[%s3321_s1 + $0x370] sm:$0xf]  ;;  %v2224_v34 = vld [vmem:[%s3321_s1 + $0x374] sm:$0xf0]  ;;  %v1649_v39 = vor.u32 %v2162_v27, %v1648_v26  ;;  %v1833_v41 = vor.u32 %v2208_v32, %v1832_v30  ;;  %v1760_v43 = vld [vmem:[%s3321_s1 + $0x260] sm:$0xf] }
  0x2a   :  { %892 = vmatpush.bf16.msra.mxu1 %v1537_v5  ;;  %v1960_v37 = vld [vmem:[%s3321_s1 + $0x3f0] sm:$0xf]  ;;  %v2240_v38 = vld [vmem:[%s3321_s1 + $0x3f4] sm:$0xf0]  ;;  %v1897_v42 = vor.u32 %v2224_v34, %v1896_v33  ;;  %v2190_v44 = vld [vmem:[%s3321_s1 + $0x264] sm:$0xf0] }
  0x2b   :  { %905 = vmatpush.bf16.msra.mxu2 %v1601_v6  ;;  %v1824_v45 = vld [vmem:[%s3321_s1 + $0x2e0] sm:$0xf]  ;;  %v1961_v46 = vor.u32 %v2240_v38, %v1960_v37  ;;  %v2206_v47 = vld [vmem:[%s3321_s1 + $0x2e4] sm:$0xf0]  ;;  %v86_v52 = vld [vmem:[%s3320_s0 + $0x10] sm:$0xff]  ;;  %v1761_v53 = vor.u32 %v2190_v44, %v1760_v43  ;;  %vm1246_vm0 = vcmask 1043456  }
  0x2c   :  { %918 = vmatpush.bf16.msra.mxu3 %v1665_v10  ;;  %v1888_v48 = vld [vmem:[%s3321_s1 + $0x360] sm:$0xf]  ;;  %v2222_v49 = vld [vmem:[%s3321_s1 + $0x364] sm:$0xf0]  ;;  %v1752_v54 = vld [vmem:[%s3321_s1 + $0x250] sm:$0xf]  ;;  %v2696_v57 = vpack.c.bf16 %v86_v52, %v86_v52  ;;  %v1825_v58 = vor.u32 %v2206_v47, %v1824_v45 }
  0x2d   :  { %880 = vmatpush.bf16.msra.mxu0 %v1465_v16  ;;  %v1952_v50 = vld [vmem:[%s3321_s1 + $0x3e0] sm:$0xf]  ;;  %v2238_v51 = vld [vmem:[%s3321_s1 + $0x3e4] sm:$0xf0]  ;;  %v2188_v55 = vld [vmem:[%s3321_s1 + $0x254] sm:$0xf0]  ;;  %v1889_v59 = vor.u32 %v2222_v49, %v1888_v48 }
  0x2e   :  { %893 = vmatpush.bf16.msra.mxu1 %v1529_v19  ;;  %v1816_v56 = vld [vmem:[%s3321_s1 + $0x2d0] sm:$0xf]  ;;  %v2204_v60 = vld [vmem:[%s3321_s1 + $0x2d4] sm:$0xf0]  ;;  %v1953_v63 = vor.u32 %v2238_v51, %v1952_v50  ;;  %v84_v0 = vld [vmem:[%s3320_s0] sm:$0xff]  ;;  %v1753_v8 = vor.u32 %v2188_v55, %v1752_v54  ;;  %vm1242_vm1 = vcmask 588800  }
  0x2f   :  { %906 = vmatpush.bf16.msra.mxu2 %v1593_v20  ;;  %v1880_v61 = vld [vmem:[%s3321_s1 + $0x350] sm:$0xf]  ;;  %v2220_v62 = vld [vmem:[%s3321_s1 + $0x354] sm:$0xf0]  ;;  %v85_v2 = vld [vmem:[%s3320_s0 + $0x8] sm:$0xff]  ;;  %v2723_v5 = vpack.c.bf16 %v84_v0, %v84_v0  ;;  %v1817_v9 = vor.u32 %v2204_v60, %v1816_v56  ;;  %vm1445_vm2 = vcmask 80896  }
  0x30   :  { %919 = vmatpush.bf16.msra.mxu3 %v1657_v24  ;;  %v87_v1 = vld [vmem:[%s3320_s0 + $0x18] sm:$0xff]  ;;  %v1944_v3 = vld [vmem:[%s3321_s1 + $0x3d0] sm:$0xf]  ;;  %v2727_v7 = vpack.c.bf16 %v85_v2, %v85_v2  ;;  %v1881_v10 = vor.u32 %v2220_v62, %v1880_v61  ;;  %v1744_v11 = vld [vmem:[%s3321_s1 + $0x240] sm:$0xf] }
  0x31   :  { %881 = vmatpush.bf16.msra.mxu0 %v1457_v31  ;;  %v2236_v4 = vld [vmem:[%s3321_s1 + $0x3d4] sm:$0xf0]  ;;  %v2725_v6 = vpack.c.bf16 %v87_v1, %v87_v1  ;;  %v2186_v12 = vld [vmem:[%s3321_s1 + $0x244] sm:$0xf0]  ;;  %v1808_v13 = vld [vmem:[%s3321_s1 + $0x2c0] sm:$0xf] }
  0x32   :  { %894 = vmatpush.bf16.msra.mxu1 %v1521_v35  ;;  %v1945_v14 = vor.u32 %v2236_v4, %v1944_v3  ;;  %v2202_v15 = vld [vmem:[%s3321_s1 + $0x2c4] sm:$0xf0]  ;;  %v1872_v16 = vld [vmem:[%s3321_s1 + $0x340] sm:$0xf]  ;;  %v1745_v20 = vor.u32 %v2186_v12, %v1744_v11  ;;  %v1736_v23 = vld [vmem:[%s3321_s1 + $0x230] sm:$0xf] }
  0x33   :  { %907 = vmatpush.bf16.msra.mxu2 %v1585_v36  ;;  %v2218_v17 = vld [vmem:[%s3321_s1 + $0x344] sm:$0xf0]  ;;  %v1936_v18 = vld [vmem:[%s3321_s1 + $0x3c0] sm:$0xf]  ;;  %v1809_v21 = vor.u32 %v2202_v15, %v1808_v13  ;;  %v2184_v24 = vld [vmem:[%s3321_s1 + $0x234] sm:$0xf0] }
  0x34   :  { %920 = vmatpush.bf16.msra.mxu3 %v1649_v39  ;;  %882 = vmatmul.bf16.vlgmr.msra.gmra.mxu0 %v2723_v5  ;;  %v2234_v19 = vld [vmem:[%s3321_s1 + $0x3c4] sm:$0xf0]  ;;  %v1873_v22 = vor.u32 %v2218_v17, %v1872_v16  ;;  %v1800_v25 = vld [vmem:[%s3321_s1 + $0x2b0] sm:$0xf]  ;;  %v2200_v27 = vld [vmem:[%s3321_s1 + $0x2b4] sm:$0xf0]  ;;  %v1737_v32 = vor.u32 %v2184_v24, %v1736_v23 }
  0x35   :  { %926 = vmatpush.bf16.msrb.mxu0 %v1769_v40  ;;  %895 = vmatmul.bf16.vlgmr.msra.gmra.mxu1 %v2727_v7  ;;  %v1937_v26 = vor.u32 %v2234_v19, %v1936_v18  ;;  %v1864_v28 = vld [vmem:[%s3321_s1 + $0x330] sm:$0xf]  ;;  %v2216_v29 = vld [vmem:[%s3321_s1 + $0x334] sm:$0xf0]  ;;  %v1801_v33 = vor.u32 %v2200_v27, %v1800_v25  ;;  %v1728_v35 = vld [vmem:[%s3321_s1 + $0x220] sm:$0xf] }
  0x36   :  { %939 = vmatpush.bf16.msrb.mxu1 %v1833_v41  ;;  %908 = vmatmul.bf16.vlgmr.msra.gmra.mxu2 %v2696_v57  ;;  %v1928_v30 = vld [vmem:[%s3321_s1 + $0x3b0] sm:$0xf]  ;;  %v2232_v31 = vld [vmem:[%s3321_s1 + $0x3b4] sm:$0xf0]  ;;  %v1865_v34 = vor.u32 %v2216_v29, %v1864_v28  ;;  %v2182_v36 = vld [vmem:[%s3321_s1 + $0x224] sm:$0xf0] }
  0x37   :  { %952 = vmatpush.bf16.msrb.mxu2 %v1897_v42  ;;  %921 = vmatmul.bf16.vlgmr.msra.gmra.mxu3 %v2725_v6  ;;  %v1792_v37 = vld [vmem:[%s3321_s1 + $0x2a0] sm:$0xf]  ;;  %v1929_v38 = vor.u32 %v2232_v31, %v1928_v30  ;;  %v2198_v39 = vld [vmem:[%s3321_s1 + $0x2a4] sm:$0xf0]  ;;  %v1729_v44 = vor.u32 %v2182_v36, %v1728_v35  ;;  %v1720_v47 = vld [vmem:[%s3321_s1 + $0x210] sm:$0xf] }
  0x38   :  { %965 = vmatpush.bf16.msrb.mxu3 %v1961_v46  ;;  %v1856_v40 = vld [vmem:[%s3321_s1 + $0x320] sm:$0xf]  ;;  %v2214_v41 = vld [vmem:[%s3321_s1 + $0x324] sm:$0xf0]  ;;  %v1793_v45 = vor.u32 %v2198_v39, %v1792_v37  ;;  %v2180_v48 = vld [vmem:[%s3321_s1 + $0x214] sm:$0xf0] }
  0x39   :  { %927 = vmatpush.bf16.msrb.mxu0 %v1761_v53  ;;  %v1920_v42 = vld [vmem:[%s3321_s1 + $0x3a0] sm:$0xf]  ;;  %v2230_v43 = vld [vmem:[%s3321_s1 + $0x3a4] sm:$0xf0]  ;;  %v1857_v46 = vor.u32 %v2214_v41, %v1856_v40  ;;  %v1784_v49 = vld [vmem:[%s3321_s1 + $0x290] sm:$0xf]  ;;  %v1721_v56 = vor.u32 %v2180_v48, %v1720_v47 }
  0x3a   :  { %940 = vmatpush.bf16.msrb.mxu1 %v1825_v58  ;;  %v1921_v50 = vor.u32 %v2230_v43, %v1920_v42  ;;  %v2196_v51 = vld [vmem:[%s3321_s1 + $0x294] sm:$0xf0]  ;;  %v1848_v52 = vld [vmem:[%s3321_s1 + $0x310] sm:$0xf]  ;;  %v1712_v58 = vld [vmem:[%s3321_s1 + $0x200] sm:$0xf] }
  0x3b   :  { %953 = vmatpush.bf16.msrb.mxu2 %v1889_v59  ;;  %v2212_v53 = vld [vmem:[%s3321_s1 + $0x314] sm:$0xf0]  ;;  %v1912_v54 = vld [vmem:[%s3321_s1 + $0x390] sm:$0xf]  ;;  %v2178_v59 = vld [vmem:[%s3321_s1 + $0x204] sm:$0xf0]  ;;  %v1785_v60 = vor.u32 %v2196_v51, %v1784_v49 }
  0x3c   :  { %966 = vmatpush.bf16.msrb.mxu3 %v1953_v63  ;;  %v2228_v55 = vld [vmem:[%s3321_s1 + $0x394] sm:$0xf0]  ;;  %v1849_v61 = vor.u32 %v2212_v53, %v1848_v52  ;;  %v1776_v62 = vld [vmem:[%s3321_s1 + $0x280] sm:$0xf]  ;;  %v2194_v63 = vld [vmem:[%s3321_s1 + $0x284] sm:$0xf0]  ;;  %v1713_v11 = vor.u32 %v2178_v59, %v1712_v58 }
  0x3d   :  { %928 = vmatpush.bf16.msrb.mxu0 %v1753_v8  ;;  %v1840_v0 = vld [vmem:[%s3321_s1 + $0x300] sm:$0xf]  ;;  %v1913_v1 = vor.u32 %v2228_v55, %v1912_v54  ;;  %v2210_v2 = vld [vmem:[%s3321_s1 + $0x304] sm:$0xf0]  ;;  %v2127_v8 = vld [vmem:[%s3321_s1 + $0x74] sm:$0xf]  ;;  %v1777_v15 = vor.u32 %v2194_v63, %v1776_v62 }
  0x3e   :  { %941 = vmatpush.bf16.msrb.mxu1 %v1817_v9  ;;  %v1904_v3 = vld [vmem:[%s3321_s1 + $0x380] sm:$0xf]  ;;  %v2226_v4 = vld [vmem:[%s3321_s1 + $0x384] sm:$0xf0]  ;;  %v1514_v9 = vld [vmem:[%s3321_s1 + $0x78] sm:$0xf0]  ;;  %v1841_v16 = vor.u32 %v2210_v2, %v1840_v0 }
  0x3f   :  { %954 = vmatpush.bf16.msrb.mxu2 %v1881_v10  ;;  %v2143_v10 = vld [vmem:[%s3321_s1 + $0xf4] sm:$0xf]  ;;  %v1578_v12 = vld [vmem:[%s3321_s1 + $0xf8] sm:$0xf0]  ;;  %v2125_v24 = vld [vmem:[%s3321_s1 + $0x64] sm:$0xf] }
  0x40   :  { %967 = vmatpush.bf16.msrb.mxu3 %v1945_v14  ;;  %v2159_v13 = vld [vmem:[%s3321_s1 + $0x174] sm:$0xf]  ;;  %v1642_v14 = vld [vmem:[%s3321_s1 + $0x178] sm:$0xf0]  ;;  %v1581_v25 = vor.u32 %v2143_v10, %v1578_v12  ;;  %v1506_v27 = vld [vmem:[%s3321_s1 + $0x68] sm:$0xf0] }
  0x41   :  { %929 = vmatpush.bf16.msrb.mxu0 %v1745_v20  ;;  %v2175_v17 = vld [vmem:[%s3321_s1 + $0x1f4] sm:$0xf]  ;;  %v1706_v18 = vld [vmem:[%s3321_s1 + $0x1f8] sm:$0xf0]  ;;  %v1905_v20 = vor.u32 %v2226_v4, %v1904_v3  ;;  %v2141_v28 = vld [vmem:[%s3321_s1 + $0xe4] sm:$0xf]  ;;  %v1509_v39 = vor.u32 %v2125_v24, %v1506_v27 }
  0x42   :  { %942 = vmatpush.bf16.msrb.mxu1 %v1809_v21  ;;  %v90_v19 = vld [vmem:[%s3320_s0 + $0x30] sm:$0xff]  ;;  %v1517_v21 = vor.u32 %v2127_v8, %v1514_v9  ;;  %v91_v23 = vld [vmem:[%s3320_s0 + $0x38] sm:$0xff]  ;;  %v89_v29 = vld [vmem:[%s3320_s0 + $0x28] sm:$0xff]  ;;  %v1709_v30 = vor.u32 %v2175_v17, %v1706_v18 }
  0x43   :  { %955 = vmatpush.bf16.msrb.mxu2 %v1873_v22  ;;  %v88_v22 = vld [vmem:[%s3320_s0 + $0x20] sm:$0xff]  ;;  %v2897_v31 = vpack.c.bf16 %v90_v19, %v90_v19  ;;  %v2910_v36 = vpack.c.bf16 %v91_v23, %v91_v23  ;;  %v2918_v40 = vpack.c.bf16 %v89_v29, %v89_v29  ;;  %v2123_v43 = vld [vmem:[%s3321_s1 + $0x54] sm:$0xf]  ;;  %v1562_v47 = vld [vmem:[%s3321_s1 + $0xd8] sm:$0xf0] }
  0x44   :  { %968 = vmatpush.bf16.msrb.mxu3 %v1937_v26  ;;  %v1645_v26 = vor.u32 %v2159_v13, %v1642_v14  ;;  %v2908_v35 = vpack.c.bf16 %v88_v22, %v88_v22  ;;  %v2173_v37 = vld [vmem:[%s3321_s1 + $0x1e4] sm:$0xf]  ;;  %v2155_v48 = vld [vmem:[%s3321_s1 + $0x154] sm:$0xf]  ;;  %v1626_v49 = vld [vmem:[%s3321_s1 + $0x158] sm:$0xf0] }
  0x45   :  { %930 = vmatpush.bf16.msrb.mxu0 %v1737_v32  ;;  %v1570_v32 = vld [vmem:[%s3321_s1 + $0xe8] sm:$0xf0]  ;;  %v1690_v51 = vld [vmem:[%s3321_s1 + $0x1d8] sm:$0xf0]  ;;  %v1629_v54 = vor.u32 %v2155_v48, %v1626_v49  ;;  %v2121_v55 = vld [vmem:[%s3321_s1 + $0x44] sm:$0xf] }
  0x46   :  { %943 = vmatpush.bf16.msrb.mxu1 %v1801_v33  ;;  %v2157_v33 = vld [vmem:[%s3321_s1 + $0x164] sm:$0xf]  ;;  %v1573_v41 = vor.u32 %v2141_v28, %v1570_v32  ;;  %v1618_v62 = vld [vmem:[%s3321_s1 + $0x148] sm:$0xf0]  ;;  %v2119_v4 = vld [vmem:[%s3321_s1 + $0x34] sm:$0xf] }
  0x47   :  { %956 = vmatpush.bf16.msrb.mxu2 %v1865_v34  ;;  %v1634_v34 = vld [vmem:[%s3321_s1 + $0x168] sm:$0xf0]  ;;  %v2137_v58 = vld [vmem:[%s3321_s1 + $0xc4] sm:$0xf]  ;;  %v1482_v8 = vld [vmem:[%s3321_s1 + $0x38] sm:$0xf0] }
  0x48   :  { %969 = vmatpush.bf16.msrb.mxu3 %v1929_v38  ;;  %v1698_v38 = vld [vmem:[%s3321_s1 + $0x1e8] sm:$0xf0]  ;;  %v1637_v42 = vor.u32 %v2157_v33, %v1634_v34  ;;  %v2169_v63 = vld [vmem:[%s3321_s1 + $0x1c4] sm:$0xf]  ;;  %v2135_v9 = vld [vmem:[%s3321_s1 + $0xb4] sm:$0xf] }
  0x49   :  { %931 = vmatpush.bf16.msrb.mxu0 %v1729_v44  ;;  %v1498_v44 = vld [vmem:[%s3321_s1 + $0x58] sm:$0xf0]  ;;  %v1682_v0 = vld [vmem:[%s3321_s1 + $0x1c8] sm:$0xf0]  ;;  %v2151_v12 = vld [vmem:[%s3321_s1 + $0x134] sm:$0xf] }
  0x4a   :  { %944 = vmatpush.bf16.msrb.mxu1 %v1793_v45  ;;  %v2139_v45 = vld [vmem:[%s3321_s1 + $0xd4] sm:$0xf]  ;;  %v1501_v52 = vor.u32 %v2123_v43, %v1498_v44  ;;  %v1685_v10 = vor.u32 %v2169_v63, %v1682_v0  ;;  %v1610_v13 = vld [vmem:[%s3321_s1 + $0x138] sm:$0xf0]  ;;  %v2117_v19 = vld [vmem:[%s3321_s1 + $0x24] sm:$0xf] }
  0x4b   :  { %957 = vmatpush.bf16.msrb.mxu2 %v1857_v46  ;;  %v1701_v46 = vor.u32 %v2173_v37, %v1698_v38  ;;  %v1565_v53 = vor.u32 %v2139_v45, %v1562_v47  ;;  %v2167_v14 = vld [vmem:[%s3321_s1 + $0x1b4] sm:$0xf]  ;;  %v1613_v18 = vor.u32 %v2151_v12, %v1610_v13  ;;  %v1538_v23 = vld [vmem:[%s3321_s1 + $0xa8] sm:$0xf0]  ;;  %v2149_v24 = vld [vmem:[%s3321_s1 + $0x124] sm:$0xf] }
  0x4c   :  { %970 = vmatpush.bf16.msrb.mxu3 %v1921_v50  ;;  %v2171_v50 = vld [vmem:[%s3321_s1 + $0x1d4] sm:$0xf]  ;;  %v1666_v27 = vld [vmem:[%s3321_s1 + $0x1a8] sm:$0xf0]  ;;  %v1466_v33 = vld [vmem:[%s3321_s1 + $0x18] sm:$0xf0] }
  0x4d   :  { %932 = vmatpush.bf16.msrb.mxu0 %v1721_v56  ;;  %v1490_v56 = vld [vmem:[%s3321_s1 + $0x48] sm:$0xf0]  ;;  %v1693_v59 = vor.u32 %v2171_v50, %v1690_v51  ;;  %v2115_v32 = vld [vmem:[%s3321_s1 + $0x14] sm:$0xf]  ;;  %v1530_v38 = vld [vmem:[%s3321_s1 + $0x98] sm:$0xf0] }
  0x4e   :  { %945 = vmatpush.bf16.msrb.mxu1 %v1785_v60  ;;  %v1554_v60 = vld [vmem:[%s3321_s1 + $0xc8] sm:$0xf0]  ;;  %v2131_v34 = vld [vmem:[%s3321_s1 + $0x94] sm:$0xf]  ;;  %v1658_v43 = vld [vmem:[%s3321_s1 + $0x198] sm:$0xf0]  ;;  %v1469_v44 = vor.u32 %v2115_v32, %v1466_v33 }
  0x4f   :  { %958 = vmatpush.bf16.msrb.mxu2 %v1849_v61  ;;  %v2153_v61 = vld [vmem:[%s3321_s1 + $0x144] sm:$0xf]  ;;  %v1557_v2 = vor.u32 %v2137_v58, %v1554_v60  ;;  %v1533_v47 = vor.u32 %v2131_v34, %v1530_v38  ;;  %v1522_v50 = vld [vmem:[%s3321_s1 + $0x88] sm:$0xf0]  ;;  %v1770_v58 = vld [vmem:[%s3321_s1 + $0x278] sm:$0xf0] }
  0x50   :  { %971 = vmatpush.bf16.msrb.mxu3 %v1913_v1  ;;  %v1493_v1 = vor.u32 %v2121_v55, %v1490_v56  ;;  %v1621_v3 = vor.u32 %v2153_v61, %v1618_v62  ;;  %v2113_v45 = vld [vmem:[%s3321_s1 + $0x4] sm:$0xf]  ;;  %v1650_v55 = vld [vmem:[%s3321_s1 + $0x188] sm:$0xf0]  ;;  %v2191_v56 = vld [vmem:[%s3321_s1 + $0x274] sm:$0xf] }
  0x51   :  { %933 = vmatpush.bf16.msrb.mxu0 %v1713_v11  ;;  %v1546_v11 = vld [vmem:[%s3321_s1 + $0xb8] sm:$0xf0]  ;;  %v2129_v49 = vld [vmem:[%s3321_s1 + $0x84] sm:$0xf]  ;;  %v2223_v62 = vld [vmem:[%s3321_s1 + $0x374] sm:$0xf] }
  0x52   :  { %946 = vmatpush.bf16.msrb.mxu1 %v1777_v15  ;;  %v1674_v15 = vld [vmem:[%s3321_s1 + $0x1b8] sm:$0xf0]  ;;  %v1549_v17 = vor.u32 %v2135_v9, %v1546_v11  ;;  %v2145_v51 = vld [vmem:[%s3321_s1 + $0x104] sm:$0xf]  ;;  %v1525_v0 = vor.u32 %v2129_v49, %v1522_v50  ;;  %v1762_v12 = vld [vmem:[%s3321_s1 + $0x268] sm:$0xf0] }
  0x53   :  { %959 = vmatpush.bf16.msrb.mxu2 %v1841_v16  ;;  %v1485_v16 = vor.u32 %v2119_v4, %v1482_v8  ;;  %v1677_v22 = vor.u32 %v2167_v14, %v1674_v15  ;;  %v1834_v61 = vld [vmem:[%s3321_s1 + $0x2f8] sm:$0xf0]  ;;  %v1773_v8 = vor.u32 %v2191_v56, %v1770_v58  ;;  %v2189_v11 = vld [vmem:[%s3321_s1 + $0x264] sm:$0xf]  ;;  %v1826_v15 = vld [vmem:[%s3321_s1 + $0x2e8] sm:$0xf0] }
  0x54   :  { %972 = vmatpush.bf16.msrb.mxu3 %v1905_v20  ;;  %934 = vmatmul.bf16.vlgmr.msrb.gmra.mxu0 %v2908_v35  ;;  %v1474_v20 = vld [vmem:[%s3321_s1 + $0x28] sm:$0xf0]  ;;  %v1898_v63 = vld [vmem:[%s3321_s1 + $0x378] sm:$0xf0]  ;;  %v2205_v13 = vld [vmem:[%s3321_s1 + $0x2e4] sm:$0xf] }
  0x55   :  { %978 = vmatpush.bf16.msra.mxu0 %v1517_v21  ;;  %947 = vmatmul.bf16.vlgmr.msrb.gmra.mxu1 %v2918_v40  ;;  %v2133_v21 = vld [vmem:[%s3321_s1 + $0xa4] sm:$0xf]  ;;  %v1477_v28 = vor.u32 %v2117_v19, %v1474_v20  ;;  %v1954_v19 = vld [vmem:[%s3321_s1 + $0x3e8] sm:$0xf0]  ;;  %v1765_v20 = vor.u32 %v2189_v11, %v1762_v12  ;;  %v2199_v49 = vld [vmem:[%s3321_s1 + $0x2b4] sm:$0xf] }
  0x56   :  { %991 = vmatpush.bf16.msra.mxu1 %v1581_v25  ;;  %960 = vmatmul.bf16.vlgmr.msrb.gmra.mxu2 %v2897_v31  ;;  %v1602_v25 = vld [vmem:[%s3321_s1 + $0x128] sm:$0xf0]  ;;  %v1541_v29 = vor.u32 %v2133_v21, %v1538_v23  ;;  %v1829_v21 = vor.u32 %v2205_v13, %v1826_v15  ;;  %v2187_v23 = vld [vmem:[%s3321_s1 + $0x254] sm:$0xf]  ;;  %v1722_v12 = vld [vmem:[%s3321_s1 + $0x218] sm:$0xf0] }
  0x57   :  { %1004 = vmatpush.bf16.msra.mxu2 %v1645_v26  ;;  %973 = vmatmul.bf16.vlgmr.msrb.gmra.mxu3 %v2910_v36  ;;  %v2165_v26 = vld [vmem:[%s3321_s1 + $0x1a4] sm:$0xf]  ;;  %v1746_v38 = vld [vmem:[%s3321_s1 + $0x248] sm:$0xf0]  ;;  %v2179_v11 = vld [vmem:[%s3321_s1 + $0x214] sm:$0xf] }
  0x58   :  { %1017 = vmatpush.bf16.msra.mxu3 %v1709_v30  ;;  %v1605_v30 = vor.u32 %v2149_v24, %v1602_v25  ;;  %v1669_v37 = vor.u32 %v2165_v26, %v1666_v27  ;;  %v1754_v24 = vld [vmem:[%s3321_s1 + $0x258] sm:$0xf0]  ;;  %v2203_v25 = vld [vmem:[%s3321_s1 + $0x2d4] sm:$0xf] }
  0x59   :  { %979 = vmatpush.bf16.msra.mxu0 %v1509_v39  ;;  %v2147_v39 = vld [vmem:[%s3321_s1 + $0x114] sm:$0xf]  ;;  %v1818_v27 = vld [vmem:[%s3321_s1 + $0x2d8] sm:$0xf0]  ;;  %v1757_v32 = vor.u32 %v2187_v23, %v1754_v24  ;;  %v1714_v24 = vld [vmem:[%s3321_s1 + $0x208] sm:$0xf0] }
  0x5a   :  { %992 = vmatpush.bf16.msra.mxu1 %v1573_v41  ;;  %v1594_v41 = vld [vmem:[%s3321_s1 + $0x118] sm:$0xf0]  ;;  %v1821_v33 = vor.u32 %v2203_v25, %v1818_v27  ;;  %v2195_v13 = vld [vmem:[%s3321_s1 + $0x294] sm:$0xf]  ;;  %v2193_v25 = vld [vmem:[%s3321_s1 + $0x284] sm:$0xf] }
  0x5b   :  { %1005 = vmatpush.bf16.msra.mxu2 %v1637_v42  ;;  %v2163_v42 = vld [vmem:[%s3321_s1 + $0x194] sm:$0xf]  ;;  %v1597_v48 = vor.u32 %v2147_v39, %v1594_v41  ;;  %v2217_v39 = vld [vmem:[%s3321_s1 + $0x344] sm:$0xf]  ;;  %v1874_v41 = vld [vmem:[%s3321_s1 + $0x348] sm:$0xf0] }
  0x5c   :  { %1018 = vmatpush.bf16.msra.mxu3 %v1701_v46  ;;  %v1458_v46 = vld [vmem:[%s3321_s1 + $0x8] sm:$0xf0]  ;;  %v1786_v15 = vld [vmem:[%s3321_s1 + $0x298] sm:$0xf0] }
  0x5d   :  { %980 = vmatpush.bf16.msra.mxu0 %v1501_v52  ;;  %v1661_v52 = vor.u32 %v2163_v42, %v1658_v43  ;;  %v1461_v60 = vor.u32 %v2113_v45, %v1458_v46  ;;  %v2233_v42 = vld [vmem:[%s3321_s1 + $0x3c4] sm:$0xf]  ;;  %v1938_v43 = vld [vmem:[%s3321_s1 + $0x3c8] sm:$0xf0]  ;;  %v1877_v46 = vor.u32 %v2217_v39, %v1874_v41 }
  0x5e   :  { %993 = vmatpush.bf16.msra.mxu1 %v1565_v53  ;;  %v1586_v53 = vld [vmem:[%s3321_s1 + $0x108] sm:$0xf0]  ;;  %v1941_v50 = vor.u32 %v2233_v42, %v1938_v43  ;;  %v2016_v42 = vld [vmem:[#allocation4 + $0x60] sm:$0xf] }
  0x5f   :  { %1006 = vmatpush.bf16.msra.mxu2 %v1629_v54  ;;  %v2161_v54 = vld [vmem:[%s3321_s1 + $0x184] sm:$0xf]  ;;  %v2254_v43 = vld [vmem:[#allocation4 + $0x64] sm:$0xf0] }
  0x60   :  { %1019 = vmatpush.bf16.msra.mxu3 %v1693_v59  ;;  %v2207_v59 = vld [vmem:[%s3321_s1 + $0x2f4] sm:$0xf]  ;;  %v1653_v4 = vor.u32 %v2161_v54, %v1650_v55  ;;  %v1930_v55 = vld [vmem:[%s3321_s1 + $0x3b8] sm:$0xf0] }
  0x61   :  { %981 = vmatpush.bf16.msra.mxu0 %v1493_v1  ;;  %v1589_v1 = vor.u32 %v2145_v51, %v1586_v53  ;;  %v1837_v9 = vor.u32 %v2207_v59, %v1834_v61  ;;  %v1802_v51 = vld [vmem:[%s3321_s1 + $0x2b8] sm:$0xf0]  ;;  %v2231_v54 = vld [vmem:[%s3321_s1 + $0x3b4] sm:$0xf]  ;;  %v1730_v61 = vld [vmem:[%s3321_s1 + $0x228] sm:$0xf0] }
  0x62   :  { %994 = vmatpush.bf16.msra.mxu1 %v1557_v2  ;;  %v2239_v2 = vld [vmem:[%s3321_s1 + $0x3f4] sm:$0xf]  ;;  %v1866_v53 = vld [vmem:[%s3321_s1 + $0x338] sm:$0xf0]  ;;  %v1805_v58 = vor.u32 %v2199_v49, %v1802_v51 }
  0x63   :  { %1007 = vmatpush.bf16.msra.mxu2 %v1621_v3  ;;  %v1962_v3 = vld [vmem:[%s3321_s1 + $0x3f8] sm:$0xf0] }
  0x64   :  { %1020 = vmatpush.bf16.msra.mxu3 %v1685_v10  ;;  %v1901_v10 = vor.u32 %v2223_v62, %v1898_v63  ;;  %v1965_v14 = vor.u32 %v2239_v2, %v1962_v3  ;;  %v2197_v62 = vld [vmem:[%s3321_s1 + $0x2a4] sm:$0xf]  ;;  %v1933_v63 = vor.u32 %v2231_v54, %v1930_v55  ;;  %v1858_v2 = vld [vmem:[%s3321_s1 + $0x328] sm:$0xf0]  ;;  %v2252_v49 = vld [vmem:[#allocation4 + $0x54] sm:$0xf0] }
  0x65   :  { %982 = vmatpush.bf16.msra.mxu0 %v1485_v16  ;;  %v2221_v16 = vld [vmem:[%s3321_s1 + $0x364] sm:$0xf] }
  0x66   :  { %995 = vmatpush.bf16.msra.mxu1 %v1549_v17  ;;  %v1890_v17 = vld [vmem:[%s3321_s1 + $0x368] sm:$0xf0]  ;;  %v2229_v3 = vld [vmem:[%s3321_s1 + $0x3a4] sm:$0xf] }
  0x67   :  { %1008 = vmatpush.bf16.msra.mxu2 %v1613_v18  ;;  %v2237_v18 = vld [vmem:[%s3321_s1 + $0x3e4] sm:$0xf] }
  0x68   :  { %1021 = vmatpush.bf16.msra.mxu3 %v1677_v22  ;;  %v1893_v22 = vor.u32 %v2221_v16, %v1890_v17  ;;  %v1957_v26 = vor.u32 %v2237_v18, %v1954_v19  ;;  %v2211_v16 = vld [vmem:[%s3321_s1 + $0x314] sm:$0xf]  ;;  %v1850_v17 = vld [vmem:[%s3321_s1 + $0x318] sm:$0xf0]  ;;  %v2249_v54 = vld [vmem:[#allocation4 + $0x44] sm:$0xf] }
  0x69   :  { %983 = vmatpush.bf16.msra.mxu0 %v1477_v28  ;;  %v2219_v28 = vld [vmem:[%s3321_s1 + $0x354] sm:$0xf]  ;;  %v1914_v19 = vld [vmem:[%s3321_s1 + $0x398] sm:$0xf0]  ;;  %v1853_v23 = vor.u32 %v2211_v16, %v1850_v17  ;;  %v3268_v17 = vld [vmem:[#allocation2] sm:$0x3] }
  0x6a   :  { %996 = vmatpush.bf16.msra.mxu1 %v1541_v29  ;;  %v1882_v29 = vld [vmem:[%s3321_s1 + $0x358] sm:$0xf0]  ;;  %v2227_v18 = vld [vmem:[%s3321_s1 + $0x394] sm:$0xf] }
  0x6b   :  { %1009 = vmatpush.bf16.msra.mxu2 %v1605_v30  ;;  %v2235_v30 = vld [vmem:[%s3321_s1 + $0x3d4] sm:$0xf]  ;;  %v1885_v34 = vor.u32 %v2219_v28, %v1882_v29  ;;  %v1917_v27 = vor.u32 %v2227_v18, %v1914_v19  ;;  %v2209_v28 = vld [vmem:[%s3321_s1 + $0x304] sm:$0xf]  ;;  %v1842_v29 = vld [vmem:[%s3321_s1 + $0x308] sm:$0xf0] }
  0x6c   :  { %1022 = vmatpush.bf16.msra.mxu3 %v1669_v37  ;;  %v2185_v37 = vld [vmem:[%s3321_s1 + $0x244] sm:$0xf]  ;;  %v2242_v19 = vld [vmem:[#allocation4 + $0x4] sm:$0xf0] }
  0x6d   :  { %984 = vmatpush.bf16.msra.mxu0 %v1469_v44  ;;  %v1749_v44 = vor.u32 %v2185_v37, %v1746_v38  ;;  %v2255_v37 = vld [vmem:[#allocation4 + $0x74] sm:$0xf]  ;;  %v2026_v38 = vld [vmem:[#allocation4 + $0x78] sm:$0xf0]  ;;  %v1968_v18 = vld [vmem:[#allocation4] sm:$0xf] }
  0x6e   :  { %997 = vmatpush.bf16.msra.mxu1 %v1533_v47  ;;  %v2183_v47 = vld [vmem:[%s3321_s1 + $0x234] sm:$0xf]  ;;  %v2029_v41 = vor.u32 %v2255_v37, %v2026_v38 }
  0x6f   :  { %1010 = vmatpush.bf16.msra.mxu2 %v1597_v48  ;;  %v1738_v48 = vld [vmem:[%s3321_s1 + $0x238] sm:$0xf0] }
  0x70   :  { %1023 = vmatpush.bf16.msra.mxu3 %v1661_v52  ;;  %v2215_v52 = vld [vmem:[%s3321_s1 + $0x334] sm:$0xf]  ;;  %v1741_v56 = vor.u32 %v2183_v47, %v1738_v48 }
  0x71   :  { %985 = vmatpush.bf16.msra.mxu0 %v1461_v60  ;;  %v1869_v59 = vor.u32 %v2215_v52, %v1866_v53  ;;  %v2181_v60 = vld [vmem:[%s3321_s1 + $0x224] sm:$0xf]  ;;  %v2008_v48 = vld [vmem:[#allocation4 + $0x50] sm:$0xf]  ;;  %v2250_v53 = vld [vmem:[#allocation4 + $0x44] sm:$0xf0] }
  0x72   :  { %998 = vmatpush.bf16.msra.mxu1 %v1525_v0  ;;  %v1794_v0 = vld [vmem:[%s3321_s1 + $0x2a8] sm:$0xf0]  ;;  %v2009_v51 = vor.u32 %v2252_v49, %v2008_v48  ;;  %v2000_v52 = vld [vmem:[#allocation4 + $0x40] sm:$0xf] }
  0x73   :  { %1011 = vmatpush.bf16.msra.mxu2 %v1589_v1  ;;  %v2213_v1 = vld [vmem:[%s3321_s1 + $0x324] sm:$0xf] }
  0x74   :  { %1024 = vmatpush.bf16.msra.mxu3 %v1653_v4  ;;  %986 = vmatmul.bf16.vlgmr.msra.gmra.mxu0 %v2723_v5  ;;  %v2201_v5 = vld [vmem:[%s3321_s1 + $0x2c4] sm:$0xf]  ;;  %v1922_v4 = vld [vmem:[%s3321_s1 + $0x3a8] sm:$0xf0] }
  0x75   :  { %1030 = vmatpush.bf16.msrb.mxu0 %v1773_v8  ;;  %999 = vmatmul.bf16.vlgmr.msra.gmra.mxu1 %v2727_v7  ;;  %v1810_v7 = vld [vmem:[%s3321_s1 + $0x2c8] sm:$0xf0]  ;;  %v1733_v8 = vor.u32 %v2181_v60, %v1730_v61  ;;  %v1994_v61 = vld [vmem:[#allocation4 + $0x38] sm:$0xf0] }
  0x76   :  { %1043 = vmatpush.bf16.msrb.mxu1 %v1837_v9  ;;  %1012 = vmatmul.bf16.vlgmr.msra.gmra.mxu2 %v2696_v57  ;;  %v1946_v57 = vld [vmem:[%s3321_s1 + $0x3d8] sm:$0xf0]  ;;  %v1813_v45 = vor.u32 %v2201_v5, %v1810_v7  ;;  %v1797_v9 = vor.u32 %v2197_v62, %v1794_v0  ;;  %v2246_v0 = vld [vmem:[#allocation4 + $0x24] sm:$0xf0] }
  0x77   :  { %1056 = vmatpush.bf16.msrb.mxu2 %v1901_v10  ;;  %1025 = vmatmul.bf16.vlgmr.msra.gmra.mxu3 %v2725_v6  ;;  %v1949_v6 = vor.u32 %v2235_v30, %v1946_v57  ;;  %v1861_v10 = vor.u32 %v2213_v1, %v1858_v2  ;;  %v2225_v30 = vld [vmem:[%s3321_s1 + $0x384] sm:$0xf]  ;;  %v1906_v57 = vld [vmem:[%s3321_s1 + $0x388] sm:$0xf0] }
  0x78   :  { %1069 = vmatpush.bf16.msrb.mxu3 %v1965_v14  ;;  %v1925_v14 = vor.u32 %v2229_v3, %v1922_v4  ;;  %v1909_v7 = vor.u32 %v2225_v30, %v1906_v57  ;;  %v2245_v1 = vld [vmem:[#allocation4 + $0x24] sm:$0xf]  ;;  %v1986_v3 = vld [vmem:[#allocation4 + $0x28] sm:$0xf0] }
  0x79   :  { %1031 = vmatpush.bf16.msrb.mxu0 %v1765_v20  ;;  %v1725_v20 = vor.u32 %v2179_v11, %v1722_v12  ;;  %v1976_v11 = vld [vmem:[#allocation4 + $0x10] sm:$0xf]  ;;  %v2244_v12 = vld [vmem:[#allocation4 + $0x14] sm:$0xf0] }
  0x7a   :  { %1044 = vmatpush.bf16.msrb.mxu1 %v1829_v21  ;;  %v2177_v21 = vld [vmem:[%s3321_s1 + $0x204] sm:$0xf] }
  0x7b   :  { %1057 = vmatpush.bf16.msrb.mxu2 %v1893_v22  ;;  %v1789_v22 = vor.u32 %v2195_v13, %v1786_v15  ;;  %v2243_v13 = vld [vmem:[#allocation4 + $0x14] sm:$0xf]  ;;  %v1978_v15 = vld [vmem:[#allocation4 + $0x18] sm:$0xf0] }
  0x7c   :  { %1070 = vmatpush.bf16.msrb.mxu3 %v1957_v26  ;;  %v1778_v26 = vld [vmem:[%s3321_s1 + $0x288] sm:$0xf0]  ;;  %v1981_v16 = vor.u32 %v2243_v13, %v1978_v15  ;;  %v2032_v13 = vld [vmem:[#allocation4 + $0x80] sm:$0xf]  ;;  %v2257_v15 = vld [vmem:[#allocation4 + $0x84] sm:$0xf] }
  0x7d   :  { %1032 = vmatpush.bf16.msrb.mxu0 %v1757_v32  ;;  %v2024_v32 = vld [vmem:[#allocation4 + $0x70] sm:$0xf]  ;;  %v1781_v5 = vor.u32 %v2193_v25, %v1778_v26 }
  0x7e   :  { %1045 = vmatpush.bf16.msrb.mxu1 %v1821_v33  ;;  %v2256_v33 = vld [vmem:[#allocation4 + $0x74] sm:$0xf0] }
  0x7f   :  { %1058 = vmatpush.bf16.msrb.mxu2 %v1885_v34  ;;  %v1717_v34 = vor.u32 %v2177_v21, %v1714_v24  ;;  %v2025_v39 = vor.u32 %v2256_v33, %v2024_v32  ;;  %v230_v24 = vperm.slane %v3268_v17, 0 }
  0x80   :  { %1071 = vmatpush.bf16.msrb.mxu3 %v1949_v6  ;;  %v1845_v6 = vor.u32 %v2209_v28, %v1842_v29 }
  0x81   :  { %1033 = vmatpush.bf16.msrb.mxu0 %v1749_v44  ;;  %v2253_v44 = vld [vmem:[#allocation4 + $0x64] sm:$0xf] }
  0x82   :  { %1046 = vmatpush.bf16.msrb.mxu1 %v1813_v45  ;;  %v2017_v45 = vor.u32 %v2254_v43, %v2016_v42 }
  0x83   :  { %1059 = vmatpush.bf16.msrb.mxu2 %v1877_v46  ;;  %v2018_v46 = vld [vmem:[#allocation4 + $0x68] sm:$0xf0] }
  0x84   :  { %1072 = vmatpush.bf16.msrb.mxu3 %v1941_v50  ;;  %v2021_v47 = vor.u32 %v2253_v44, %v2018_v46  ;;  %v2251_v50 = vld [vmem:[#allocation4 + $0x54] sm:$0xf]  ;;  %v1110_v46 = vld [vmem:[#allocation4 + $0xc0] sm:$0xff] }
  0x85   :  { %1034 = vmatpush.bf16.msrb.mxu0 %v1741_v56  ;;  %v1992_v56 = vld [vmem:[#allocation4 + $0x30] sm:$0xf]  ;;  %v1190_v48 = vunpack.c.l.b16 %v1110_v46  ;;  %v1191_v49 = vunpack.c.h.b16 %v1110_v46 }
  0x86   :  { %1047 = vmatpush.bf16.msrb.mxu1 %v1805_v58  ;;  %v2248_v58 = vld [vmem:[#allocation4 + $0x34] sm:$0xf0] }
  0x87   :  { %1060 = vmatpush.bf16.msrb.mxu2 %v1869_v59  ;;  %v2247_v59 = vld [vmem:[#allocation4 + $0x34] sm:$0xf]  ;;  %v1993_v60 = vor.u32 %v2248_v58, %v1992_v56  ;;  %v2048_v58 = vld [vmem:[#allocation4 + $0xa0] sm:$0xf] }
  0x88   :  { %1073 = vmatpush.bf16.msrb.mxu3 %v1933_v63  ;;  %v1997_v62 = vor.u32 %v2247_v59, %v1994_v61  ;;  %v1984_v63 = vld [vmem:[#allocation4 + $0x20] sm:$0xf]  ;;  %v2262_v59 = vld [vmem:[#allocation4 + $0xa4] sm:$0xf0] }
  0x89   :  { %1035 = vmatpush.bf16.msrb.mxu0 %v1733_v8  ;;  %v1985_v2 = vor.u32 %v2246_v0, %v1984_v63  ;;  %v1989_v8 = vor.u32 %v2245_v1, %v1986_v3  ;;  %v2050_v63 = vld [vmem:[#allocation4 + $0xa8] sm:$0xf0]  ;;  %v2260_v3 = vld [vmem:[#allocation4 + $0x94] sm:$0xf0] }
  0x8a   :  { %1048 = vmatpush.bf16.msrb.mxu1 %v1797_v9 }
  0x8b   :  { %1061 = vmatpush.bf16.msrb.mxu2 %v1861_v10 }
  0x8c   :  { %1074 = vmatpush.bf16.msrb.mxu3 %v1925_v14  ;;  %v1977_v14 = vor.u32 %v2244_v12, %v1976_v11 }
  0x8d   :  { %1036 = vmatpush.bf16.msrb.mxu0 %v1725_v20  ;;  %v2241_v20 = vld [vmem:[#allocation4 + $0x4] sm:$0xf] }
  0x8e   :  { %1049 = vmatpush.bf16.msrb.mxu1 %v1789_v22  ;;  %v1969_v22 = vor.u32 %v2242_v19, %v1968_v18  ;;  %v2034_v19 = vld [vmem:[#allocation4 + $0x88] sm:$0xf0] }
  0x8f   :  { %1062 = vmatpush.bf16.msrb.mxu2 %v1853_v23  ;;  %v1970_v23 = vld [vmem:[#allocation4 + $0x8] sm:$0xf0] }
  0x90   :  { %1075 = vmatpush.bf16.msrb.mxu3 %v1917_v27  ;;  %v1973_v26 = vor.u32 %v2241_v20, %v1970_v23 }
  0x91   :  { %1037 = vmatpush.bf16.msrb.mxu0 %v1717_v34 }
  0x92   :  { %1050 = vmatpush.bf16.msrb.mxu1 %v1781_v5 }
  0x93   :  { %1063 = vmatpush.bf16.msrb.mxu2 %v1845_v6 }
  0x94   :  { %1076 = vmatpush.bf16.msrb.mxu3 %v1909_v7  ;;  %1038 = vmatmul.bf16.vlgmr.msrb.gmra.mxu0 %v2908_v35  ;;  %v2010_v35 = vld [vmem:[#allocation4 + $0x58] sm:$0xf0] }
  0x95   :  { %1253 = vmatpush.bf16.msra.mxu0 %v2025_v39  ;;  %1051 = vmatmul.bf16.vlgmr.msrb.gmra.mxu1 %v2918_v40  ;;  %v2013_v40 = vor.u32 %v2251_v50, %v2010_v35  ;;  %v1217_v35 = vpack.c.b16 %v1191_v49, %v1191_v49  ;;  %v2276_v49 = vld [vmem:[%s3325_s5 + $0x58] sm:$0xff] }
  0x96   :  { %1064 = vmatmul.bf16.vlgmr.msrb.gmra.mxu2 %v2897_v31  ;;  %v2002_v31 = vld [vmem:[#allocation4 + $0x48] sm:$0xf0] }
  0x97   :  { %1279 = vmatpush.bf16.msra.mxu2 %v2029_v41  ;;  %1077 = vmatmul.bf16.vlgmr.msrb.gmra.mxu3 %v2910_v36  ;;  %v2001_v36 = vor.u32 %v2250_v53, %v2000_v52  ;;  %v2005_v55 = vor.u32 %v2249_v54, %v2002_v31  ;;  %v1251_v53 = vsel %vm1246_vm0, %v1217_v35, 0  ;;  %v2264_v54 = vld [vmem:[#allocation4 + $0xb4] sm:$0xf0]  ;;  %v2263_v31 = vld [vmem:[#allocation4 + $0xb4] sm:$0xf] }
  0x98   :  { %1295 = vmatpush.bf16.msra.mxu3 %v1251_v53 }
  0x99   :  { %1254 = vmatpush.bf16.msra.mxu0 %v2017_v45 }
  0x9b   :  { %1280 = vmatpush.bf16.msra.mxu2 %v2021_v47 }
  0x9d   :  { %1255 = vmatpush.bf16.msra.mxu0 %v2009_v51  ;;  %v1216_v51 = vpack.c.b16 %v1190_v48, %v1190_v48 }
  0x9f   :  { %1281 = vmatpush.bf16.msra.mxu2 %v2013_v40  ;;  %v1248_v52 = vsel %vm1246_vm0, %v1216_v51, 0  ;;  %v2056_v40 = vld [vmem:[#allocation4 + $0xb0] sm:$0xf]  ;;  %v2268_v51 = vld [vmem:[%s3325_s5 + $0x18] sm:$0xff] }
  0xa0   :  { %1269 = vmatpush.bf16.msra.mxu1 %v1248_v52  ;;  %v2267_v52 = vld [vmem:[%s3325_s5 + $0x10] sm:$0xff] }
  0xa1   :  { %1256 = vmatpush.bf16.msra.mxu0 %v2001_v36  ;;  %v2057_v36 = vor.u32 %v2264_v54, %v2056_v40 }
  0xa3   :  { %1282 = vmatpush.bf16.msra.mxu2 %v2005_v55  ;;  %v2058_v55 = vld [vmem:[#allocation4 + $0xb8] sm:$0xf0] }
  0xa4   :  { %v2061_v56 = vor.u32 %v2263_v31, %v2058_v55  ;;  %1270 = vmatpush.bf16.msra.mxu1 %v2057_v36  ;;  %v2266_v31 = vld [vmem:[%s3325_s5 + $0x8] sm:$0xff]  ;;  %v2275_v36 = vld [vmem:[%s3325_s5 + $0x50] sm:$0xff]  ;;  %v2265_v55 = vld [vmem:[%s3325_s5] sm:$0xff] }
  0xa5   :  { %1257 = vmatpush.bf16.msra.mxu0 %v1993_v60  ;;  %v2261_v60 = vld [vmem:[#allocation4 + $0xa4] sm:$0xf] }
  0xa6   :  { %1296 = vmatpush.bf16.msra.mxu3 %v2061_v56  ;;  %v2053_v1 = vor.u32 %v2261_v60, %v2050_v63  ;;  %v2274_v56 = vld [vmem:[%s3325_s5 + $0x48] sm:$0xff] }
  0xa7   :  { %1283 = vmatpush.bf16.msra.mxu2 %v1997_v62  ;;  %v2049_v62 = vor.u32 %v2262_v59, %v2048_v58  ;;  %v2273_v58 = vld [vmem:[%s3325_s5 + $0x40] sm:$0xff]  ;;  %v1111_v59 = vld [vmem:[#allocation6] sm:$0x3] }
  0xa8   :  { %v1113_v60 = vperm.slane %v1111_v59, 0  ;;  %v1114_v63 = vperm.slane %v1111_v59, 1 }
  0xa9   :  { %1258 = vmatpush.bf16.msra.mxu0 %v1985_v2  ;;  %1271 = vmatpush.bf16.msra.mxu1 %v2049_v62  ;;  %v2040_v2 = vld [vmem:[#allocation4 + $0x90] sm:$0xf] }
  0xaa   :  { %1297 = vmatpush.bf16.msra.mxu3 %v2053_v1 }
  0xab   :  { %1284 = vmatpush.bf16.msra.mxu2 %v1989_v8  ;;  %v2041_v8 = vor.u32 %v2260_v3, %v2040_v2 }
  0xad   :  { %1259 = vmatpush.bf16.msra.mxu0 %v1977_v14  ;;  %1272 = vmatpush.bf16.msra.mxu1 %v2041_v8  ;;  %v2258_v14 = vld [vmem:[#allocation4 + $0x84] sm:$0xf0] }
  0xae   :  { %v2033_v18 = vor.u32 %v2258_v14, %v2032_v13  ;;  %v2283_v14 = vld [vmem:[#allocation7] ss:$0 sm:$0xff] }
  0xaf   :  { %1285 = vmatpush.bf16.msra.mxu2 %v1981_v16 }
  0xb1   :  { %v883_v4 = vpop.f32.mrf.mxu0  ;;  %1260 = vmatpush.bf16.msra.mxu0 %v1969_v22  ;;  %1273 = vmatpush.bf16.msra.mxu1 %v2033_v18  ;;  %v231_v22 = vperm.slane %v3268_v17, 1 }
  0xb2   :  { %v896_v9 = vpop.f32.mrf.mxu1  ;;  %v884_v29 = vadd.f32 %v883_v4, %v230_v24  ;;  %v2259_v4 = vld [vmem:[#allocation4 + $0x94] sm:$0xf] }
  0xb3   :  { %1286 = vmatpush.bf16.msra.mxu2 %v1973_v26 }
  0xb4   :  { %v897_v57 = vadd.f32 %v896_v9, %v884_v29  ;;  %v2042_v9 = vld [vmem:[#allocation4 + $0x98] sm:$0xf0] }
  0xb5   :  { %v2045_v11 = vor.u32 %v2259_v4, %v2042_v9 }
  0xb7   :  { %1298 = vmatpush.bf16.msra.mxu3 %v2045_v11 }
  0xb9   :  { %v909_v10 = vpop.f32.mrf.mxu2  ;;  %v885_v25 = vpop.f32.mrf.mxu0 }
  0xba   :  { %v922_v21 = vpop.f32.mrf.mxu3  ;;  %v898_v27 = vpop.f32.mrf.mxu1  ;;  %v910_v32 = vadd.f32 %v909_v10, %v897_v57 }
  0xbc   :  { %v923_v33 = vadd.f32 %v922_v21, %v910_v32  ;;  %v2037_v21 = vor.u32 %v2257_v15, %v2034_v19 }
  0xbe   :  { %1299 = vmatpush.bf16.msra.mxu3 %v2037_v21 }
  0xc1   :  { %v911_v28 = vpop.f32.mrf.mxu2 }
  0xc2   :  { %v924_v30 = vpop.f32.mrf.mxu3 }
  0xd1   :  { %v935_v34 = vpop.f32.mrf.mxu0 }
  0xd2   :  { %v936_v37 = vadd.f32 %v935_v34, %v923_v33  ;;  %v948_v38 = vpop.f32.mrf.mxu1 }
  0xd4   :  { %v949_v5 = vadd.f32 %v948_v38, %v936_v37 }
  0xd9   :  { %v961_v6 = vpop.f32.mrf.mxu2  ;;  %v937_v42 = vpop.f32.mrf.mxu0 }
  0xda   :  { %v962_v7 = vadd.f32 %v961_v6, %v949_v5  ;;  %v974_v39 = vpop.f32.mrf.mxu3  ;;  %v950_v43 = vpop.f32.mrf.mxu1  ;;  %v2272_v42 = vld [vmem:[%s3325_s5 + $0x38] sm:$0xff] }
  0xdb   :  { %v1333_v43 = vld [vmem:[%s3325_s5 + $0x60] sm:$0xf]  ;;  %1419 = vmatpush.bf16.msrb.mxu1 %v2272_v42 }
  0xdc   :  { %v975_v41 = vadd.f32 %v974_v39, %v962_v7 }
  0xde   :  { %v1082_v44 = vmax.f32 %v975_v41, 0.0 }
  0xe0   :  { %v1084_v45 = vpack.c.bf16 %v1082_v44, %v1082_v44  ;;  %v2271_v44 = vld [vmem:[%s3325_s5 + $0x30] sm:$0xff] }
  0xe1   :  { %v963_v47 = vpop.f32.mrf.mxu2  ;;  %1420 = vmatpush.bf16.msrb.mxu1 %v2271_v44 }
  0xe2   :  { %1261 = vmatmul.bf16.vlgmr.msra.gmra.mxu0 %v1084_v45  ;;  %1287 = vmatmul.bf16.vlgmr.msra.gmra.mxu2 %v1084_v45  ;;  %v976_v50 = vpop.f32.mrf.mxu3  ;;  %v1387_v45 = vunpack.c.l.b16 %v1333_v43  ;;  %v2270_v47 = vld [vmem:[%s3325_s5 + $0x28] sm:$0xff] }
  0xe3   :  { %v2269_v50 = vld [vmem:[%s3325_s5 + $0x20] sm:$0xff] }
  0xe4   :  { %v1400_v46 = vpack.c.b16 %v1387_v45, %v1387_v45 }
  0xe5   :  { %1421 = vmatpush.bf16.msrb.mxu1 %v2270_v47 }
  0xe6   :  { %v1417_v48 = vsel %vm1246_vm0, %v1400_v46, 0 }
  0xe7   :  { %1435 = vmatpush.bf16.msrb.mxu3 %v1417_v48 }
  0xe9   :  { %1422 = vmatpush.bf16.msrb.mxu1 %v2269_v50 }
  0xeb   :  { %1436 = vmatpush.bf16.msrb.mxu3 %v2276_v49 }
  0xed   :  { %1423 = vmatpush.bf16.msrb.mxu1 %v2268_v51 }
  0xef   :  { %1437 = vmatpush.bf16.msrb.mxu3 %v2275_v36 }
  0xf1   :  { %v987_v61 = vpop.f32.mrf.mxu0  ;;  %1424 = vmatpush.bf16.msrb.mxu1 %v2267_v52 }
  0xf2   :  { %v1000_v0 = vpop.f32.mrf.mxu1  ;;  %v988_v25 = vadd.f32 %v987_v61, %v231_v22 }
  0xf3   :  { %1438 = vmatpush.bf16.msrb.mxu3 %v2274_v56 }
  0xf4   :  { %v1001_v26 = vadd.f32 %v1000_v0, %v988_v25 }
  0xf5   :  { %1425 = vmatpush.bf16.msrb.mxu1 %v2266_v31 }
  0xf7   :  { %1439 = vmatpush.bf16.msrb.mxu3 %v2273_v58 }
  0xf9   :  { %v1013_v10 = vpop.f32.mrf.mxu2  ;;  %v989_v16 = vpop.f32.mrf.mxu0  ;;  %1426 = vmatpush.bf16.msrb.mxu1 %v2265_v55 }
  0xfa   :  { %v1026_v12 = vpop.f32.mrf.mxu3  ;;  %v1002_v20 = vpop.f32.mrf.mxu1  ;;  %v1014_v27 = vadd.f32 %v1013_v10, %v1001_v26 }
  0xfc   :  { %v1027_v28 = vadd.f32 %v1026_v12, %v1014_v27 }
 0x101   :  { %v1015_v23 = vpop.f32.mrf.mxu2 }
 0x102   :  { %v1028_v24 = vpop.f32.mrf.mxu3 }
 0x111   :  { %v1039_v29 = vpop.f32.mrf.mxu0 }
 0x112   :  { %v1052_v30 = vpop.f32.mrf.mxu1  ;;  %v1040_v57 = vadd.f32 %v1039_v29, %v1027_v28 }
 0x114   :  { %v1053_v32 = vadd.f32 %v1052_v30, %v1040_v57 }
 0x119   :  { %v1065_v33 = vpop.f32.mrf.mxu2  ;;  %v1041_v38 = vpop.f32.mrf.mxu0 }
 0x11a   :  { %v1066_v34 = vadd.f32 %v1065_v33, %v1053_v32  ;;  %v1078_v37 = vpop.f32.mrf.mxu3  ;;  %v1054_v5 = vpop.f32.mrf.mxu1 }
 0x11c   :  { %v1079_v6 = vadd.f32 %v1078_v37, %v1066_v34 }
 0x11e   :  { %v1083_v7 = vmax.f32 %v1079_v6, 0.0 }
 0x120   :  { %v1085_v39 = vpack.c.bf16 %v1083_v7, %v1083_v7 }
 0x121   :  { %v1067_v17 = vpop.f32.mrf.mxu2 }
 0x122   :  { %v1080_v41 = vpop.f32.mrf.mxu3  ;;  %2062 = vmatmul.msk.bf16.vlgmr.msra.gmra.mxu1 %vm1242_vm1, %v1085_v39  ;;  %2063 = vmatmul.msk.bf16.vlgmr.msra.gmra.mxu3 %vm1242_vm1, %v1085_v39 }
 0x15f   :  { %v1262_v35 = vpop.f32.mrf.mxu0 }
 0x160   :  { %v1263_v61 = vadd.f32 %v1262_v35, %v1113_v60 }
 0x165   :  { %v1288_v53 = vpop.f32.mrf.mxu2 }
 0x166   :  { %v1289_v2 = vadd.f32 %v1288_v53, %v1114_v63 }
 0x167   :  { %v1264_v40 = vpop.f32.mrf.mxu0 }
 0x16d   :  { %v1290_v54 = vpop.f32.mrf.mxu2 }
 0x19f   :  { %v1275_v62 = vpop.f32.mrf.mxu1 }
 0x1a0   :  { %v1276_v0 = vadd.f32 %v1275_v62, %v1263_v61 }
 0x1a2   :  { %v1305_v1 = vmax.f32 %v1276_v0, 0.0 }
 0x1a4   :  { %v1307_v3 = vpack.c.bf16 %v1305_v1, %v1305_v1 }
 0x1a5   :  { %v1301_v4 = vpop.f32.mrf.mxu3 }
 0x1a6   :  { %v1302_v8 = vadd.f32 %v1301_v4, %v1289_v2  ;;  %1427 = vmatmul.bf16.vlgmr.msrb.gmra.mxu1 %v1307_v3 }
 0x1a7   :  { %v1277_v9 = vpop.f32.mrf.mxu1 }
 0x1a8   :  { %v1306_v10 = vmax.f32 %v1302_v8, 0.0 }
 0x1aa   :  { %v1308_v11 = vpack.c.bf16 %v1306_v10, %v1306_v10 }
 0x1ac   :  { %2112 = vmatmul.msk.bf16.vlgmr.msrb.gmra.mxu3 %vm1242_vm1, %v1308_v11 }
 0x1ad   :  { %v1303_v12 = vpop.f32.mrf.mxu3 }
 0x223   :  { %v1428_v13 = vpop.f32.mrf.mxu1 }
 0x224   :  { %v1429_v16 = vadd.f32 %v2283_v14, %v1428_v13 }
 0x22b   :  { %v1430_v15 = vpop.f32.mrf.mxu1 }
 0x22f   :  { %v1441_v18 = vpop.f32.mrf.mxu3 }
 0x230   :  { %v1442_v19 = vadd.f32 %v1441_v18, %v1429_v16 }
 0x232   :  { %1446 = vst.msk [vmem:[%s3327_s7] sm:$0xff] %vm1445_vm2, %v1442_v19 }
 0x237   :  { %v1443_v20 = vpop.f32.mrf.mxu3 }
 0x238   :  { %1451 = vsyncpa [#allocation3], 1 }
 0x239   :  { %1452 = vsyncpa [#allocation5], 1 }
 0x23a   :  { %1453 = vsyncpa [#allocation8], 1 }

// kernel: cnn_net_forward.2
= control target key start
LH: loop header
LB: loop body
LE: loop exit
PB: predicated region body
PF: predicated region fallthrough
CT: control target
= control target key end

     0   :  { %10 = vsyncpa [#allocation3], 0  ;;  %s9028_s0 = inlined_call_operand.vmem [shape: f32[2,28,28], index: 0, kind: input, shape index: {}]   ;;  %s9029_s1 = inlined_call_operand.hbm [shape: f32[5,28,768], index: 1, kind: input, shape index: {}]   ;;  %s9030_s2 = inlined_call_operand.hbm [shape: f32[1,384], index: 2, kind: input, shape index: {}]   ;;  %s9031_s3 = inlined_call_operand.hbm [shape: bf16[5,384,512], index: 3, kind: input, shape index: {}]   ;;  %s9032_s4 = inlined_call_operand.hbm [shape: f32[1,256], index: 4, kind: input, shape index: {}]   ;;  %s9033_s5 = inlined_call_operand.vmem [shape: f32[2,4,256], index: 5, kind: output, shape index: {}]  }
   0x1   :  { %11 = vsyncpa [#allocation5], 0 }
   0x2   :  { %12 = vsyncpa [#allocation8], 0  ;;  %s8339_s18 = smov 0  }
   0x3 LB: > { %s185_s21 = sshll.u32 %s9030_s2, 4  ;;  %s8348_s22 = sadd.s32 4294967295, %s8298_s18   ;;  %s8298_s18 = sphi %s8339_s18, %s18_s18   ;;  %s186_s21 = int_to_ptr.hbm [resolvable:$true] %s185_s21 }
   0x4   : > { %p5547_p0 = scmp.ge.s32.totalorder %s8298_s18, 1  ;;  %p159_p1 = scmp.lt.s32.totalorder %s8298_s18, 3 }
   0x5   : > { %p8135_p2 = scmp.eq.s32.totalorder %s8348_s22, 0  ;;  %s8300_s24 = smov [#allocation4]  }
   0x6   : > { %p8353_p3 = pnand %p5547_p0, %p159_p1  ;;  %s187_s25 = sshll.u32 %s8300_s24, 4  ;;  %s188_s25 = int_to_ptr.vmem [resolvable:$true] %s187_s25 }
   0x7   : > { %s170_s28 = sshll.u32 %s9029_s1, 4  ;;  %s8301_s30 = smov [#allocation2]   ;;  %s171_s28 = int_to_ptr.hbm [resolvable:$true] %s170_s28 }
   0x8   : > { %p8122_p4 = pneg %p8353_p3  ;;  %s172_s6 = sshll.u32 %s8301_s30, 4  ;;  %s173_s6 = int_to_ptr.vmem [resolvable:$true] %s172_s6 }
   0x9   : > { %s196_s9 = sshll.u32 %s9031_s3, 4  ;;  %s8302_s10 = smov 768   ;;  %s197_s9 = int_to_ptr.hbm [resolvable:$true] %s196_s9 }
   0xa   : > { %p8364_p5 = pnand %p8135_p2, %p8122_p4  ;;  %s8303_s11 = smov 48  }
   0xb   : > { %s8304_s12 = smov [#allocation6]   ;;  %s8305_s14 = smov 256  }
   0xc   : > { %8128 = dma.hbm_to_vmem [thread:$0]  (!%p8364_p5), %s186_s21, 48, %s188_s25, [#allocation5]  }
   0xd   : > { %8125 = dma.hbm_to_vmem [thread:$0]  (!%p8364_p5), %s171_s28, 15360, %s173_s6, [#allocation3], %s8302_s10, %s8302_s10, %s8303_s11  }
   0xe   : > { %s198_s13 = sshll.u32 %s8304_s12, 4  ;;  %s8306_s15 = smov 16   ;;  %s199_s13 = int_to_ptr.vmem [resolvable:$true] %s198_s13 }
   0xf   : > { %8131 = dma.hbm_to_vmem [thread:$0]  (!%p8364_p5), %s197_s9, 61440, %s199_s13, [#allocation5], %s8305_s14, %s8305_s14, %s8306_s15  }
  0x10   : > { %s211_s19 = sshll.u32 %s9032_s4, 4  ;;  %s8307_s20 = smov [#allocation7]   ;;  %s212_s19 = int_to_ptr.hbm [resolvable:$true] %s211_s19 }
  0x11   : > { %s213_s21 = sshll.u32 %s8307_s20, 4  ;;  %234 = sbr.rel (%p8353_p3) target bundleno = 1223 (0x4c7), region = 40  ;;  %s214_s21 = int_to_ptr.vmem [resolvable:$true] %s213_s21 }
  0x12   : > { %8134 = dma.hbm_to_vmem [thread:$0]  (!%p8364_p5), %s212_s19, 32, %s214_s21, [#allocation8]  }
  0x16   : > { %8285 = dma.done.wait (%p8135_p2), [#allocation3], 15360  }
  0x17   : > { %8287 = vsyncadd (%p8135_p2), [#allocation3], 4294951936 }
  0x18   : > { %8289 = dma.done.wait (%p8135_p2), [#allocation5], 61488  }
  0x19   : > { %8291 = vsyncadd (%p8135_p2), [#allocation5], 4294905808 }
  0x1a   : > { %8293 = dma.done.wait (%p8135_p2), [#allocation8], 32  }
  0x1b   : > { %8295 = vsyncadd (%p8135_p2), [#allocation8], 4294967264  ;;  %p278_p6 = scmp.lt.s32.totalorder %s8348_s22, 1  ;;  %vm353_vm0 = vcmask 1043456   ;;  %v337_v0 = vld [vmem:[#allocation2 + $0x150] sm:$0xf] }
  0x1c   : > { %v338_v1 = vld [vmem:[#allocation2 + $0x158] sm:$0xf]  ;;  %v339_v2 = vld [vmem:[#allocation2 + $0x160] sm:$0xf]  ;;  %5562 = vmatpush.msk.msra.mxu0 %vm353_vm0, %v337_v0  ;;  %v340_v3 = vld [vmem:[#allocation2 + $0x168] sm:$0xf] }
  0x1d   : > { %s9053_s22 = smov (!%p278_p6, %s8348_s22), 1  ;;  %5566 = vmatpush.msk.msra.mxu1 %vm353_vm0, %v338_v1  ;;  %v331_v4 = vld [vmem:[#allocation2 + $0x120] sm:$0xff]  ;;  %v332_v5 = vld [vmem:[#allocation2 + $0x128] sm:$0xff]  ;;  %5570 = vmatpush.msk.msra.mxu2 %vm353_vm0, %v339_v2  ;;  %v333_v6 = vld [vmem:[#allocation2 + $0x130] sm:$0xff]  ;;  %vm343_vm1 = vcmask 228352   ;;  %vm1454_vm3 = vcmask 195584  }
  0x1e   : > { %s7624_s23 = sshll.u32 %s9053_s22, 5  ;;  %5574 = vmatpush.msk.msra.mxu3 %vm353_vm0, %v340_v3  ;;  %v334_v7 = vld [vmem:[#allocation2 + $0x138] sm:$0xff]  ;;  %v325_v8 = vld [vmem:[#allocation2 + $0xf0] sm:$0xff]  ;;  %385 = vmatpush.msra.mxu0 %v331_v4  ;;  %v327_v10 = vld [vmem:[#allocation2 + $0x100] sm:$0xff]  ;;  %vm5356_vm7 = vcmask 64512   ;;  %s7625_s27 = sshll.u32 %s9053_s22, 3 }
  0x1f   : > { %411 = vmatpush.msra.mxu1 %v332_v5  ;;  %v326_v9 = vld [vmem:[#allocation2 + $0xf8] sm:$0xff]  ;;  %v328_v11 = vld [vmem:[#allocation2 + $0x108] sm:$0xff]  ;;  %s8408_s26 = scalar_lea.vmem %s9028_s0, %s7624_s23  ;;  %437 = vmatpush.msra.mxu2 %v333_v6  ;;  %v319_v12 = vld [vmem:[#allocation2 + $0xc0] sm:$0xff]  ;;  %s287_s30 = scalar_lea.vmem %s9033_s5, %s7625_s27 }
  0x20   : > { %463 = vmatpush.msra.mxu3 %v334_v7  ;;  %v320_v13 = vld [vmem:[#allocation2 + $0xc8] sm:$0xff]  ;;  %386 = vmatpush.msra.mxu0 %v325_v8  ;;  %v321_v14 = vld [vmem:[#allocation2 + $0xd0] sm:$0xff]  ;;  %v322_v15 = vld [vmem:[#allocation2 + $0xd8] sm:$0xff] }
  0x21   : > { %412 = vmatpush.msra.mxu1 %v326_v9  ;;  %438 = vmatpush.msra.mxu2 %v327_v10  ;;  %v8411_v16 = vld [vmem:[%s8408_s26 + $0x1] sm:$0xff]  ;;  %v341_v17 = vld [vmem:[#allocation2 + $0x170] sm:$0xf]  ;;  %v342_v18 = vld [vmem:[#allocation2 + $0x178] sm:$0xf] }
  0x22   : > { %464 = vmatpush.msra.mxu3 %v328_v11  ;;  %387 = vmatpush.msra.mxu0 %v319_v12  ;;  %v309_v19 = vld [vmem:[#allocation2 + $0x90] sm:$0xf]  ;;  %v310_v20 = vld [vmem:[#allocation2 + $0x98] sm:$0xf]  ;;  %v335_v21 = vld [vmem:[#allocation2 + $0x140] sm:$0xff] }
  0x23   : > { %413 = vmatpush.msra.mxu1 %v320_v13  ;;  %439 = vmatpush.msra.mxu2 %v321_v14  ;;  %v336_v22 = vld [vmem:[#allocation2 + $0x148] sm:$0xff]  ;;  %v303_v23 = vld [vmem:[#allocation2 + $0x60] sm:$0xff]  ;;  %v329_v25 = vld [vmem:[#allocation2 + $0x110] sm:$0xff] }
  0x24   : > { %465 = vmatpush.msra.mxu3 %v322_v15  ;;  %5563 = vmatmul.msk.f32.vlgmr.msra.gmra.mxu0 %vm343_vm1, %v8411_v16  ;;  %v304_v24 = vld [vmem:[#allocation2 + $0x68] sm:$0xff]  ;;  %v330_v26 = vld [vmem:[#allocation2 + $0x118] sm:$0xff]  ;;  %v297_v27 = vld [vmem:[#allocation2 + $0x30] sm:$0xff] }
  0x25   : > { %5567 = vmatmul.msk.f32.vlgmr.msra.gmra.mxu1 %vm343_vm1, %v8411_v16  ;;  %5571 = vmatmul.msk.f32.vlgmr.msra.gmra.mxu2 %vm343_vm1, %v8411_v16  ;;  %v298_v28 = vld [vmem:[#allocation2 + $0x38] sm:$0xff]  ;;  %v8426_v29 = vld [vmem:[%s8408_s26 + $0x9] sm:$0xff]  ;;  %v323_v30 = vld [vmem:[#allocation2 + $0xe0] sm:$0xff] }
  0x26   : > { %5575 = vmatmul.msk.f32.vlgmr.msra.gmra.mxu3 %vm343_vm1, %v8411_v16  ;;  %5578 = vmatpush.msk.msrb.mxu0 %vm353_vm0, %v341_v17  ;;  %v324_v31 = vld [vmem:[#allocation2 + $0xe8] sm:$0xff]  ;;  %v291_v32 = vld [vmem:[#allocation2] sm:$0xff]  ;;  %v313_v36 = vld [vmem:[#allocation2 + $0xb0] sm:$0xf] }
  0x27   : > { %5582 = vmatpush.msk.msrb.mxu1 %vm353_vm0, %v342_v18  ;;  %5586 = vmatpush.msk.msrb.mxu2 %vm353_vm0, %v309_v19  ;;  %v292_v33 = vld [vmem:[#allocation2 + $0x8] sm:$0xff]  ;;  %v311_v34 = vld [vmem:[#allocation2 + $0xa0] sm:$0xf]  ;;  %v314_v37 = vld [vmem:[#allocation2 + $0xb8] sm:$0xf] }
  0x28   : > { %5590 = vmatpush.msk.msrb.mxu3 %vm353_vm0, %v310_v20  ;;  %489 = vmatpush.msrb.mxu0 %v335_v21  ;;  %v312_v35 = vld [vmem:[#allocation2 + $0xa8] sm:$0xf]  ;;  %v305_v38 = vld [vmem:[#allocation2 + $0x70] sm:$0xff]  ;;  %v306_v39 = vld [vmem:[#allocation2 + $0x78] sm:$0xff] }
  0x29   : > { %515 = vmatpush.msrb.mxu1 %v336_v22  ;;  %568 = vmatpush.msrb.mxu2 %v303_v23  ;;  %v307_v40 = vld [vmem:[#allocation2 + $0x80] sm:$0xff]  ;;  %v308_v41 = vld [vmem:[#allocation2 + $0x88] sm:$0xff]  ;;  %v8439_v42 = vld [vmem:[%s8408_s26 + $0x11] sm:$0xff] }
  0x2a   : > { %594 = vmatpush.msrb.mxu3 %v304_v24  ;;  %490 = vmatpush.msrb.mxu0 %v329_v25  ;;  %v299_v43 = vld [vmem:[#allocation2 + $0x40] sm:$0xff]  ;;  %v300_v44 = vld [vmem:[#allocation2 + $0x48] sm:$0xff]  ;;  %v301_v45 = vld [vmem:[#allocation2 + $0x50] sm:$0xff] }
  0x2b   : > { %516 = vmatpush.msrb.mxu1 %v330_v26  ;;  %569 = vmatpush.msrb.mxu2 %v297_v27  ;;  %v302_v46 = vld [vmem:[#allocation2 + $0x58] sm:$0xff]  ;;  %v293_v47 = vld [vmem:[#allocation2 + $0x10] sm:$0xff]  ;;  %v295_v49 = vld [vmem:[#allocation2 + $0x20] sm:$0xff] }
  0x2c   : > { %595 = vmatpush.msrb.mxu3 %v298_v28  ;;  %5564 = vmatmul.msk.f32.gmra.mxu0 %vm343_vm1, %v8426_v29  ;;  %v294_v48 = vld [vmem:[#allocation2 + $0x18] sm:$0xff]  ;;  %v296_v50 = vld [vmem:[#allocation2 + $0x28] sm:$0xff]  ;;  %v288_v51 = vld [vmem:[%s8408_s26] sm:$0xff] }
  0x2d   : > { %5568 = vmatmul.msk.f32.gmra.mxu1 %vm343_vm1, %v8426_v29  ;;  %5572 = vmatmul.msk.f32.gmra.mxu2 %vm343_vm1, %v8426_v29  ;;  %v289_v52 = vld [vmem:[%s8408_s26 + $0x8] sm:$0xff]  ;;  %v733_v53 = vld [vmem:[#allocation2 + $0x210] sm:$0xf]  ;;  %v734_v54 = vld [vmem:[#allocation2 + $0x218] sm:$0xf] }
  0x2e   : > { %5576 = vmatmul.msk.f32.gmra.mxu3 %vm343_vm1, %v8426_v29  ;;  %491 = vmatpush.msrb.mxu0 %v323_v30  ;;  %v735_v55 = vld [vmem:[#allocation2 + $0x220] sm:$0xf]  ;;  %v736_v56 = vld [vmem:[#allocation2 + $0x228] sm:$0xf]  ;;  %v729_v59 = vld [vmem:[#allocation2 + $0x1f0] sm:$0xff] }
  0x2f   : > { %517 = vmatpush.msrb.mxu1 %v324_v31  ;;  %570 = vmatpush.msrb.mxu2 %v291_v32  ;;  %v727_v57 = vld [vmem:[#allocation2 + $0x1e0] sm:$0xff]  ;;  %v728_v58 = vld [vmem:[#allocation2 + $0x1e8] sm:$0xff]  ;;  %v730_v60 = vld [vmem:[#allocation2 + $0x1f8] sm:$0xff] }
  0x30   : > { %596 = vmatpush.msrb.mxu3 %v292_v33  ;;  %5594 = vmatpush.msk.msra.mxu0 %vm353_vm0, %v311_v34  ;;  %v721_v61 = vld [vmem:[#allocation2 + $0x1b0] sm:$0xff]  ;;  %v722_v62 = vld [vmem:[#allocation2 + $0x1b8] sm:$0xff]  ;;  %v723_v63 = vld [vmem:[#allocation2 + $0x1c0] sm:$0xff] }
  0x31   : > { %5598 = vmatpush.msk.msra.mxu1 %vm353_vm0, %v312_v35  ;;  %5602 = vmatpush.msk.msra.mxu2 %vm353_vm0, %v313_v36  ;;  %v724_v0 = vld [vmem:[#allocation2 + $0x1c8] sm:$0xff]  ;;  %v290_v1 = vld [vmem:[%s8408_s26 + $0x10] sm:$0xff]  ;;  %v715_v2 = vld [vmem:[#allocation2 + $0x180] sm:$0xff] }
  0x32   : > { %5606 = vmatpush.msk.msra.mxu3 %vm353_vm0, %v314_v37  ;;  %620 = vmatpush.msra.mxu0 %v305_v38  ;;  %v716_v3 = vld [vmem:[#allocation2 + $0x188] sm:$0xff]  ;;  %v717_v4 = vld [vmem:[#allocation2 + $0x190] sm:$0xff]  ;;  %v718_v5 = vld [vmem:[#allocation2 + $0x198] sm:$0xff] }
  0x33   : > { %646 = vmatpush.msra.mxu1 %v306_v39  ;;  %672 = vmatpush.msra.mxu2 %v307_v40  ;;  %v737_v6 = vld [vmem:[#allocation2 + $0x230] sm:$0xf]  ;;  %v738_v7 = vld [vmem:[#allocation2 + $0x238] sm:$0xf]  ;;  %v731_v10 = vld [vmem:[#allocation2 + $0x200] sm:$0xff] }
  0x34   : > { %698 = vmatpush.msra.mxu3 %v308_v41  ;;  %5565 = vmatmul.msk.f32.gmra.mxu0 %vm343_vm1, %v8439_v42  ;;  %v962_v8 = vld [vmem:[#allocation2 + $0x2d0] sm:$0xf]  ;;  %v963_v9 = vld [vmem:[#allocation2 + $0x2d8] sm:$0xf]  ;;  %v732_v11 = vld [vmem:[#allocation2 + $0x208] sm:$0xff] }
  0x35   : > { %5569 = vmatmul.msk.f32.gmra.mxu1 %vm343_vm1, %v8439_v42  ;;  %5573 = vmatmul.msk.f32.gmra.mxu2 %vm343_vm1, %v8439_v42  ;;  %v956_v12 = vld [vmem:[#allocation2 + $0x2a0] sm:$0xff]  ;;  %v957_v13 = vld [vmem:[#allocation2 + $0x2a8] sm:$0xff]  ;;  %v725_v14 = vld [vmem:[#allocation2 + $0x1d0] sm:$0xff] }
  0x36   : > { %5577 = vmatmul.msk.f32.gmra.mxu3 %vm343_vm1, %v8439_v42  ;;  %621 = vmatpush.msra.mxu0 %v299_v43  ;;  %v726_v15 = vld [vmem:[#allocation2 + $0x1d8] sm:$0xff]  ;;  %v719_v18 = vld [vmem:[#allocation2 + $0x1a0] sm:$0xff]  ;;  %v720_v19 = vld [vmem:[#allocation2 + $0x1a8] sm:$0xff] }
  0x37   : > { %647 = vmatpush.msra.mxu1 %v300_v44  ;;  %673 = vmatpush.msra.mxu2 %v301_v45  ;;  %v951_v17 = vld [vmem:[#allocation2 + $0x278] sm:$0xff]  ;;  %v944_v20 = vld [vmem:[#allocation2 + $0x240] sm:$0xff]  ;;  %v945_v21 = vld [vmem:[#allocation2 + $0x248] sm:$0xff] }
  0x38   : > { %699 = vmatpush.msra.mxu3 %v302_v46  ;;  %622 = vmatpush.msra.mxu0 %v293_v47  ;;  %v711_v22 = vld [vmem:[%s8408_s26 + $0x2] sm:$0xff]  ;;  %v712_v23 = vld [vmem:[%s8408_s26 + $0xa] sm:$0xff]  ;;  %v967_v27 = vld [vmem:[#allocation2 + $0x2f8] sm:$0xf] }
  0x39   : > { %648 = vmatpush.msra.mxu1 %v294_v48  ;;  %674 = vmatpush.msra.mxu2 %v295_v49  ;;  %v964_v24 = vld [vmem:[#allocation2 + $0x2e0] sm:$0xf]  ;;  %v965_v25 = vld [vmem:[#allocation2 + $0x2e8] sm:$0xf]  ;;  %v966_v26 = vld [vmem:[#allocation2 + $0x2f0] sm:$0xf] }
  0x3a   : > { %700 = vmatpush.msra.mxu3 %v296_v50  ;;  %v958_v28 = vld [vmem:[#allocation2 + $0x2b0] sm:$0xff]  ;;  %v960_v30 = vld [vmem:[#allocation2 + $0x2c0] sm:$0xff]  ;;  %v961_v31 = vld [vmem:[#allocation2 + $0x2c8] sm:$0xff] }
  0x3b   : > { %v952_v32 = vld [vmem:[#allocation2 + $0x280] sm:$0xff]  ;;  %v953_v33 = vld [vmem:[#allocation2 + $0x288] sm:$0xff]  ;;  %v954_v34 = vld [vmem:[#allocation2 + $0x290] sm:$0xff] }
  0x3c   : > { %5579 = vmatmul.msk.f32.vlgmr.msrb.gmra.mxu0 %vm343_vm1, %v8411_v16  ;;  %v955_v35 = vld [vmem:[#allocation2 + $0x298] sm:$0xff]  ;;  %v946_v37 = vld [vmem:[#allocation2 + $0x250] sm:$0xff]  ;;  %v948_v39 = vld [vmem:[#allocation2 + $0x260] sm:$0xff] }
  0x3d   : > { %5583 = vmatmul.msk.f32.vlgmr.msrb.gmra.mxu1 %vm343_vm1, %v8411_v16  ;;  %5587 = vmatmul.msk.f32.vlgmr.msrb.gmra.mxu2 %vm343_vm1, %v288_v51  ;;  %v950_v16 = vld [vmem:[#allocation2 + $0x270] sm:$0xff]  ;;  %v947_v38 = vld [vmem:[#allocation2 + $0x258] sm:$0xff]  ;;  %v949_v40 = vld [vmem:[#allocation2 + $0x268] sm:$0xff] }
  0x3e   : > { %5591 = vmatmul.msk.f32.vlgmr.msrb.gmra.mxu3 %vm343_vm1, %v288_v51  ;;  %5610 = vmatpush.msk.msrb.mxu0 %vm353_vm0, %v733_v53  ;;  %v713_v36 = vld [vmem:[%s8408_s26 + $0x12] sm:$0xff]  ;;  %v940_v41 = vld [vmem:[%s8408_s26 + $0x3] sm:$0xff] }
  0x3f   : > { %5614 = vmatpush.msk.msrb.mxu1 %vm353_vm0, %v734_v54  ;;  %5618 = vmatpush.msk.msrb.mxu2 %vm353_vm0, %v735_v55  ;;  %v1191_v43 = vld [vmem:[#allocation2 + $0x390] sm:$0xf]  ;;  %v1192_v44 = vld [vmem:[#allocation2 + $0x398] sm:$0xf]  ;;  %v1193_v45 = vld [vmem:[#allocation2 + $0x3a0] sm:$0xf] }
  0x40   : > { %5622 = vmatpush.msk.msrb.mxu3 %vm353_vm0, %v736_v56  ;;  %779 = vmatpush.msrb.mxu0 %v727_v57  ;;  %v1194_v46 = vld [vmem:[#allocation2 + $0x3a8] sm:$0xf]  ;;  %v1185_v47 = vld [vmem:[#allocation2 + $0x360] sm:$0xff]  ;;  %v1187_v49 = vld [vmem:[#allocation2 + $0x370] sm:$0xff] }
  0x41   : > { %805 = vmatpush.msrb.mxu1 %v728_v58  ;;  %831 = vmatpush.msrb.mxu2 %v729_v59  ;;  %v1186_v48 = vld [vmem:[#allocation2 + $0x368] sm:$0xff]  ;;  %v1188_v50 = vld [vmem:[#allocation2 + $0x378] sm:$0xff]  ;;  %v1181_v53 = vld [vmem:[#allocation2 + $0x340] sm:$0xff] }
  0x42   : > { %857 = vmatpush.msrb.mxu3 %v730_v60  ;;  %780 = vmatpush.msrb.mxu0 %v721_v61  ;;  %v942_v54 = vld [vmem:[%s8408_s26 + $0x13] sm:$0xff]  ;;  %v1182_v55 = vld [vmem:[#allocation2 + $0x348] sm:$0xff]  ;;  %v1173_v56 = vld [vmem:[#allocation2 + $0x300] sm:$0xff] }
  0x43   : > { %806 = vmatpush.msrb.mxu1 %v722_v62  ;;  %832 = vmatpush.msrb.mxu2 %v723_v63  ;;  %v1174_v57 = vld [vmem:[#allocation2 + $0x308] sm:$0xff]  ;;  %v1175_v58 = vld [vmem:[#allocation2 + $0x310] sm:$0xff]  ;;  %v1176_v59 = vld [vmem:[#allocation2 + $0x318] sm:$0xff] }
  0x44   : > { %5580 = vmatmul.msk.f32.gmra.mxu0 %vm343_vm1, %v8426_v29  ;;  %858 = vmatpush.msrb.mxu3 %v724_v0  ;;  %v1195_v62 = vld [vmem:[#allocation2 + $0x3b0] sm:$0xf]  ;;  %v1196_v63 = vld [vmem:[#allocation2 + $0x3b8] sm:$0xf]  ;;  %v1189_v0 = vld [vmem:[#allocation2 + $0x380] sm:$0xff] }
  0x45   : > { %5584 = vmatmul.msk.f32.gmra.mxu1 %vm343_vm1, %v8426_v29  ;;  %5588 = vmatmul.msk.f32.gmra.mxu2 %vm343_vm1, %v289_v52  ;;  %v959_v29 = vld [vmem:[#allocation2 + $0x2b8] sm:$0xff] }
  0x46   : > { %5592 = vmatmul.msk.f32.gmra.mxu3 %vm343_vm1, %v289_v52  ;;  %781 = vmatpush.msrb.mxu0 %v715_v2 }
  0x47   : > { %807 = vmatpush.msrb.mxu1 %v716_v3  ;;  %833 = vmatpush.msrb.mxu2 %v717_v4 }
  0x48   : > { %859 = vmatpush.msrb.mxu3 %v718_v5 }
  0x4c   : > { %5581 = vmatmul.msk.f32.gmra.mxu0 %vm343_vm1, %v8439_v42 }
  0x4d   : > { %5585 = vmatmul.msk.f32.gmra.mxu1 %vm343_vm1, %v8439_v42  ;;  %5589 = vmatmul.msk.f32.gmra.mxu2 %vm343_vm1, %v290_v1  ;;  %v941_v42 = vld [vmem:[%s8408_s26 + $0xb] sm:$0xff] }
  0x4e   : > { %5593 = vmatmul.msk.f32.gmra.mxu3 %vm343_vm1, %v290_v1 }
  0x54   : > { %5595 = vmatmul.msk.f32.vlgmr.msra.gmra.mxu0 %vm343_vm1, %v288_v51 }
  0x55   : > { %5599 = vmatmul.msk.f32.vlgmr.msra.gmra.mxu1 %vm343_vm1, %v288_v51  ;;  %5603 = vmatmul.msk.f32.vlgmr.msra.gmra.mxu2 %vm343_vm1, %v288_v51 }
  0x56   : > { %5607 = vmatmul.msk.f32.vlgmr.msra.gmra.mxu3 %vm343_vm1, %v288_v51  ;;  %5626 = vmatpush.msk.msra.mxu0 %vm353_vm0, %v737_v6  ;;  %v1179_v51 = vld [vmem:[#allocation2 + $0x330] sm:$0xff] }
  0x57   : > { %5630 = vmatpush.msk.msra.mxu1 %vm353_vm0, %v738_v7  ;;  %5634 = vmatpush.msk.msra.mxu2 %vm353_vm0, %v962_v8  ;;  %v1183_v6 = vld [vmem:[#allocation2 + $0x350] sm:$0xff]  ;;  %v1184_v7 = vld [vmem:[#allocation2 + $0x358] sm:$0xff]  ;;  %v1177_v8 = vld [vmem:[#allocation2 + $0x320] sm:$0xff] }
  0x58   : > { %5638 = vmatpush.msk.msra.mxu3 %vm353_vm0, %v963_v9  ;;  %883 = vmatpush.msra.mxu0 %v731_v10  ;;  %v1178_v9 = vld [vmem:[#allocation2 + $0x328] sm:$0xff] }
  0x59   : > { %909 = vmatpush.msra.mxu1 %v732_v11  ;;  %1008 = vmatpush.msra.mxu2 %v956_v12 }
  0x5a   : > { %1034 = vmatpush.msra.mxu3 %v957_v13  ;;  %884 = vmatpush.msra.mxu0 %v725_v14  ;;  %v1169_v14 = vld [vmem:[%s8408_s26 + $0x4] sm:$0xff] }
  0x5b   : > { %910 = vmatpush.msra.mxu1 %v726_v15  ;;  %1009 = vmatpush.msra.mxu2 %v950_v16 }
  0x5c   : > { %5596 = vmatmul.msk.f32.gmra.mxu0 %vm343_vm1, %v289_v52  ;;  %1035 = vmatpush.msra.mxu3 %v951_v17 }
  0x5d   : > { %5600 = vmatmul.msk.f32.gmra.mxu1 %vm343_vm1, %v289_v52  ;;  %5604 = vmatmul.msk.f32.gmra.mxu2 %vm343_vm1, %v289_v52 }
  0x5e   : > { %5608 = vmatmul.msk.f32.gmra.mxu3 %vm343_vm1, %v289_v52  ;;  %885 = vmatpush.msra.mxu0 %v719_v18  ;;  %v1180_v52 = vld [vmem:[#allocation2 + $0x338] sm:$0xff] }
  0x5f   : > { %911 = vmatpush.msra.mxu1 %v720_v19  ;;  %1010 = vmatpush.msra.mxu2 %v944_v20  ;;  %v1170_v19 = vld [vmem:[%s8408_s26 + $0xc] sm:$0xff] }
  0x60   : > { %1036 = vmatpush.msra.mxu3 %v945_v21 }
  0x64   : > { %5597 = vmatmul.msk.f32.gmra.mxu0 %vm343_vm1, %v290_v1 }
  0x65   : > { %5601 = vmatmul.msk.f32.gmra.mxu1 %vm343_vm1, %v290_v1  ;;  %5605 = vmatmul.msk.f32.gmra.mxu2 %vm343_vm1, %v290_v1 }
  0x66   : > { %5609 = vmatmul.msk.f32.gmra.mxu3 %vm343_vm1, %v290_v1  ;;  %v1190_v1 = vld [vmem:[#allocation2 + $0x388] sm:$0xff] }
  0x6c   : > { %5611 = vmatmul.msk.f32.vlgmr.msrb.gmra.mxu0 %vm343_vm1, %v711_v22 }
  0x6d   : > { %5615 = vmatmul.msk.f32.vlgmr.msrb.gmra.mxu1 %vm343_vm1, %v711_v22  ;;  %5619 = vmatmul.msk.f32.vlgmr.msrb.gmra.mxu2 %vm343_vm1, %v711_v22 }
  0x6e   : > { %5623 = vmatmul.msk.f32.vlgmr.msrb.gmra.mxu3 %vm343_vm1, %v711_v22  ;;  %5642 = vmatpush.msk.msrb.mxu0 %vm353_vm0, %v964_v24  ;;  %v1171_v24 = vld [vmem:[%s8408_s26 + $0x14] sm:$0xff] }
  0x6f   : > { %5646 = vmatpush.msk.msrb.mxu1 %vm353_vm0, %v965_v25  ;;  %5650 = vmatpush.msk.msrb.mxu2 %vm353_vm0, %v966_v26 }
  0x70   : > { %5654 = vmatpush.msk.msrb.mxu3 %vm353_vm0, %v967_v27  ;;  %1060 = vmatpush.msrb.mxu0 %v958_v28 }
  0x71   : > { %1086 = vmatpush.msrb.mxu1 %v959_v29  ;;  %1112 = vmatpush.msrb.mxu2 %v960_v30 }
  0x72   : > { %1138 = vmatpush.msrb.mxu3 %v961_v31  ;;  %1061 = vmatpush.msrb.mxu0 %v952_v32 }
  0x73   : > { %1087 = vmatpush.msrb.mxu1 %v953_v33  ;;  %1113 = vmatpush.msrb.mxu2 %v954_v34 }
  0x74   : > { %5612 = vmatmul.msk.f32.gmra.mxu0 %vm343_vm1, %v712_v23  ;;  %1139 = vmatpush.msrb.mxu3 %v955_v35 }
  0x75   : > { %5616 = vmatmul.msk.f32.gmra.mxu1 %vm343_vm1, %v712_v23  ;;  %5620 = vmatmul.msk.f32.gmra.mxu2 %vm343_vm1, %v712_v23 }
  0x76   : > { %5624 = vmatmul.msk.f32.gmra.mxu3 %vm343_vm1, %v712_v23  ;;  %1062 = vmatpush.msrb.mxu0 %v946_v37 }
  0x77   : > { %1088 = vmatpush.msrb.mxu1 %v947_v38  ;;  %1114 = vmatpush.msrb.mxu2 %v948_v39 }
  0x78   : > { %1140 = vmatpush.msrb.mxu3 %v949_v40 }
  0x7c   : > { %5613 = vmatmul.msk.f32.gmra.mxu0 %vm343_vm1, %v713_v36 }
  0x7d   : > { %5617 = vmatmul.msk.f32.gmra.mxu1 %vm343_vm1, %v713_v36  ;;  %5621 = vmatmul.msk.f32.gmra.mxu2 %vm343_vm1, %v713_v36 }
  0x7e   : > { %5625 = vmatmul.msk.f32.gmra.mxu3 %vm343_vm1, %v713_v36 }
  0x84   : > { %5627 = vmatmul.msk.f32.vlgmr.msra.gmra.mxu0 %vm343_vm1, %v711_v22 }
  0x85   : > { %5631 = vmatmul.msk.f32.vlgmr.msra.gmra.mxu1 %vm343_vm1, %v711_v22  ;;  %5635 = vmatmul.msk.f32.vlgmr.msra.gmra.mxu2 %vm343_vm1, %v940_v41 }
  0x86   : > { %5639 = vmatmul.msk.f32.vlgmr.msra.gmra.mxu3 %vm343_vm1, %v940_v41  ;;  %5658 = vmatpush.msk.msra.mxu0 %vm353_vm0, %v1191_v43 }
  0x87   : > { %5662 = vmatpush.msk.msra.mxu1 %vm353_vm0, %v1192_v44  ;;  %5666 = vmatpush.msk.msra.mxu2 %vm353_vm0, %v1193_v45 }
  0x88   : > { %5670 = vmatpush.msk.msra.mxu3 %vm353_vm0, %v1194_v46  ;;  %1237 = vmatpush.msra.mxu0 %v1185_v47 }
  0x89   : > { %1263 = vmatpush.msra.mxu1 %v1186_v48  ;;  %1289 = vmatpush.msra.mxu2 %v1187_v49 }
  0x8a   : > { %1315 = vmatpush.msra.mxu3 %v1188_v50  ;;  %1238 = vmatpush.msra.mxu0 %v1179_v51 }
  0x8b   : > { %1264 = vmatpush.msra.mxu1 %v1180_v52  ;;  %1290 = vmatpush.msra.mxu2 %v1181_v53 }
  0x8c   : > { %5628 = vmatmul.msk.f32.gmra.mxu0 %vm343_vm1, %v712_v23  ;;  %1316 = vmatpush.msra.mxu3 %v1182_v55 }
  0x8d   : > { %5632 = vmatmul.msk.f32.gmra.mxu1 %vm343_vm1, %v712_v23  ;;  %5636 = vmatmul.msk.f32.gmra.mxu2 %vm343_vm1, %v941_v42 }
  0x8e   : > { %5640 = vmatmul.msk.f32.gmra.mxu3 %vm343_vm1, %v941_v42  ;;  %1239 = vmatpush.msra.mxu0 %v1173_v56 }
  0x8f   : > { %1265 = vmatpush.msra.mxu1 %v1174_v57  ;;  %1291 = vmatpush.msra.mxu2 %v1175_v58 }
  0x90   : > { %1317 = vmatpush.msra.mxu3 %v1176_v59 }
  0x94   : > { %5629 = vmatmul.msk.f32.gmra.mxu0 %vm343_vm1, %v713_v36 }
  0x95   : > { %5633 = vmatmul.msk.f32.gmra.mxu1 %vm343_vm1, %v713_v36  ;;  %5637 = vmatmul.msk.f32.gmra.mxu2 %vm343_vm1, %v942_v54 }
  0x96   : > { %5641 = vmatmul.msk.f32.gmra.mxu3 %vm343_vm1, %v942_v54 }
  0x9c   : > { %5643 = vmatmul.msk.f32.vlgmr.msrb.gmra.mxu0 %vm343_vm1, %v940_v41 }
  0x9d   : > { %5647 = vmatmul.msk.f32.vlgmr.msrb.gmra.mxu1 %vm343_vm1, %v940_v41  ;;  %5651 = vmatmul.msk.f32.vlgmr.msrb.gmra.mxu2 %vm343_vm1, %v940_v41 }
  0x9e   : > { %5655 = vmatmul.msk.f32.vlgmr.msrb.gmra.mxu3 %vm343_vm1, %v940_v41  ;;  %5674 = vmatpush.msk.msrb.mxu0 %vm353_vm0, %v1195_v62 }
  0x9f   : > { %5678 = vmatpush.msk.msrb.mxu1 %vm353_vm0, %v1196_v63 }
  0xa0   : > { %1341 = vmatpush.msrb.mxu0 %v1189_v0 }
  0xa1   : > { %v8534_v60 = vpop.f32.mrf.mxu0  ;;  %1367 = vmatpush.msrb.mxu1 %v1190_v1 }
  0xa2   : > { %v8536_v61 = vpop.f32.mrf.mxu1  ;;  %1342 = vmatpush.msrb.mxu0 %v1183_v6 }
  0xa3   : > { %1368 = vmatpush.msrb.mxu1 %v1184_v7 }
  0xa4   : > { %5644 = vmatmul.msk.f32.gmra.mxu0 %vm343_vm1, %v941_v42 }
  0xa5   : > { %5648 = vmatmul.msk.f32.gmra.mxu1 %vm343_vm1, %v941_v42  ;;  %5652 = vmatmul.msk.f32.gmra.mxu2 %vm343_vm1, %v941_v42 }
  0xa6   : > { %5656 = vmatmul.msk.f32.gmra.mxu3 %vm343_vm1, %v941_v42  ;;  %1343 = vmatpush.msrb.mxu0 %v1177_v8 }
  0xa7   : > { %1369 = vmatpush.msrb.mxu1 %v1178_v9 }
  0xa8   : > { %v8544_v2 = vpop.f32.mrf.mxu2 }
  0xa9   : > { %v8546_v3 = vpop.f32.mrf.mxu3  ;;  %v8548_v4 = vpop.f32.mrf.mxu0 }
  0xaa   : > { %v8550_v5 = vpop.f32.mrf.mxu1 }
  0xac   : > { %5645 = vmatmul.msk.f32.gmra.mxu0 %vm343_vm1, %v942_v54 }
  0xad   : > { %5649 = vmatmul.msk.f32.gmra.mxu1 %vm343_vm1, %v942_v54  ;;  %5653 = vmatmul.msk.f32.gmra.mxu2 %vm343_vm1, %v942_v54 }
  0xae   : > { %5657 = vmatmul.msk.f32.gmra.mxu3 %vm343_vm1, %v942_v54 }
  0xb0   : > { %v8556_v10 = vpop.f32.mrf.mxu2 }
  0xb1   : > { %v8558_v11 = vpop.f32.mrf.mxu3  ;;  %v395_v12 = vpop.f32.mrf.mxu0 }
  0xb2   : > { %v421_v13 = vpop.f32.mrf.mxu1 }
  0xb4   : > { %5659 = vmatmul.msk.f32.vlgmr.msra.gmra.mxu0 %vm343_vm1, %v1169_v14 }
  0xb5   : > { %5663 = vmatmul.msk.f32.vlgmr.msra.gmra.mxu1 %vm343_vm1, %v1169_v14  ;;  %5667 = vmatmul.msk.f32.vlgmr.msra.gmra.mxu2 %vm343_vm1, %v1169_v14 }
  0xb6   : > { %5671 = vmatmul.msk.f32.vlgmr.msra.gmra.mxu3 %vm343_vm1, %v1169_v14 }
  0xb8   : > { %v447_v15 = vpop.f32.mrf.mxu2 }
  0xb9   : > { %v473_v16 = vpop.f32.mrf.mxu3  ;;  %v8565_v17 = vpop.f32.mrf.mxu0 }
  0xba   : > { %v8567_v18 = vpop.f32.mrf.mxu1 }
  0xbc   : > { %5660 = vmatmul.msk.f32.gmra.mxu0 %vm343_vm1, %v1170_v19 }
  0xbd   : > { %5664 = vmatmul.msk.f32.gmra.mxu1 %vm343_vm1, %v1170_v19  ;;  %5668 = vmatmul.msk.f32.gmra.mxu2 %vm343_vm1, %v1170_v19 }
  0xbe   : > { %5672 = vmatmul.msk.f32.gmra.mxu3 %vm343_vm1, %v1170_v19 }
  0xc0   : > { %v8574_v20 = vpop.f32.mrf.mxu2 }
  0xc1   : > { %v8576_v21 = vpop.f32.mrf.mxu3  ;;  %v496_v22 = vpop.f32.mrf.mxu0 }
  0xc2   : > { %v522_v23 = vpop.f32.mrf.mxu1 }
  0xc4   : > { %5661 = vmatmul.msk.f32.gmra.mxu0 %vm343_vm1, %v1171_v24 }
  0xc5   : > { %5665 = vmatmul.msk.f32.gmra.mxu1 %vm343_vm1, %v1171_v24  ;;  %5669 = vmatmul.msk.f32.gmra.mxu2 %vm343_vm1, %v1171_v24 }
  0xc6   : > { %5673 = vmatmul.msk.f32.gmra.mxu3 %vm343_vm1, %v1171_v24 }
  0xc8   : > { %v8583_v25 = vpop.f32.mrf.mxu2 }
  0xc9   : > { %v601_v26 = vpop.f32.mrf.mxu3  ;;  %v8585_v27 = vpop.f32.mrf.mxu0 }
  0xca   : > { %v8587_v28 = vpop.f32.mrf.mxu1 }
  0xcc   : > { %5675 = vmatmul.msk.f32.vlgmr.msrb.gmra.mxu0 %vm343_vm1, %v1169_v14 }
  0xcd   : > { %5679 = vmatmul.msk.f32.vlgmr.msrb.gmra.mxu1 %vm343_vm1, %v1169_v14 }
  0xd0   : > { %v578_v29 = vpop.f32.mrf.mxu2 }
  0xd1   : > { %v604_v30 = vpop.f32.mrf.mxu3  ;;  %v8591_v31 = vadd.f32 %v578_v29, %v395_v12  ;;  %v624_v33 = vpop.f32.mrf.mxu0 }
  0xd2   : > { %v8593_v32 = vadd.f32 %v604_v30, %v421_v13  ;;  %v650_v34 = vpop.f32.mrf.mxu1  ;;  %v625_v49 = vadd.f32 %v624_v33, %v8544_v2 }
  0xd3   : > { %v651_v50 = vadd.f32 %v650_v34, %v8546_v3 }
  0xd4   : > { %9036 = vst [vmem:[#allocation12_spill] sm:$0xff] %v8593_v32  ;;  %5676 = vmatmul.msk.f32.gmra.mxu0 %vm343_vm1, %v1170_v19 }
  0xd5   : > { %5680 = vmatmul.msk.f32.gmra.mxu1 %vm343_vm1, %v1170_v19  ;;  %v602_v19 = vadd.f32 %v601_v26, %v8550_v5 }
  0xd8   : > { %v8597_v35 = vpop.f32.mrf.mxu2 }
  0xd9   : > { %v8599_v36 = vpop.f32.mrf.mxu3  ;;  %v8601_v37 = vpop.f32.mrf.mxu0 }
  0xda   : > { %v8603_v38 = vpop.f32.mrf.mxu1 }
  0xdc   : > { %5677 = vmatmul.msk.f32.gmra.mxu0 %vm343_vm1, %v1171_v24 }
  0xdd   : > { %5681 = vmatmul.msk.f32.gmra.mxu1 %vm343_vm1, %v1171_v24 }
  0xe0   : > { %v679_v39 = vpop.f32.mrf.mxu2 }
  0xe1   : > { %v705_v40 = vpop.f32.mrf.mxu3  ;;  %v8607_v41 = vadd.f32 %v679_v39, %v496_v22  ;;  %v630_v43 = vpop.f32.mrf.mxu0 }
  0xe2   : > { %v8609_v42 = vadd.f32 %v705_v40, %v522_v23  ;;  %v656_v44 = vpop.f32.mrf.mxu1  ;;  %v631_v63 = vadd.f32 %v630_v43, %v447_v15 }
  0xe3   : > { %v657_v0 = vadd.f32 %v656_v44, %v473_v16 }
  0xe8   : > { %v8611_v45 = vpop.f32.mrf.mxu2 }
  0xe9   : > { %v8613_v46 = vpop.f32.mrf.mxu3  ;;  %v783_v47 = vpop.f32.mrf.mxu0 }
  0xea   : > { %v8615_v48 = vpop.f32.mrf.mxu1 }
  0xf0   : > { %v835_v51 = vpop.f32.mrf.mxu2 }
  0xf1   : > { %v861_v52 = vpop.f32.mrf.mxu3  ;;  %v8619_v53 = vadd.f32 %v835_v51, %v625_v49  ;;  %v786_v55 = vpop.f32.mrf.mxu0 }
  0xf2   : > { %v925_v54 = vadd.f32 %v861_v52, %v651_v50  ;;  %v812_v56 = vpop.f32.mrf.mxu1 }
  0xf3   : > { %v929_v22 = vadd.f32 %v812_v56, %v602_v19 }
  0xf8   : > { %v8621_v57 = vpop.f32.mrf.mxu2 }
  0xf9   : > { %v864_v58 = vpop.f32.mrf.mxu3  ;;  %v8623_v59 = vpop.f32.mrf.mxu0 }
  0xfa   : > { %v8625_v62 = vpop.f32.mrf.mxu1 }
  0xfb   : > { %9037 = vst [vmem:[#allocation13_spill] sm:$0xff] %v8625_v62 }
 0x100   : > { %v841_v1 = vpop.f32.mrf.mxu2 }
 0x101   : > { %v867_v2 = vpop.f32.mrf.mxu3  ;;  %v8627_v6 = vadd.f32 %v841_v1, %v631_v63  ;;  %v887_v7 = vpop.f32.mrf.mxu0 }
 0x102   : > { %v8629_v3 = vadd.f32 %v867_v2, %v657_v0  ;;  %v913_v8 = vpop.f32.mrf.mxu1  ;;  %v573_v0 = vadd.f32 %v8574_v20, %v8534_v60 }
 0x103   : > { %9038 = vst [vmem:[#allocation14_spill] sm:$0xff] %v8627_v6 }
 0x104   : > { %v922_v1 = vadd.f32 %v783_v47, %v573_v0 }
 0x108   : > { %v1012_v9 = vpop.f32.mrf.mxu2 }
 0x109   : > { %v1038_v12 = vpop.f32.mrf.mxu3  ;;  %v8631_v13 = vpop.f32.mrf.mxu0  ;;  %v1151_v2 = vadd.f32 %v1012_v9, %v922_v1  ;;  %v599_v1 = vadd.f32 %v8576_v21, %v8536_v61 }
 0x10a   : > { %v8633_v14 = vpop.f32.mrf.mxu1 }
 0x110   : > { %v1015_v23 = vpop.f32.mrf.mxu2 }
 0x111   : > { %v1041_v15 = vpop.f32.mrf.mxu3  ;;  %v8638_v24 = vpop.f32.mrf.mxu0 }
 0x112   : > { %v8636_v16 = vadd.f32 %v1041_v15, %v929_v22  ;;  %9039 = vst [vmem:[#allocation15_spill] sm:$0xff] %v8638_v24  ;;  %v8640_v29 = vpop.f32.mrf.mxu1  ;;  %v576_v24 = vadd.f32 %v8583_v25, %v8548_v4  ;;  %v677_v4 = vadd.f32 %v8597_v35, %v8565_v17  ;;  %v1433_v25 = vlaneseq  ;;  %v8677_v35 = vld [vmem:[#allocation4] sm:$0x7] }
 0x113   : > { %9040 = vst [vmem:[#allocation16_spill] sm:$0xff] %v8640_v29 }
 0x114   : > { %v928_v32 = vadd.f32 %v786_v55, %v576_v24  ;;  %v926_v55 = vadd.f32 %v887_v7, %v677_v4  ;;  %v9044_v4 = vld [vmem:[#allocation12_spill] sm:$0xff] }
 0x116   : > { %v1157_v20 = vadd.f32 %v1015_v23, %v928_v32  ;;  %v923_v32 = vadd.f32 %v8615_v48, %v599_v1 }
 0x118   : > { %v1018_v39 = vpop.f32.mrf.mxu2 }
 0x119   : > { %v8642_v30 = vpop.f32.mrf.mxu3  ;;  %v1064_v33 = vpop.f32.mrf.mxu0 }
 0x11a   : > { %9041 = vst [vmem:[#allocation17_spill] sm:$0xff] %v8642_v30  ;;  %v1090_v34 = vpop.f32.mrf.mxu1  ;;  %v1153_v21 = vadd.f32 %v1064_v33, %v8619_v53  ;;  %v628_v53 = vadd.f32 %v8601_v37, %v8556_v10 }
 0x11b   : > { %v1154_v19 = vadd.f32 %v1090_v34, %v925_v54 }
 0x120   : > { %v1116_v49 = vpop.f32.mrf.mxu2 }
 0x121   : > { %v1142_v40 = vpop.f32.mrf.mxu3  ;;  %v8644_v43 = vpop.f32.mrf.mxu0  ;;  %v1155_v24 = vadd.f32 %v1116_v49, %v926_v55  ;;  %v9048_v55 = vld [vmem:[#allocation17_spill] sm:$0xff] }
 0x122   : > { %v1093_v44 = vpop.f32.mrf.mxu1 }
 0x128   : > { %v8650_v51 = vpop.f32.mrf.mxu2 }
 0x129   : > { %v8646_v5 = vpop.f32.mrf.mxu3  ;;  %v8648_v26 = vpop.f32.mrf.mxu0 }
 0x12a   : > { %9042 = vst [vmem:[#allocation18_spill] sm:$0xff] %v8648_v26  ;;  %v1096_v50 = vpop.f32.mrf.mxu1 }
 0x12b   : > { %v1166_v61 = vadd.f32 %v1096_v50, %v8629_v3  ;;  %v930_v50 = vadd.f32 %v8621_v57, %v628_v53 }
 0x130   : > { %v8656_v22 = vpop.f32.mrf.mxu2 }
 0x131   : > { %v8652_v52 = vpop.f32.mrf.mxu3  ;;  %v1241_v56 = vpop.f32.mrf.mxu0 }
 0x132   : > { %9043 = vst [vmem:[#allocation19_spill] sm:$0xff] %v8652_v52  ;;  %v1267_v63 = vpop.f32.mrf.mxu1  ;;  %v1380_v6 = vadd.f32 %v1241_v56, %v1151_v2  ;;  %v654_v52 = vadd.f32 %v8603_v38, %v8558_v11  ;;  %v703_v11 = vadd.f32 %v8599_v36, %v8567_v18  ;;  %v934_v38 = vadd.f32 %v8623_v59, %v8591_v31 }
 0x133   : > { %v8679_v18 = vshrl.u32 %v1433_v25, 7 }
 0x134   : > { %v931_v60 = vadd.f32 %v864_v58, %v654_v52  ;;  %v927_v58 = vadd.f32 %v913_v8, %v703_v11  ;;  %v1163_v23 = vadd.f32 %v1018_v39, %v934_v38  ;;  %v932_v52 = vadd.f32 %v8631_v13, %v8607_v41  ;;  %v9045_v11 = vld [vmem:[#allocation13_spill] sm:$0xff] }
 0x135   : > { %v1438_v49 = vmul.u32 2, %v8679_v18  ;;  %v8716_v41 = vadd.s32 8, %v8679_v18 }
 0x136   : > { %v1160_v47 = vadd.f32 %v1093_v44, %v931_v60  ;;  %v1159_v60 = vadd.f32 %v8644_v43, %v930_v50 }
 0x137   : > { %v1446_v50 = vadd.s32 1, %v1438_v49 }
 0x138   : > { %v1293_v2 = vpop.f32.mrf.mxu2 }
 0x139   : > { %v1319_v15 = vpop.f32.mrf.mxu3  ;;  %v1244_v29 = vpop.f32.mrf.mxu0  ;;  %v8683_v59 = vadd.f32 %v1293_v2, %v1153_v21  ;;  %v709_v2 = vadd.f32 %v8613_v46, %v8587_v28  ;;  %v9049_v46 = vld [vmem:[#allocation14_spill] sm:$0xff]  ;;  %v9051_v21 = vld [vmem:[#allocation19_spill] sm:$0xff] }
 0x13a   : > { %v1383_v30 = vadd.f32 %v1319_v15, %v1154_v19  ;;  %v8658_v26 = vpop.f32.mrf.mxu1  ;;  %v1386_v9 = vadd.f32 %v1244_v29, %v1157_v20  ;;  %v1156_v29 = vadd.f32 %v1142_v40, %v927_v58  ;;  %v8696_v40 = vand.u32 127, %v1433_v25 }
 0x13b   : > { %v933_v15 = vadd.f32 %v8633_v14, %v8609_v42  ;;  %v1161_v20 = vadd.f32 %v8650_v51, %v932_v52  ;;  %v1387_v43 = vadd.f32 %v8658_v26, %v8636_v16 }
 0x13c   : > { %v1398_v62 = vmax.f32 %v1380_v6, %v1383_v30  ;;  %v1152_v6 = vadd.f32 %v1038_v12, %v923_v32  ;;  %v1409_v12 = vperm.slane %v8677_v35, 0  ;;  %vm1440_vm2 = vcmp.eq.s32.totalorder %v8696_v40, %v1438_v49  ;;  %v9047_v32 = vld [vmem:[#allocation16_spill] sm:$0xff] }
 0x13d   : > { %v1162_v57 = vadd.f32 %v8646_v5, %v933_v15  ;;  %v683_v5 = vadd.f32 %v8611_v45, %v8585_v27  ;;  %v935_v27 = vadd.f32 %v9045_v11, %v9044_v4  ;;  %v9046_v45 = vld [vmem:[#allocation15_spill] sm:$0xff]  ;;  %v939_v38 = vadd.f32 %v9047_v32, %v709_v2  ;;  %v7748_v4 = vld [vmem:[#allocation6 + $0x3cc] sm:$0xf0]  ;;  %v5798_v32 = vld [vmem:[#allocation6 + $0x3d0] sm:$0xf0] }
 0x13e   : > { %v8681_v31 = vadd.f32 %v1267_v63, %v1152_v6  ;;  %v9050_v6 = vld [vmem:[#allocation18_spill] sm:$0xff]  ;;  %vm1448_vm5 = vcmp.eq.s32.totalorder %v8696_v40, %v1446_v50 }
 0x13f   : > { %v938_v25 = vadd.f32 %v9046_v45, %v683_v5  ;;  %v1164_v58 = vadd.f32 %v9048_v55, %v935_v27  ;;  %v7812_v5 = vld [vmem:[#allocation6 + $0x5cc] sm:$0xf0]  ;;  %v6036_v55 = vld [vmem:[#allocation6 + $0x5a0] sm:$0xf] }
 0x140   : > { %v1296_v63 = vpop.f32.mrf.mxu2 }
 0x141   : > { %v1322_v54 = vpop.f32.mrf.mxu3  ;;  %v1247_v0 = vpop.f32.mrf.mxu0  ;;  %v1388_v51 = vadd.f32 %v1296_v63, %v1159_v60 }
 0x142   : > { %v1389_v34 = vadd.f32 %v1322_v54, %v1160_v47  ;;  %v8664_v56 = vpop.f32.mrf.mxu1  ;;  %v1392_v36 = vadd.f32 %v1247_v0, %v1163_v23  ;;  %v8711_v54 = vadd.f32 %v1409_v12, %v1398_v62  ;;  %v8308_v0 = vmov 0.0  }
 0x143   : > { %v8729_v1 = vsel %vm1440_vm2, 1.0, %v8308_v0  ;;  %v1165_v23 = vadd.f32 %v9050_v6, %v9049_v46  ;;  %v1393_v18 = vadd.f32 %v8664_v56, %v1164_v58  ;;  %v7808_v58 = vld [vmem:[#allocation6 + $0x5ac] sm:$0xf0] }
 0x144   : > { %v1401_v19 = vmax.f32 %v1386_v9, %v1389_v34  ;;  %v1424_v34 = vmax.f32 %v8711_v54, 0.0 }
 0x146   : > { %v8704_v37 = vadd.f32 %v1409_v12, %v1401_v19  ;;  %v1439_v19 = vmul.u32 2, %v8716_v41 }
 0x148   : > { %v1427_v14 = vmax.f32 %v8704_v37, 0.0  ;;  %v1299_v28 = vpop.f32.mrf.mxu2  ;;  %vm1441_vm4 = vcmp.eq.s32.totalorder %v8696_v40, %v1439_v19  ;;  %v5908_v37 = vld [vmem:[#allocation6 + $0x4a0] sm:$0xf] }
 0x149   : > { %v1325_v17 = vpop.f32.mrf.mxu3  ;;  %v1345_v30 = vpop.f32.mrf.mxu0 }
 0x14a   : > { %v1395_v48 = vadd.f32 %v1325_v17, %v1166_v61  ;;  %v1371_v44 = vpop.f32.mrf.mxu1  ;;  %v8685_v7 = vadd.f32 %v1345_v30, %v1155_v24  ;;  %v1167_v61 = vadd.f32 %v8656_v22, %v938_v25  ;;  %v1168_v24 = vadd.f32 %v9051_v21, %v939_v38  ;;  %v7746_v25 = vld [vmem:[#allocation6 + $0x3c4] sm:$0xf]  ;;  %v5924_v38 = vld [vmem:[#allocation6 + $0x4c0] sm:$0xf] }
 0x14b   : > { %v8687_v3 = vadd.f32 %v1371_v44, %v1156_v29  ;;  %v8750_v44 = vsel %vm1441_vm4, 1.0, %v8308_v0  ;;  %v1411_v22 = vperm.slane %v8677_v35, 2 }
 0x14c   : > { %v1404_v8 = vmax.f32 %v1392_v36, %v1395_v48  ;;  %v1399_v33 = vmax.f32 %v8681_v31, %v8685_v7  ;;  %v1394_v36 = vadd.f32 %v1299_v28, %v1165_v23  ;;  %v8764_v31 = vsel %vm1448_vm5, 1.0, %v8308_v0  ;;  %v5812_v7 = vld [vmem:[#allocation6 + $0x3e0] sm:$0xf] }
 0x14d   : > { %v1400_v39 = vmax.f32 %v8683_v59, %v8687_v3  ;;  %v1447_v59 = vadd.s32 1, %v1439_v19  ;;  %v5940_v3 = vld [vmem:[#allocation6 + $0x4e0] sm:$0xf]  ;;  %v5801_v28 = vor.u32 %v7746_v25, %v5798_v32  ;;  %v6037_v23 = vor.u32 %v7808_v58, %v6036_v55  ;;  %v7736_v32 = vld [vmem:[#allocation6 + $0x36c] sm:$0xf0] }
 0x14e   : > { %v8702_v10 = vadd.f32 %v1409_v12, %v1404_v8  ;;  %v1410_v8 = vperm.slane %v8677_v35, 1  ;;  %v5796_v19 = vld [vmem:[#allocation6 + $0x3c0] sm:$0xf]  ;;  %v7810_v55 = vld [vmem:[#allocation6 + $0x5c4] sm:$0xf] }
 0x14f   : > { %v1417_v41 = vadd.f32 %v1411_v22, %v1400_v39  ;;  %vm1449_vm6 = vcmp.eq.s32.totalorder %v8696_v40, %v1447_v59  ;;  %v6020_v40 = vld [vmem:[#allocation6 + $0x580] sm:$0xf]  ;;  %v6054_v58 = vld [vmem:[#allocation6 + $0x5d0] sm:$0xf0] }
 0x150   : > { %v1430_v47 = vmax.f32 %v8702_v10, 0.0  ;;  %v7780_v10 = vld [vmem:[#allocation6 + $0x4cc] sm:$0xf0]  ;;  %v5685_v46 = vsel %vm1449_vm6, 1.0, %v8308_v0  ;;  %v5828_v59 = vld [vmem:[#allocation6 + $0x400] sm:$0xf] }
 0x151   : > { %v1348_v13 = vpop.f32.mrf.mxu0  ;;  %v5925_v6 = vor.u32 %v7780_v10, %v5924_v38  ;;  %v7772_v0 = vld [vmem:[#allocation6 + $0x48c] sm:$0xf0]  ;;  %v5748_v25 = vld [vmem:[#allocation6 + $0x360] sm:$0xf]  ;;  %v7734_v38 = vld [vmem:[#allocation6 + $0x364] sm:$0xf] }
 0x152   : > { %1474 = vmatpush.msrb.mxu2 %v1430_v47  ;;  %v1374_v42 = vpop.f32.mrf.mxu1  ;;  %v1390_v62 = vadd.f32 %v1348_v13, %v1161_v20  ;;  %v6068_v13 = vld [vmem:[#allocation6 + $0x5e0] sm:$0xf]  ;;  %v5749_v10 = vor.u32 %v7736_v32, %v5748_v25  ;;  %v5932_v32 = vld [vmem:[#allocation6 + $0x4c8] sm:$0xf] }
 0x153   : > { %v1391_v9 = vadd.f32 %v1374_v42, %v1162_v57  ;;  %v1416_v57 = vadd.f32 %v1410_v8, %v1399_v33  ;;  %v7816_v42 = vld [vmem:[#allocation6 + $0x5ec] sm:$0xf0] }
 0x154   : > { %1475 = vmatpush.msrb.mxu2 %v1427_v14  ;;  %v1402_v16 = vmax.f32 %v1387_v43, %v1390_v62  ;;  %v7784_v33 = vld [vmem:[#allocation6 + $0x4ec] sm:$0xf0]  ;;  %v6069_v39 = vor.u32 %v7816_v42, %v6068_v13  ;;  %v5782_v13 = vld [vmem:[#allocation6 + $0x3b0] sm:$0xf0]  ;;  %v5764_v42 = vld [vmem:[#allocation6 + $0x380] sm:$0xf] }
 0x155   : > { %v1403_v26 = vmax.f32 %v1388_v51, %v1391_v9  ;;  %v1425_v43 = vmax.f32 %v1416_v57, 0.0  ;;  %v1426_v51 = vmax.f32 %v1417_v41, 0.0  ;;  %v7752_v62 = vld [vmem:[#allocation6 + $0x3ec] sm:$0xf0]  ;;  %v6052_v9 = vld [vmem:[#allocation6 + $0x5c0] sm:$0xf]  ;;  %v5941_v27 = vor.u32 %v7784_v33, %v5940_v3 }
 0x156   : > { %1476 = vmatpush.msrb.mxu2 %v1424_v34  ;;  %v1419_v15 = vadd.f32 %v1410_v8, %v1402_v16  ;;  %v5813_v2 = vor.u32 %v7752_v62, %v5812_v7  ;;  %v7750_v16 = vld [vmem:[#allocation6 + $0x3e4] sm:$0xf]  ;;  %v6053_v45 = vor.u32 %v7812_v5, %v6052_v9  ;;  %v7792_v57 = vld [vmem:[#allocation6 + $0x52c] sm:$0xf0] }
 0x157   : > { %5686 = vmatmul.msk.f32.vlgmr.msrb.gmra.mxu2 %vm1454_vm3, %v8729_v1  ;;  %v1420_v56 = vadd.f32 %v1411_v22, %v1403_v26  ;;  %v5814_v26 = vld [vmem:[#allocation6 + $0x3f0] sm:$0xf0]  ;;  %v7756_v7 = vld [vmem:[#allocation6 + $0x40c] sm:$0xf0]  ;;  %v7738_v9 = vld [vmem:[#allocation6 + $0x384] sm:$0xf] }
 0x158   : > { %v1428_v35 = vmax.f32 %v1419_v15, 0.0  ;;  %v5817_v11 = vor.u32 %v7750_v16, %v5814_v26  ;;  %v5844_v15 = vld [vmem:[#allocation6 + $0x420] sm:$0xf]  ;;  %v5829_v33 = vor.u32 %v7756_v7, %v5828_v59  ;;  %v7788_v62 = vld [vmem:[#allocation6 + $0x50c] sm:$0xf0] }
 0x159   : > { %v1351_v29 = vpop.f32.mrf.mxu0  ;;  %v1429_v49 = vmax.f32 %v1420_v56, 0.0  ;;  %v7814_v16 = vld [vmem:[#allocation6 + $0x5e4] sm:$0xf]  ;;  %v6070_v26 = vld [vmem:[#allocation6 + $0x5f0] sm:$0xf0] }
 0x15a   : > { %v1377_v17 = vpop.f32.mrf.mxu1  ;;  %v1396_v48 = vadd.f32 %v1351_v29, %v1167_v61  ;;  %v7804_v61 = vld [vmem:[#allocation6 + $0x58c] sm:$0xf0]  ;;  %v6006_v59 = vld [vmem:[#allocation6 + $0x570] sm:$0xf0]  ;;  %v5756_v7 = vld [vmem:[#allocation6 + $0x368] sm:$0xf] }
 0x15b   : > { %v1397_v30 = vadd.f32 %v1377_v17, %v1168_v24  ;;  %v6021_v21 = vor.u32 %v7804_v61, %v6020_v40  ;;  %v6004_v24 = vld [vmem:[#allocation6 + $0x560] sm:$0xf]  ;;  %v7800_v29 = vld [vmem:[#allocation6 + $0x56c] sm:$0xf0]  ;;  %v7730_v61 = vld [vmem:[#allocation6 + $0x344] sm:$0xf] }
 0x15c   : > { %v1405_v53 = vmax.f32 %v1393_v18, %v1396_v48  ;;  %v5876_v18 = vld [vmem:[#allocation6 + $0x460] sm:$0xf]  ;;  %v6005_v48 = vor.u32 %v7800_v29, %v6004_v24  ;;  %v7732_v40 = vld [vmem:[#allocation6 + $0x34c] sm:$0xf0]  ;;  %v5788_v24 = vld [vmem:[#allocation6 + $0x3a8] sm:$0xf] }
 0x15d   : > { %v1406_v12 = vmax.f32 %v1394_v36, %v1397_v30  ;;  %v7768_v36 = vld [vmem:[#allocation6 + $0x46c] sm:$0xf0]  ;;  %v5988_v30 = vld [vmem:[#allocation6 + $0x540] sm:$0xf] }
 0x15e   : > { %v1422_v52 = vadd.f32 %v1410_v8, %v1405_v53  ;;  %v5877_v53 = vor.u32 %v7768_v36, %v5876_v18  ;;  %v5860_v8 = vld [vmem:[#allocation6 + $0x440] sm:$0xf]  ;;  %v7745_v18 = vld [vmem:[#allocation6 + $0x3b4] sm:$0xf0] }
 0x15f   : > { %v1423_v63 = vadd.f32 %v1411_v22, %v1406_v12  ;;  %5687 = vmatmul.msk.f32.gmra.mxu2 %vm1454_vm3, %v8750_v44  ;;  %v7764_v12 = vld [vmem:[#allocation6 + $0x44c] sm:$0xf0]  ;;  %v5789_v36 = vor.u32 %v7745_v18, %v5788_v24  ;;  %v7786_v24 = vld [vmem:[#allocation6 + $0x504] sm:$0xf]  ;;  %v5708_v18 = vld [vmem:[#allocation6 + $0x308] sm:$0xf] }
 0x160   : > { %v1431_v60 = vmax.f32 %v1422_v52, 0.0  ;;  %v5861_v50 = vor.u32 %v7764_v12, %v5860_v8  ;;  %v5780_v52 = vld [vmem:[#allocation6 + $0x3a0] sm:$0xf]  ;;  %v5718_v8 = vld [vmem:[#allocation6 + $0x330] sm:$0xf0] }
 0x161   : > { %v1432_v20 = vmax.f32 %v1423_v63, 0.0  ;;  %v7744_v63 = vld [vmem:[#allocation6 + $0x3ac] sm:$0xf0]  ;;  %v7802_v12 = vld [vmem:[#allocation6 + $0x584] sm:$0xf] }
 0x162   : > { %1497 = vmatpush.msrb.mxu3 %v1431_v60  ;;  %1572 = vmatpush.msra.mxu0 %v1431_v60  ;;  %v5781_v56 = vor.u32 %v7744_v63, %v5780_v52  ;;  %v7760_v60 = vld [vmem:[#allocation6 + $0x42c] sm:$0xf0]  ;;  %v5772_v63 = vld [vmem:[#allocation6 + $0x388] sm:$0xf] }
 0x163   : > { %1520 = vmatpush.msra.mxu2 %v1432_v20  ;;  %1595 = vmatpush.msra.mxu1 %v1432_v20  ;;  %v5972_v20 = vld [vmem:[#allocation6 + $0x520] sm:$0xf]  ;;  %v5845_v41 = vor.u32 %v7760_v60, %v5844_v15  ;;  %v7741_v15 = vld [vmem:[#allocation6 + $0x394] sm:$0xf0] }
 0x164   : > { %1498 = vmatpush.msrb.mxu3 %v1428_v35  ;;  %1573 = vmatpush.msra.mxu0 %v1428_v35  ;;  %v5973_v35 = vor.u32 %v7792_v57, %v5972_v20  ;;  %v5700_v60 = vld [vmem:[#allocation6 + $0x300] sm:$0xf]  ;;  %v7724_v20 = vld [vmem:[#allocation6 + $0x30c] sm:$0xf0]  ;;  %v7722_v57 = vld [vmem:[#allocation6 + $0x304] sm:$0xf] }
 0x165   : > { %1521 = vmatpush.msra.mxu2 %v1429_v49  ;;  %1596 = vmatpush.msra.mxu1 %v1429_v49  ;;  %v7742_v49 = vld [vmem:[#allocation6 + $0x3a4] sm:$0xf] }
 0x166   : > { %1499 = vmatpush.msrb.mxu3 %v1425_v43  ;;  %1574 = vmatpush.msra.mxu0 %v1425_v43  ;;  %v5785_v43 = vor.u32 %v7742_v49, %v5782_v13  ;;  %v7782_v49 = vld [vmem:[#allocation6 + $0x4e4] sm:$0xf]  ;;  %v5942_v13 = vld [vmem:[#allocation6 + $0x4f0] sm:$0xf0] }
 0x167   : > { %1522 = vmatpush.msra.mxu2 %v1426_v51  ;;  %1597 = vmatpush.msra.mxu1 %v1426_v51  ;;  %v7740_v51 = vld [vmem:[#allocation6 + $0x38c] sm:$0xf0] }
 0x168   : > { %5688 = vmatmul.msk.f32.vlgmr.msrb.gmra.mxu3 %vm1454_vm3, %v8729_v1  ;;  %5690 = vmatmul.msk.f32.vlgmr.msra.gmra.mxu2 %vm1454_vm3, %v8729_v1  ;;  %v5765_v3 = vor.u32 %v7740_v51, %v5764_v42  ;;  %v7798_v51 = vld [vmem:[#allocation6 + $0x564] sm:$0xf] }
 0x169   : > { %1549 = vmatpush.msra.mxu3 %v1430_v47  ;;  %5694 = vmatmul.msk.f32.vlgmr.msra.gmra.mxu0 %vm1454_vm3, %v8764_v31  ;;  %v5797_v47 = vor.u32 %v7748_v4, %v5796_v19  ;;  %v6073_v4 = vor.u32 %v7814_v16, %v6070_v26  ;;  %v5926_v16 = vld [vmem:[#allocation6 + $0x4d0] sm:$0xf0]  ;;  %v7794_v26 = vld [vmem:[#allocation6 + $0x544] sm:$0xf] }
 0x16a   : > { %5696 = vmatmul.msk.f32.vlgmr.msra.gmra.mxu1 %vm1454_vm3, %v8764_v31  ;;  %2340 = vmatpush.bf16.msrb.mxu0 %v6069_v39  ;;  %v5956_v39 = vld [vmem:[#allocation6 + $0x500] sm:$0xf] }
 0x16b   : > { %1550 = vmatpush.msra.mxu3 %v1427_v14  ;;  %2314 = vmatpush.bf16.msrb.mxu2 %v5813_v2  ;;  %v7776_v14 = vld [vmem:[#allocation6 + $0x4ac] sm:$0xf0]  ;;  %v5957_v5 = vor.u32 %v7788_v62, %v5956_v39  ;;  %v5766_v2 = vld [vmem:[#allocation6 + $0x390] sm:$0xf0]  ;;  %v5948_v39 = vld [vmem:[#allocation6 + $0x4e8] sm:$0xf] }
 0x16c   : > { %2353 = vmatpush.bf16.msrb.mxu1 %v5817_v11  ;;  %v5909_v54 = vor.u32 %v7776_v14, %v5908_v37  ;;  %v5769_v19 = vor.u32 %v7738_v9, %v5766_v2  ;;  %v5820_v11 = vld [vmem:[#allocation6 + $0x3e8] sm:$0xf]  ;;  %v7749_v37 = vld [vmem:[#allocation6 + $0x3d4] sm:$0xf0]  ;;  %v5732_v14 = vld [vmem:[#allocation6 + $0x340] sm:$0xf] }
 0x16d   : > { %1551 = vmatpush.msra.mxu3 %v1424_v34  ;;  %v5892_v34 = vld [vmem:[#allocation6 + $0x480] sm:$0xf]  ;;  %v7785_v62 = vld [vmem:[#allocation6 + $0x4f4] sm:$0xf0]  ;;  %v7778_v2 = vld [vmem:[#allocation6 + $0x4c4] sm:$0xf] }
 0x16e   : > { %2341 = vmatpush.bf16.msrb.mxu0 %v6053_v45  ;;  %v5893_v17 = vor.u32 %v7772_v0, %v5892_v34  ;;  %v5733_v34 = vor.u32 %v7732_v40, %v5732_v14  ;;  %v7806_v0 = vld [vmem:[#allocation6 + $0x5a4] sm:$0xf] }
 0x16f   : > { %2327 = vmatpush.bf16.msrb.mxu3 %v5941_v27  ;;  %2315 = vmatpush.bf16.msrb.mxu2 %v5797_v47  ;;  %v7753_v27 = vld [vmem:[#allocation6 + $0x3f4] sm:$0xf0]  ;;  %v5750_v47 = vld [vmem:[#allocation6 + $0x370] sm:$0xf0] }
 0x170   : > { %5689 = vmatmul.msk.f32.gmra.mxu3 %vm1454_vm3, %v8750_v44  ;;  %5691 = vmatmul.msk.f32.gmra.mxu2 %vm1454_vm3, %v8750_v44  ;;  %v7796_v44 = vld [vmem:[#allocation6 + $0x54c] sm:$0xf0]  ;;  %v5821_v45 = vor.u32 %v7753_v27, %v5820_v11  ;;  %v5740_v11 = vld [vmem:[#allocation6 + $0x348] sm:$0xf]  ;;  %v7733_v27 = vld [vmem:[#allocation6 + $0x354] sm:$0xf0] }
 0x171   : > { %5695 = vmatmul.msk.f32.gmra.mxu0 %vm1454_vm3, %v5685_v46  ;;  %2354 = vmatpush.bf16.msrb.mxu1 %v5801_v28  ;;  %v5989_v22 = vor.u32 %v7796_v44, %v5988_v30  ;;  %v5753_v28 = vor.u32 %v7734_v38, %v5750_v47  ;;  %v7728_v30 = vld [vmem:[#allocation6 + $0x32c] sm:$0xf0]  ;;  %v7726_v44 = vld [vmem:[#allocation6 + $0x324] sm:$0xf]  ;;  %v5741_v25 = vor.u32 %v7733_v27, %v5740_v11  ;;  %v7781_v38 = vld [vmem:[#allocation6 + $0x4d4] sm:$0xf0] }
 0x172   : > { %5697 = vmatmul.msk.f32.gmra.mxu1 %vm1454_vm3, %v5685_v46  ;;  %2342 = vmatpush.bf16.msrb.mxu0 %v6037_v23  ;;  %v7774_v47 = vld [vmem:[#allocation6 + $0x4a4] sm:$0xf] }
 0x173   : > { %2328 = vmatpush.bf16.msrb.mxu3 %v5925_v6  ;;  %2316 = vmatpush.bf16.msrb.mxu2 %v5781_v56  ;;  %v5804_v6 = vld [vmem:[#allocation6 + $0x3c8] sm:$0xf]  ;;  %v5773_v56 = vor.u32 %v7741_v15, %v5772_v63  ;;  %v7769_v15 = vld [vmem:[#allocation6 + $0x474] sm:$0xf0] }
 0x174   : > { %v5805_v23 = vor.u32 %v7749_v37, %v5804_v6  ;;  %v5724_v6 = vld [vmem:[#allocation6 + $0x328] sm:$0xf]  ;;  %v7729_v37 = vld [vmem:[#allocation6 + $0x334] sm:$0xf0] }
 0x175   : > { %2355 = vmatpush.bf16.msrb.mxu1 %v5785_v43  ;;  %v5945_v43 = vor.u32 %v7782_v49, %v5942_v13  ;;  %v5725_v40 = vor.u32 %v7729_v37, %v5724_v6  ;;  %v5822_v6 = vld [vmem:[#allocation6 + $0x3f8] sm:$0xf0] }
 0x176   : > { %2343 = vmatpush.bf16.msrb.mxu0 %v6021_v21  ;;  %v6038_v21 = vld [vmem:[#allocation6 + $0x5b0] sm:$0xf0] }
 0x177   : > { %2329 = vmatpush.bf16.msrb.mxu3 %v5909_v54  ;;  %2317 = vmatpush.bf16.msrb.mxu2 %v5765_v3  ;;  %v5734_v54 = vld [vmem:[#allocation6 + $0x350] sm:$0xf0]  ;;  %v6009_v3 = vor.u32 %v7798_v51, %v6006_v59  ;;  %v5852_v59 = vld [vmem:[#allocation6 + $0x428] sm:$0xf] }
 0x178   : > { %5692 = vmatmul.msk.f32.vlgmr.msra.gmra.mxu3 %vm1454_vm3, %v8764_v31  ;;  %v5737_v29 = vor.u32 %v7730_v61, %v5734_v54  ;;  %v5916_v61 = vld [vmem:[#allocation6 + $0x4a8] sm:$0xf]  ;;  %v7777_v54 = vld [vmem:[#allocation6 + $0x4b4] sm:$0xf0]  ;;  %v5846_v51 = vld [vmem:[#allocation6 + $0x430] sm:$0xf0] }
 0x179   : > { %2356 = vmatpush.bf16.msrb.mxu1 %v5769_v19  ;;  %v5929_v19 = vor.u32 %v7778_v2, %v5926_v16  ;;  %v5836_v2 = vld [vmem:[#allocation6 + $0x408] sm:$0xf] }
 0x17a   : > { %2344 = vmatpush.bf16.msrb.mxu0 %v6005_v48  ;;  %v5716_v48 = vld [vmem:[#allocation6 + $0x320] sm:$0xf] }
 0x17b   : > { %2330 = vmatpush.bf16.msrb.mxu3 %v5893_v17  ;;  %2318 = vmatpush.bf16.msrb.mxu2 %v5749_v10  ;;  %v6041_v17 = vor.u32 %v7806_v0, %v6038_v21  ;;  %v5933_v10 = vor.u32 %v7781_v38, %v5932_v32  ;;  %v7770_v0 = vld [vmem:[#allocation6 + $0x484] sm:$0xf]  ;;  %v5894_v21 = vld [vmem:[#allocation6 + $0x490] sm:$0xf0] }
 0x17d   : > { %2357 = vmatpush.bf16.msrb.mxu1 %v5753_v28 }
 0x17e   : > { %2345 = vmatpush.bf16.msrb.mxu0 %v5989_v22  ;;  %v6022_v22 = vld [vmem:[#allocation6 + $0x590] sm:$0xf0] }
 0x17f   : > { %2331 = vmatpush.bf16.msrb.mxu3 %v5877_v53  ;;  %2319 = vmatpush.bf16.msrb.mxu2 %v5733_v34  ;;  %v5717_v53 = vor.u32 %v7728_v30, %v5716_v48  ;;  %v6025_v52 = vor.u32 %v7802_v12, %v6022_v22  ;;  %v5917_v34 = vor.u32 %v7777_v54, %v5916_v61  ;;  %v7766_v12 = vld [vmem:[#allocation6 + $0x464] sm:$0xf]  ;;  %v5878_v22 = vld [vmem:[#allocation6 + $0x470] sm:$0xf0]  ;;  %v5950_v61 = vld [vmem:[#allocation6 + $0x4f8] sm:$0xf0] }
 0x180   : > { %5693 = vmatmul.msk.f32.gmra.mxu3 %vm1454_vm3, %v5685_v46  ;;  %v6057_v46 = vor.u32 %v7810_v55, %v6054_v58  ;;  %v5910_v55 = vld [vmem:[#allocation6 + $0x4b0] sm:$0xf0]  ;;  %v7790_v58 = vld [vmem:[#allocation6 + $0x524] sm:$0xf]  ;;  %v5881_v63 = vor.u32 %v7766_v12, %v5878_v22  ;;  %v7779_v12 = vld [vmem:[#allocation6 + $0x4cc] sm:$0xf] }
 0x181   : > { %2358 = vmatpush.bf16.msrb.mxu1 %v5737_v29  ;;  %v5913_v28 = vor.u32 %v7774_v47, %v5910_v55  ;;  %v5897_v29 = vor.u32 %v7770_v0, %v5894_v21  ;;  %v5934_v22 = vld [vmem:[#allocation6 + $0x4d8] sm:$0xf0] }
 0x182   : > { %2346 = vmatpush.bf16.msrb.mxu0 %v5973_v35  ;;  %v5702_v35 = vld [vmem:[#allocation6 + $0x310] sm:$0xf0] }
 0x183   : > { %2332 = vmatpush.bf16.msrb.mxu3 %v5861_v50  ;;  %v5721_v50 = vor.u32 %v7726_v44, %v5718_v8  ;;  %2320 = vmatpush.bf16.msrb.mxu2 %v5717_v53  ;;  %v5705_v42 = vor.u32 %v7722_v57, %v5702_v35  ;;  %v5900_v44 = vld [vmem:[#allocation6 + $0x488] sm:$0xf]  ;;  %v7773_v53 = vld [vmem:[#allocation6 + $0x494] sm:$0xf0] }
 0x184   : > { %v5901_v8 = vor.u32 %v7773_v53, %v5900_v44  ;;  %v5868_v57 = vld [vmem:[#allocation6 + $0x448] sm:$0xf]  ;;  %v7765_v35 = vld [vmem:[#allocation6 + $0x454] sm:$0xf0]  ;;  %v5806_v44 = vld [vmem:[#allocation6 + $0x3d8] sm:$0xf0] }
 0x185   : > { %2359 = vmatpush.bf16.msrb.mxu1 %v5721_v50  ;;  %v5884_v50 = vld [vmem:[#allocation6 + $0x468] sm:$0xf]  ;;  %v5869_v49 = vor.u32 %v7765_v35, %v5868_v57  ;;  %v5918_v57 = vld [vmem:[#allocation6 + $0x4b8] sm:$0xf0] }
 0x186   : > { %2347 = vmatpush.bf16.msrb.mxu0 %v5957_v5  ;;  %v5949_v5 = vor.u32 %v7785_v62, %v5948_v39 }
 0x187   : > { %2333 = vmatpush.bf16.msrb.mxu3 %v5845_v41  ;;  %v5701_v41 = vor.u32 %v7724_v20, %v5700_v60  ;;  %v7762_v60 = vld [vmem:[#allocation6 + $0x444] sm:$0xf]  ;;  %v5862_v20 = vld [vmem:[#allocation6 + $0x450] sm:$0xf0] }
 0x189   : > { %2321 = vmatpush.bf16.msrb.mxu2 %v5701_v41  ;;  %2360 = vmatpush.bf16.msrb.mxu1 %v5705_v42  ;;  %v5865_v41 = vor.u32 %v7762_v60, %v5862_v20  ;;  %v5790_v60 = vld [vmem:[#allocation6 + $0x3b8] sm:$0xf0]  ;;  %v7775_v20 = vld [vmem:[#allocation6 + $0x4ac] sm:$0xf] }
 0x18a   : > { %2392 = vmatpush.bf16.msra.mxu0 %v5821_v45 }
 0x18b   : > { %2334 = vmatpush.bf16.msrb.mxu3 %v5829_v33  ;;  %v7737_v33 = vld [vmem:[#allocation6 + $0x374] sm:$0xf0] }
 0x18c   : > { %v5757_v9 = vor.u32 %v7737_v33, %v5756_v7 }
 0x18d   : > { %2366 = vmatpush.bf16.msra.mxu2 %v5945_v43  ;;  %2405 = vmatpush.bf16.msra.mxu1 %v5949_v5  ;;  %v7758_v43 = vld [vmem:[#allocation6 + $0x424] sm:$0xf]  ;;  %v5830_v5 = vld [vmem:[#allocation6 + $0x410] sm:$0xf0] }
 0x18e   : > { %2393 = vmatpush.bf16.msra.mxu0 %v5805_v23  ;;  %v5849_v7 = vor.u32 %v7758_v43, %v5846_v51  ;;  %v7739_v43 = vld [vmem:[#allocation6 + $0x38c] sm:$0xf]  ;;  %v5774_v51 = vld [vmem:[#allocation6 + $0x398] sm:$0xf0] }
 0x18f   : > { %2379 = vmatpush.bf16.msra.mxu3 %v6073_v4  ;;  %v5990_v4 = vld [vmem:[#allocation6 + $0x550] sm:$0xf0] }
 0x190   : > { %v5993_v45 = vor.u32 %v7794_v26, %v5990_v4  ;;  %v7757_v26 = vld [vmem:[#allocation6 + $0x414] sm:$0xf0] }
 0x191   : > { %2367 = vmatpush.bf16.msra.mxu2 %v5929_v19  ;;  %2406 = vmatpush.bf16.msra.mxu1 %v5933_v10  ;;  %v5837_v19 = vor.u32 %v7757_v26, %v5836_v2  ;;  %v7735_v2 = vld [vmem:[#allocation6 + $0x36c] sm:$0xf]  ;;  %v5886_v26 = vld [vmem:[#allocation6 + $0x478] sm:$0xf0] }
 0x192   : > { %2394 = vmatpush.bf16.msra.mxu0 %v5789_v36  ;;  %v7725_v36 = vld [vmem:[#allocation6 + $0x314] sm:$0xf0] }
 0x193   : > { %2380 = vmatpush.bf16.msra.mxu3 %v6057_v46  ;;  %v5974_v46 = vld [vmem:[#allocation6 + $0x530] sm:$0xf0]  ;;  %v5709_v30 = vor.u32 %v7725_v36, %v5708_v18 }
 0x194   : > { %v5977_v23 = vor.u32 %v7790_v58, %v5974_v46  ;;  %v7751_v46 = vld [vmem:[#allocation6 + $0x3ec] sm:$0xf] }
 0x195   : > { %2368 = vmatpush.bf16.msra.mxu2 %v5913_v28  ;;  %2407 = vmatpush.bf16.msra.mxu1 %v5917_v34  ;;  %v5825_v18 = vor.u32 %v7751_v46, %v5822_v6  ;;  %v7813_v46 = vld [vmem:[#allocation6 + $0x5d4] sm:$0xf0] }
 0x196   : > { %2395 = vmatpush.bf16.msra.mxu0 %v5773_v56  ;;  %v5885_v56 = vor.u32 %v7769_v15, %v5884_v50  ;;  %v5937_v15 = vor.u32 %v7779_v12, %v5934_v22  ;;  %v5726_v12 = vld [vmem:[#allocation6 + $0x338] sm:$0xf0]  ;;  %v7759_v22 = vld [vmem:[#allocation6 + $0x42c] sm:$0xf] }
 0x197   : > { %2381 = vmatpush.bf16.msra.mxu3 %v6041_v17  ;;  %v5958_v17 = vld [vmem:[#allocation6 + $0x510] sm:$0xf0] }
 0x198   : > { %v5961_v48 = vor.u32 %v7786_v24, %v5958_v17 }
 0x199   : > { %2369 = vmatpush.bf16.msra.mxu2 %v5897_v29  ;;  %2408 = vmatpush.bf16.msra.mxu1 %v5901_v8 }
 0x19a   : > { %2396 = vmatpush.bf16.msra.mxu0 %v5757_v9  ;;  %v7754_v9 = vld [vmem:[#allocation6 + $0x404] sm:$0xf] }
 0x19b   : > { %2382 = vmatpush.bf16.msra.mxu3 %v6025_v52  ;;  %v5833_v16 = vor.u32 %v7754_v9, %v5830_v5 }
 0x19d   : > { %2370 = vmatpush.bf16.msra.mxu2 %v5881_v63  ;;  %2409 = vmatpush.bf16.msra.mxu1 %v5885_v56  ;;  %v7743_v56 = vld [vmem:[#allocation6 + $0x3ac] sm:$0xf] }
 0x19e   : > { %2397 = vmatpush.bf16.msra.mxu0 %v5741_v25  ;;  %v5793_v35 = vor.u32 %v7743_v56, %v5790_v60  ;;  %v6046_v56 = vld [vmem:[#allocation6 + $0x5b8] sm:$0xf0] }
 0x19f   : > { %2383 = vmatpush.bf16.msra.mxu3 %v6009_v3  ;;  %v7761_v3 = vld [vmem:[#allocation6 + $0x434] sm:$0xf0] }
 0x1a0   : > { %v5853_v33 = vor.u32 %v7761_v3, %v5852_v59  ;;  %v7771_v59 = vld [vmem:[#allocation6 + $0x48c] sm:$0xf] }
 0x1a1   : > { %2371 = vmatpush.bf16.msra.mxu2 %v5865_v41  ;;  %2410 = vmatpush.bf16.msra.mxu1 %v5869_v49 }
 0x1a2   : > { %2398 = vmatpush.bf16.msra.mxu0 %v5725_v40  ;;  %v7783_v40 = vld [vmem:[#allocation6 + $0x4ec] sm:$0xf] }
 0x1a3   : > { %2384 = vmatpush.bf16.msra.mxu3 %v5993_v45 }
 0x1a5   : > { %2372 = vmatpush.bf16.msra.mxu2 %v5849_v7  ;;  %2411 = vmatpush.bf16.msra.mxu1 %v5853_v33  ;;  %v5902_v7 = vld [vmem:[#allocation6 + $0x498] sm:$0xf0]  ;;  %v5777_v33 = vor.u32 %v7739_v43, %v5774_v51  ;;  %v7755_v51 = vld [vmem:[#allocation6 + $0x40c] sm:$0xf] }
 0x1a6   : > { %2399 = vmatpush.bf16.msra.mxu0 %v5709_v30  ;;  %v7747_v30 = vld [vmem:[#allocation6 + $0x3cc] sm:$0xf]  ;;  %v5905_v5 = vor.u32 %v7771_v59, %v5902_v7  ;;  %v5710_v43 = vld [vmem:[#allocation6 + $0x318] sm:$0xf0] }
 0x1a7   : > { %2385 = vmatpush.bf16.msra.mxu3 %v5977_v23  ;;  %v5809_v63 = vor.u32 %v7747_v30, %v5806_v44  ;;  %v7727_v44 = vld [vmem:[#allocation6 + $0x32c] sm:$0xf]  ;;  %v5838_v59 = vld [vmem:[#allocation6 + $0x418] sm:$0xf0] }
 0x1a8   : > { %v7803_v7 = vld [vmem:[#allocation6 + $0x58c] sm:$0xf] }
 0x1a9   : > { %2373 = vmatpush.bf16.msra.mxu2 %v5833_v16  ;;  %2412 = vmatpush.bf16.msra.mxu1 %v5837_v19  ;;  %v7767_v16 = vld [vmem:[#allocation6 + $0x46c] sm:$0xf] }
 0x1aa   : > { %v7815_v19 = vld [vmem:[#allocation6 + $0x5ec] sm:$0xf] }
 0x1ab   : > { %2386 = vmatpush.bf16.msra.mxu3 %v5961_v48  ;;  %v5953_v48 = vor.u32 %v7783_v40, %v5950_v61  ;;  %v7731_v40 = vld [vmem:[#allocation6 + $0x34c] sm:$0xf]  ;;  %v5742_v61 = vld [vmem:[#allocation6 + $0x358] sm:$0xf0] }
 0x1da   : > { %v8791_v14 = vpop.f32.mrf.mxu2 }
 0x1e2   : > { %v8793_v52 = vpop.f32.mrf.mxu2 }
 0x1e6   : > { %v1576_v13 = vpop.f32.mrf.mxu0 }
 0x1e7   : > { %v1599_v42 = vpop.f32.mrf.mxu1 }
 0x1eb   : > { %v1501_v39 = vpop.f32.mrf.mxu3  ;;  %v1524_v62 = vpop.f32.mrf.mxu2 }
 0x1ec   : > { %v8795_v27 = vmax.f32 %v1524_v62, %v1599_v42  ;;  %v8797_v32 = vmax.f32 %v1501_v39, %v1576_v13  ;;  %v5921_v42 = vor.u32 %v7775_v20, %v5918_v57  ;;  %v6076_v39 = vld [vmem:[#allocation6 + $0x5e8] sm:$0xf]  ;;  %v7817_v62 = vld [vmem:[#allocation6 + $0x5f4] sm:$0xf0]  ;;  %v5729_v20 = vor.u32 %v7727_v44, %v5726_v12 }
 0x1ed   : > { %v6028_v57 = vld [vmem:[#allocation6 + $0x588] sm:$0xf]  ;;  %v7793_v12 = vld [vmem:[#allocation6 + $0x534] sm:$0xf0] }
 0x1ee   : > { %v1579_v4 = vpop.f32.mrf.mxu0  ;;  %v5980_v44 = vld [vmem:[#allocation6 + $0x528] sm:$0xf] }
 0x1ef   : > { %v1602_v11 = vpop.f32.mrf.mxu1 }
 0x1f3   : > { %v1504_v45 = vpop.f32.mrf.mxu3  ;;  %v1527_v25 = vpop.f32.mrf.mxu2 }
 0x1f4   : > { %v1609_v38 = vmax.f32 %v1504_v45, %v1579_v4  ;;  %v1610_v10 = vmax.f32 %v1527_v25, %v1602_v11  ;;  %v6078_v25 = vld [vmem:[#allocation6 + $0x5f8] sm:$0xf0] }
 0x1f6   : > { %v8800_v47 = vpack.c.bf16 %v1609_v38, %v8797_v32  ;;  %v8803_v55 = vpack.c.bf16 %v1610_v10, %v8795_v27  ;;  %v6077_v10 = vor.u32 %v7817_v62, %v6076_v39  ;;  %v6324_v39 = vld [vmem:[#allocation6 + $0x1e0] sm:$0xf]  ;;  %v7688_v62 = vld [vmem:[#allocation6 + $0x1ec] sm:$0xf0] }
 0x1f8   : > { %v1818_v58 = vshrl.u32 %v8800_v47, 16  ;;  %v1820_v28 = vshll.u32 %v8800_v47, 16  ;;  %v1825_v37 = vshrl.u32 %v8803_v55, 16  ;;  %v1827_v23 = vshll.u32 %v8803_v55, 16 }
 0x1fa   : > { %v1822_v54 = vrot.slane %v1820_v28, 1  ;;  %v3952_v34 = vrot.slane %v1818_v58, 1  ;;  %v3953_v0 = vrot.slane %v1820_v28, 2  ;;  %v1829_v21 = vrot.slane %v1827_v23, 1  ;;  %v6060_v28 = vld [vmem:[#allocation6 + $0x5c8] sm:$0xf] }
 0x1fb   : > { %v3955_v24 = vrot.slane %v1825_v37, 1  ;;  %v3956_v29 = vrot.slane %v1827_v23, 2  ;;  %v1553_v17 = vpop.f32.mrf.mxu3  ;;  %v6081_v23 = vor.u32 %v7815_v19, %v6078_v25  ;;  %v7801_v19 = vld [vmem:[#allocation6 + $0x574] sm:$0xf0]  ;;  %v6014_v25 = vld [vmem:[#allocation6 + $0x578] sm:$0xf0] }
 0x1fc   : > { %v8809_v36 = vor.u32 %v1822_v54, %v1818_v58  ;;  %v8811_v53 = vor.u32 %v3953_v0, %v3952_v34  ;;  %v8813_v8 = vor.u32 %v1829_v21, %v1825_v37  ;;  %v8820_v49 = vmax.f32 %v8791_v14, %v1553_v17  ;;  %v7763_v54 = vld [vmem:[#allocation6 + $0x44c] sm:$0xf]  ;;  %v5870_v34 = vld [vmem:[#allocation6 + $0x458] sm:$0xf0]  ;;  %v6044_v17 = vld [vmem:[#allocation6 + $0x5a8] sm:$0xf] }
 0x1fd   : > { %v8815_v50 = vor.u32 %v3956_v29, %v3955_v24  ;;  %v5889_v37 = vor.u32 %v7767_v16, %v5886_v26  ;;  %v7811_v0 = vld [vmem:[#allocation6 + $0x5cc] sm:$0xf]  ;;  %v6062_v21 = vld [vmem:[#allocation6 + $0x5d8] sm:$0xf0]  ;;  %v6061_v24 = vor.u32 %v7813_v46, %v6060_v28  ;;  %v5745_v29 = vor.u32 %v7731_v40, %v5742_v61  ;;  %v6012_v26 = vld [vmem:[#allocation6 + $0x568] sm:$0xf] }
 0x1fe   : > { %2335 = vmatmul.bf16.vlgmr.msrb.gmra.mxu3 %v8809_v36  ;;  %2348 = vmatmul.bf16.vlgmr.msrb.gmra.mxu0 %v8813_v8  ;;  %v6065_v30 = vor.u32 %v7811_v0, %v6062_v21  ;;  %v6436_v28 = vld [vmem:[#allocation6 + $0x2c0] sm:$0xf]  ;;  %v7716_v46 = vld [vmem:[#allocation6 + $0x2cc] sm:$0xf0]  ;;  %v5996_v40 = vld [vmem:[#allocation6 + $0x548] sm:$0xf] }
 0x1ff   : > { %2431 = vmatpush.bf16.msrb.mxu3 %v5825_v18  ;;  %2444 = vmatpush.bf16.msrb.mxu0 %v5953_v48  ;;  %v7809_v18 = vld [vmem:[#allocation6 + $0x5b4] sm:$0xf0]  ;;  %v5873_v48 = vor.u32 %v7763_v54, %v5870_v34  ;;  %v6437_v34 = vor.u32 %v7716_v46, %v6436_v28  ;;  %v7795_v0 = vld [vmem:[#allocation6 + $0x54c] sm:$0xf]  ;;  %v5998_v21 = vld [vmem:[#allocation6 + $0x558] sm:$0xf0] }
 0x200   : > { %v6045_v60 = vor.u32 %v7809_v18, %v6044_v17  ;;  %v7797_v61 = vld [vmem:[#allocation6 + $0x554] sm:$0xf0]  ;;  %v6420_v17 = vld [vmem:[#allocation6 + $0x2a0] sm:$0xf]  ;;  %v7712_v18 = vld [vmem:[#allocation6 + $0x2ac] sm:$0xf0] }
 0x201   : > { %v6372_v28 = vld [vmem:[#allocation6 + $0x240] sm:$0xf]  ;;  %v7700_v46 = vld [vmem:[#allocation6 + $0x24c] sm:$0xf0] }
 0x203   : > { %2432 = vmatpush.bf16.msrb.mxu3 %v5809_v63  ;;  %v1556_v41 = vpop.f32.mrf.mxu3  ;;  %2445 = vmatpush.bf16.msrb.mxu0 %v5937_v15  ;;  %v5854_v63 = vld [vmem:[#allocation6 + $0x438] sm:$0xf0]  ;;  %v7807_v15 = vld [vmem:[#allocation6 + $0x5ac] sm:$0xf] }
 0x204   : > { %v1608_v13 = vmax.f32 %v8793_v52, %v1556_v41  ;;  %v5758_v52 = vld [vmem:[#allocation6 + $0x378] sm:$0xf0]  ;;  %v7805_v41 = vld [vmem:[#allocation6 + $0x594] sm:$0xf0] }
 0x205   : > { %v5761_v58 = vor.u32 %v7735_v2, %v5758_v52  ;;  %v5841_v52 = vor.u32 %v7755_v51, %v5838_v59 }
 0x206   : > { %v8824_v3 = vpack.c.bf16 %v1608_v13, %v8820_v49  ;;  %v5857_v13 = vor.u32 %v7759_v22, %v5854_v63  ;;  %v6421_v63 = vor.u32 %v7712_v18, %v6420_v17  ;;  %v6356_v17 = vld [vmem:[#allocation6 + $0x220] sm:$0xf]  ;;  %v7696_v18 = vld [vmem:[#allocation6 + $0x22c] sm:$0xf0] }
 0x207   : > { %2433 = vmatpush.bf16.msrb.mxu3 %v5793_v35  ;;  %2446 = vmatpush.bf16.msrb.mxu0 %v5921_v42  ;;  %v7723_v35 = vld [vmem:[#allocation6 + $0x30c] sm:$0xf]  ;;  %v6049_v42 = vor.u32 %v7807_v15, %v6046_v56  ;;  %v5982_v56 = vld [vmem:[#allocation6 + $0x538] sm:$0xf0] }
 0x208   : > { %v1811_v9 = vshrl.u32 %v8824_v3, 16  ;;  %v1813_v14 = vshll.u32 %v8824_v3, 16  ;;  %v5713_v2 = vor.u32 %v7723_v35, %v5710_v43  ;;  %v7791_v15 = vld [vmem:[#allocation6 + $0x52c] sm:$0xf]  ;;  %v5981_v35 = vor.u32 %v7793_v12, %v5980_v44  ;;  %v5966_v43 = vld [vmem:[#allocation6 + $0x518] sm:$0xf0] }
 0x209   : > { %v6148_v12 = vld [vmem:[#allocation6 + $0x80] sm:$0xf] }
 0x20a   : > { %v1815_v4 = vrot.slane %v1813_v14, 1  ;;  %v3949_v11 = vrot.slane %v1811_v9, 1  ;;  %v3950_v45 = vrot.slane %v1813_v14, 2  ;;  %v7720_v14 = vld [vmem:[#allocation6 + $0x2ec] sm:$0xf0] }
 0x20b   : > { %2434 = vmatpush.bf16.msrb.mxu3 %v5777_v33  ;;  %2447 = vmatpush.bf16.msrb.mxu0 %v5905_v5  ;;  %v6030_v33 = vld [vmem:[#allocation6 + $0x598] sm:$0xf0]  ;;  %v6029_v5 = vor.u32 %v7805_v41, %v6028_v57  ;;  %v6404_v57 = vld [vmem:[#allocation6 + $0x280] sm:$0xf]  ;;  %v7708_v41 = vld [vmem:[#allocation6 + $0x28c] sm:$0xf0] }
 0x20c   : > { %v8828_v38 = vor.u32 %v1815_v4, %v1811_v9  ;;  %v8830_v6 = vor.u32 %v3950_v45, %v3949_v11  ;;  %v6452_v9 = vld [vmem:[#allocation6 + $0x2e0] sm:$0xf]  ;;  %v6033_v16 = vor.u32 %v7803_v7, %v6030_v33  ;;  %v6325_v4 = vor.u32 %v7688_v62, %v6324_v39  ;;  %v7799_v45 = vld [vmem:[#allocation6 + $0x56c] sm:$0xf]  ;;  %v7656_v33 = vld [vmem:[#allocation6 + $0xec] sm:$0xf0] }
 0x20d   : > { %v6453_v11 = vor.u32 %v7720_v14, %v6452_v9  ;;  %v6405_v59 = vor.u32 %v7708_v41, %v6404_v57  ;;  %v6196_v7 = vld [vmem:[#allocation6 + $0xe0] sm:$0xf]  ;;  %v7672_v62 = vld [vmem:[#allocation6 + $0x16c] sm:$0xf0] }
 0x20e   : > { %2322 = vmatmul.bf16.vlgmr.msrb.gmra.mxu2 %v8828_v38  ;;  %2361 = vmatmul.bf16.vlgmr.msrb.gmra.mxu1 %v8828_v38  ;;  %v6260_v39 = vld [vmem:[#allocation6 + $0x160] sm:$0xf]  ;;  %v7704_v14 = vld [vmem:[#allocation6 + $0x26c] sm:$0xf0] }
 0x20f   : > { %2387 = vmatmul.bf16.vlgmr.msra.gmra.mxu3 %v8813_v8  ;;  %2400 = vmatmul.bf16.vlgmr.msra.gmra.mxu0 %v8828_v38  ;;  %v6388_v9 = vld [vmem:[#allocation6 + $0x260] sm:$0xf]  ;;  %v7692_v41 = vld [vmem:[#allocation6 + $0x20c] sm:$0xf0] }
 0x210   : > { %2418 = vmatpush.bf16.msrb.mxu2 %v6077_v10  ;;  %2435 = vmatpush.bf16.msrb.mxu3 %v5761_v58  ;;  %v6308_v10 = vld [vmem:[#allocation6 + $0x1c0] sm:$0xf]  ;;  %v7684_v58 = vld [vmem:[#allocation6 + $0x1cc] sm:$0xf0] }
 0x211   : > { %2448 = vmatpush.bf16.msrb.mxu0 %v5889_v37  ;;  %2457 = vmatpush.bf16.msrb.mxu1 %v6081_v23  ;;  %v6013_v37 = vor.u32 %v7801_v19, %v6012_v26  ;;  %v6017_v23 = vor.u32 %v7799_v45, %v6014_v25  ;;  %v6309_v54 = vor.u32 %v7684_v58, %v6308_v10  ;;  %v7652_v45 = vld [vmem:[#allocation6 + $0xcc] sm:$0xf0]  ;;  %v6244_v25 = vld [vmem:[#allocation6 + $0x140] sm:$0xf] }
 0x212   : > { %v6197_v26 = vor.u32 %v7656_v33, %v6196_v7  ;;  %v6261_v19 = vor.u32 %v7672_v62, %v6260_v39  ;;  %v7668_v58 = vld [vmem:[#allocation6 + $0x14c] sm:$0xf0]  ;;  %v6340_v57 = vld [vmem:[#allocation6 + $0x200] sm:$0xf] }
 0x213   : > { %v6132_v39 = vld [vmem:[#allocation6 + $0x60] sm:$0xf]  ;;  %v7640_v62 = vld [vmem:[#allocation6 + $0x6c] sm:$0xf0] }
 0x214   : > { %2419 = vmatpush.bf16.msrb.mxu2 %v6061_v24  ;;  %2436 = vmatpush.bf16.msrb.mxu3 %v5745_v29  ;;  %v6292_v24 = vld [vmem:[#allocation6 + $0x1a0] sm:$0xf]  ;;  %v7680_v29 = vld [vmem:[#allocation6 + $0x1ac] sm:$0xf0] }
 0x215   : > { %2449 = vmatpush.bf16.msrb.mxu0 %v5873_v48  ;;  %2458 = vmatpush.bf16.msrb.mxu1 %v6065_v30  ;;  %v5997_v48 = vor.u32 %v7797_v61, %v5996_v40  ;;  %v6001_v30 = vor.u32 %v7795_v0, %v5998_v21  ;;  %v6293_v22 = vor.u32 %v7680_v29, %v6292_v24  ;;  %v7648_v0 = vld [vmem:[#allocation6 + $0xac] sm:$0xf0]  ;;  %v6228_v21 = vld [vmem:[#allocation6 + $0x120] sm:$0xf] }
 0x216   : > { %v6245_v61 = vor.u32 %v7668_v58, %v6244_v25  ;;  %v7664_v29 = vld [vmem:[#allocation6 + $0x12c] sm:$0xf0] }
 0x217   : > { %v7636_v58 = vld [vmem:[#allocation6 + $0x4c] sm:$0xf0] }
 0x218   : > { %2420 = vmatpush.bf16.msrb.mxu2 %v6045_v60  ;;  %2437 = vmatpush.bf16.msrb.mxu3 %v5729_v20  ;;  %v6276_v60 = vld [vmem:[#allocation6 + $0x180] sm:$0xf]  ;;  %v7676_v20 = vld [vmem:[#allocation6 + $0x18c] sm:$0xf0] }
 0x219   : > { %2450 = vmatpush.bf16.msrb.mxu0 %v5857_v13  ;;  %2459 = vmatpush.bf16.msrb.mxu1 %v6049_v42  ;;  %v5985_v13 = vor.u32 %v7791_v15, %v5982_v56  ;;  %v7787_v42 = vld [vmem:[#allocation6 + $0x50c] sm:$0xf]  ;;  %v6277_v51 = vor.u32 %v7676_v20, %v6276_v60  ;;  %v7644_v15 = vld [vmem:[#allocation6 + $0x8c] sm:$0xf0]  ;;  %v6212_v56 = vld [vmem:[#allocation6 + $0x100] sm:$0xf] }
 0x21a   : > { %v7660_v60 = vld [vmem:[#allocation6 + $0x10c] sm:$0xf0] }
 0x21c   : > { %2421 = vmatpush.bf16.msrb.mxu2 %v6029_v5  ;;  %2438 = vmatpush.bf16.msrb.mxu3 %v5713_v2  ;;  %v7654_v2 = vld [vmem:[#allocation6 + $0xe4] sm:$0xf] }
 0x21d   : > { %2451 = vmatpush.bf16.msrb.mxu0 %v5841_v52  ;;  %2460 = vmatpush.bf16.msrb.mxu1 %v6033_v16  ;;  %v6198_v52 = vld [vmem:[#allocation6 + $0xf0] sm:$0xf0]  ;;  %v5969_v16 = vor.u32 %v7787_v42, %v5966_v43  ;;  %v6204_v42 = vld [vmem:[#allocation6 + $0xe8] sm:$0xf]  ;;  %v7657_v43 = vld [vmem:[#allocation6 + $0xf4] sm:$0xf0] }
 0x21e   : > { %2374 = vmatmul.bf16.vlgmr.msra.gmra.mxu2 %v8809_v36  ;;  %2413 = vmatmul.bf16.vlgmr.msra.gmra.mxu1 %v8809_v36  ;;  %v6201_v10 = vor.u32 %v7654_v2, %v6198_v52  ;;  %v7714_v2 = vld [vmem:[#allocation6 + $0x2c4] sm:$0xf]  ;;  %v6438_v52 = vld [vmem:[#allocation6 + $0x2d0] sm:$0xf0] }
 0x21f   : > { %2439 = vmatmul.bf16.vlgmr.msrb.gmra.mxu3 %v8828_v38  ;;  %v5964_v38 = vld [vmem:[#allocation6 + $0x508] sm:$0xf]  ;;  %v6441_v25 = vor.u32 %v7714_v2, %v6438_v52  ;;  %v6374_v2 = vld [vmem:[#allocation6 + $0x250] sm:$0xf0] }
 0x220   : > { %2963 = vmatpush.bf16.msra.mxu3 %v6325_v4  ;;  %2422 = vmatpush.bf16.msrb.mxu2 %v6013_v37  ;;  %v6389_v4 = vor.u32 %v7704_v14, %v6388_v9  ;;  %v7650_v37 = vld [vmem:[#allocation6 + $0xc4] sm:$0xf]  ;;  %v6205_v14 = vor.u32 %v7657_v43, %v6204_v42  ;;  %v6332_v43 = vld [vmem:[#allocation6 + $0x1e8] sm:$0xf] }
 0x221   : > { %2976 = vmatpush.bf16.msra.mxu0 %v6453_v11  ;;  %2461 = vmatpush.bf16.msrb.mxu1 %v6017_v23  ;;  %v6180_v11 = vld [vmem:[#allocation6 + $0xc0] sm:$0xf]  ;;  %v6182_v23 = vld [vmem:[#allocation6 + $0xd0] sm:$0xf0]  ;;  %v7638_v9 = vld [vmem:[#allocation6 + $0x64] sm:$0xf] }
 0x222   : > { %2452 = vmatmul.bf16.vlgmr.msrb.gmra.mxu0 %v8809_v36  ;;  %v7789_v36 = vld [vmem:[#allocation6 + $0x514] sm:$0xf0]  ;;  %v6181_v40 = vor.u32 %v7652_v45, %v6180_v11  ;;  %v6185_v24 = vor.u32 %v7650_v37, %v6182_v23  ;;  %v8848_v11 = vpack.c.bf16 %v8795_v27, %v8795_v27  ;;  %v6118_v37 = vld [vmem:[#allocation6 + $0x50] sm:$0xf0]  ;;  %v7710_v23 = vld [vmem:[#allocation6 + $0x2a4] sm:$0xf] }
 0x223   : > { %v5965_v5 = vor.u32 %v7789_v36, %v5964_v38  ;;  %v6150_v38 = vld [vmem:[#allocation6 + $0x90] sm:$0xf0]  ;;  %v6149_v36 = vor.u32 %v7644_v15, %v6148_v12  ;;  %v6124_v52 = vld [vmem:[#allocation6 + $0x48] sm:$0xf] }
 0x224   : > { %2964 = vmatpush.bf16.msra.mxu3 %v6309_v54  ;;  %2423 = vmatpush.bf16.msrb.mxu2 %v5997_v48  ;;  %v6373_v54 = vor.u32 %v7700_v46, %v6372_v28  ;;  %v7646_v48 = vld [vmem:[#allocation6 + $0xa4] sm:$0xf] }
 0x225   : > { %2977 = vmatpush.bf16.msra.mxu0 %v6437_v34  ;;  %2462 = vmatpush.bf16.msrb.mxu1 %v6001_v30  ;;  %v6164_v34 = vld [vmem:[#allocation6 + $0xa0] sm:$0xf]  ;;  %v6166_v30 = vld [vmem:[#allocation6 + $0xb0] sm:$0xf0]  ;;  %v7634_v28 = vld [vmem:[#allocation6 + $0x44] sm:$0xf] }
 0x226   : > { %v6165_v44 = vor.u32 %v7648_v0, %v6164_v34  ;;  %v6169_v20 = vor.u32 %v7646_v48, %v6166_v30  ;;  %v6100_v0 = vld [vmem:[#allocation6 + $0x20] sm:$0xf]  ;;  %v6406_v48 = vld [vmem:[#allocation6 + $0x290] sm:$0xf0]  ;;  %v6156_v30 = vld [vmem:[#allocation6 + $0x88] sm:$0xf] }
 0x228   : > { %2965 = vmatpush.bf16.msra.mxu3 %v6293_v22  ;;  %2424 = vmatpush.bf16.msrb.mxu2 %v5981_v35  ;;  %v6229_v22 = vor.u32 %v7664_v29, %v6228_v21  ;;  %v7642_v35 = vld [vmem:[#allocation6 + $0x84] sm:$0xf]  ;;  %v7632_v21 = vld [vmem:[#allocation6 + $0x2c] sm:$0xf0] }
 0x229   : > { %2978 = vmatpush.bf16.msra.mxu0 %v6421_v63  ;;  %2463 = vmatpush.bf16.msrb.mxu1 %v5985_v13  ;;  %v6357_v63 = vor.u32 %v7696_v18, %v6356_v17  ;;  %v7718_v13 = vld [vmem:[#allocation6 + $0x2e4] sm:$0xf]  ;;  %v6153_v7 = vor.u32 %v7642_v35, %v6150_v38  ;;  %v6102_v17 = vld [vmem:[#allocation6 + $0x30] sm:$0xf0]  ;;  %v6101_v12 = vor.u32 %v7632_v21, %v6100_v0 }
 0x22a   : > { %v7706_v18 = vld [vmem:[#allocation6 + $0x284] sm:$0xf]  ;;  %v6326_v35 = vld [vmem:[#allocation6 + $0x1f0] sm:$0xf0] }
 0x22b   : > { %v6409_v15 = vor.u32 %v7706_v18, %v6406_v48  ;;  %v7702_v38 = vld [vmem:[#allocation6 + $0x264] sm:$0xf]  ;;  %v6092_v48 = vld [vmem:[#allocation6 + $0x8] sm:$0xf] }
 0x22c   : > { %2966 = vmatpush.bf16.msra.mxu3 %v6277_v51  ;;  %2425 = vmatpush.bf16.msrb.mxu2 %v5965_v5  ;;  %v6213_v51 = vor.u32 %v7660_v60, %v6212_v56  ;;  %v6134_v5 = vld [vmem:[#allocation6 + $0x70] sm:$0xf0]  ;;  %v7628_v56 = vld [vmem:[#allocation6 + $0xc] sm:$0xf0]  ;;  %v7626_v60 = vld [vmem:[#allocation6 + $0x4] sm:$0xf] }
 0x22d   : > { %2979 = vmatpush.bf16.msra.mxu0 %v6405_v59  ;;  %2464 = vmatpush.bf16.msrb.mxu1 %v5969_v16  ;;  %v6341_v59 = vor.u32 %v7692_v41, %v6340_v57  ;;  %v6188_v16 = vld [vmem:[#allocation6 + $0xc8] sm:$0xf]  ;;  %v6137_v45 = vor.u32 %v7638_v9, %v6134_v5  ;;  %v7686_v41 = vld [vmem:[#allocation6 + $0x1e4] sm:$0xf]  ;;  %v6310_v9 = vld [vmem:[#allocation6 + $0x1d0] sm:$0xf0] }
 0x22f   : > { %2426 = vmatmul.bf16.vlgmr.msrb.gmra.mxu2 %v8813_v8 }
 0x230   : > { %2950 = vmatpush.bf16.msra.mxu2 %v6197_v26  ;;  %2967 = vmatpush.bf16.msra.mxu3 %v6261_v19  ;;  %v7653_v26 = vld [vmem:[#allocation6 + $0xd4] sm:$0xf0]  ;;  %v8844_v19 = vpack.c.bf16 %v8797_v32, %v8797_v32  ;;  %v6422_v32 = vld [vmem:[#allocation6 + $0x2b0] sm:$0xf0] }
 0x231   : > { %2980 = vmatpush.bf16.msra.mxu0 %v6389_v4  ;;  %2989 = vmatpush.bf16.msra.mxu1 %v6201_v10  ;;  %v6133_v4 = vor.u32 %v7640_v62, %v6132_v39  ;;  %v6116_v10 = vld [vmem:[#allocation6 + $0x40] sm:$0xf]  ;;  %v6189_v46 = vor.u32 %v7653_v26, %v6188_v16  ;;  %v6425_v34 = vor.u32 %v7710_v23, %v6422_v32  ;;  %v7682_v62 = vld [vmem:[#allocation6 + $0x1c4] sm:$0xf]  ;;  %v7637_v16 = vld [vmem:[#allocation6 + $0x54] sm:$0xf0] }
 0x232   : > { %2465 = vmatmul.bf16.vlgmr.msrb.gmra.mxu1 %v8813_v8  ;;  %v6454_v8 = vld [vmem:[#allocation6 + $0x2f0] sm:$0xf0]  ;;  %v6117_v27 = vor.u32 %v7636_v58, %v6116_v10  ;;  %v6316_v26 = vld [vmem:[#allocation6 + $0x1c8] sm:$0xf]  ;;  %v6125_v58 = vor.u32 %v7637_v16, %v6124_v52  ;;  %v7669_v52 = vld [vmem:[#allocation6 + $0x154] sm:$0xf0] }
 0x233   : > { %v6457_v33 = vor.u32 %v7718_v13, %v6454_v8  ;;  %v6390_v13 = vld [vmem:[#allocation6 + $0x270] sm:$0xf0]  ;;  %v6140_v8 = vld [vmem:[#allocation6 + $0x68] sm:$0xf]  ;;  %v7647_v16 = vld [vmem:[#allocation6 + $0xac] sm:$0xf] }
 0x234   : > { %2951 = vmatpush.bf16.msra.mxu2 %v6181_v40  ;;  %2968 = vmatpush.bf16.msra.mxu3 %v6245_v61  ;;  %v6172_v40 = vld [vmem:[#allocation6 + $0xa8] sm:$0xf]  ;;  %v7649_v61 = vld [vmem:[#allocation6 + $0xb4] sm:$0xf0]  ;;  %v6358_v32 = vld [vmem:[#allocation6 + $0x230] sm:$0xf0] }
 0x235   : > { %2981 = vmatpush.bf16.msra.mxu0 %v6373_v54  ;;  %2990 = vmatpush.bf16.msra.mxu1 %v6185_v24  ;;  %v6121_v54 = vor.u32 %v7634_v28, %v6118_v37  ;;  %v7630_v24 = vld [vmem:[#allocation6 + $0x24] sm:$0xf]  ;;  %v6173_v29 = vor.u32 %v7649_v61, %v6172_v40  ;;  %v6108_v40 = vld [vmem:[#allocation6 + $0x28] sm:$0xf]  ;;  %v7633_v61 = vld [vmem:[#allocation6 + $0x34] sm:$0xf0] }
 0x236   : > { %v7678_v28 = vld [vmem:[#allocation6 + $0x1a4] sm:$0xf]  ;;  %v6109_v21 = vor.u32 %v7633_v61, %v6108_v40  ;;  %v7665_v40 = vld [vmem:[#allocation6 + $0x134] sm:$0xf0]  ;;  %v7643_v61 = vld [vmem:[#allocation6 + $0x8c] sm:$0xf] }
 0x237   : > { %v7694_v37 = vld [vmem:[#allocation6 + $0x224] sm:$0xf] }
 0x238   : > { %2952 = vmatpush.bf16.msra.mxu2 %v6165_v44  ;;  %2969 = vmatpush.bf16.msra.mxu3 %v6229_v22  ;;  %v7645_v44 = vld [vmem:[#allocation6 + $0x94] sm:$0xf0]  ;;  %v6084_v22 = vld [vmem:[#allocation6] sm:$0xf]  ;;  %v6361_v0 = vor.u32 %v7694_v37, %v6358_v32  ;;  %v6230_v37 = vld [vmem:[#allocation6 + $0x130] sm:$0xf0] }
 0x239   : > { %2982 = vmatpush.bf16.msra.mxu0 %v6357_v63  ;;  %2991 = vmatpush.bf16.msra.mxu1 %v6169_v20  ;;  %v6105_v63 = vor.u32 %v7630_v24, %v6102_v17  ;;  %v6086_v20 = vld [vmem:[#allocation6 + $0x10] sm:$0xf0]  ;;  %v6157_v57 = vor.u32 %v7645_v44, %v6156_v30  ;;  %v6085_v42 = vor.u32 %v7628_v56, %v6084_v22  ;;  %v7629_v30 = vld [vmem:[#allocation6 + $0x14] sm:$0xf0]  ;;  %v6284_v44 = vld [vmem:[#allocation6 + $0x188] sm:$0xf] }
 0x23a   : > { %v6278_v24 = vld [vmem:[#allocation6 + $0x190] sm:$0xf0]  ;;  %v7655_v22 = vld [vmem:[#allocation6 + $0xec] sm:$0xf] }
 0x23b   : > { %v6342_v17 = vld [vmem:[#allocation6 + $0x210] sm:$0xf0]  ;;  %v7687_v56 = vld [vmem:[#allocation6 + $0x1ec] sm:$0xf] }
 0x23c   : > { %2953 = vmatpush.bf16.msra.mxu2 %v6149_v36  ;;  %2970 = vmatpush.bf16.msra.mxu3 %v6213_v51  ;;  %v7641_v36 = vld [vmem:[#allocation6 + $0x74] sm:$0xf0] }
 0x23d   : > { %2983 = vmatpush.bf16.msra.mxu0 %v6341_v59  ;;  %2992 = vmatpush.bf16.msra.mxu1 %v6153_v7  ;;  %v7689_v51 = vld [vmem:[#allocation6 + $0x1f4] sm:$0xf0]  ;;  %v6089_v59 = vor.u32 %v7626_v60, %v6086_v20  ;;  %v6329_v7 = vor.u32 %v7686_v41, %v6326_v35  ;;  %v6141_v39 = vor.u32 %v7641_v36, %v6140_v8  ;;  %v6334_v60 = vld [vmem:[#allocation6 + $0x1f8] sm:$0xf0]  ;;  %v6268_v8 = vld [vmem:[#allocation6 + $0x168] sm:$0xf] }
 0x23e   : > { %v6333_v5 = vor.u32 %v7689_v51, %v6332_v43  ;;  %v6337_v36 = vor.u32 %v7687_v56, %v6334_v60  ;;  %v7651_v43 = vld [vmem:[#allocation6 + $0xcc] sm:$0xf]  ;;  %v6190_v51 = vld [vmem:[#allocation6 + $0xd8] sm:$0xf0] }
 0x23f   : > { %2971 = vmatmul.bf16.vlgmr.msra.gmra.mxu3 %v8844_v19  ;;  %v7719_v60 = vld [vmem:[#allocation6 + $0x2ec] sm:$0xf] }
 0x240   : > { %3015 = vmatpush.bf16.msrb.mxu3 %v6457_v33  ;;  %2984 = vmatmul.bf16.vlgmr.msra.gmra.mxu0 %v8848_v11  ;;  %v6393_v33 = vor.u32 %v7702_v38, %v6390_v13  ;;  %v7670_v38 = vld [vmem:[#allocation6 + $0x164] sm:$0xf]  ;;  %v6262_v13 = vld [vmem:[#allocation6 + $0x170] sm:$0xf0] }
 0x241   : > { %3028 = vmatpush.bf16.msrb.mxu0 %v6205_v14  ;;  %2954 = vmatpush.bf16.msra.mxu2 %v6133_v4  ;;  %v7698_v14 = vld [vmem:[#allocation6 + $0x244] sm:$0xf]  ;;  %v7685_v4 = vld [vmem:[#allocation6 + $0x1d4] sm:$0xf0] }
 0x242   : > { %2993 = vmatpush.bf16.msra.mxu1 %v6137_v45  ;;  %v8854_v45 = vpack.c.bf16 %v8820_v49, %v8820_v49  ;;  %v6377_v10 = vor.u32 %v7698_v14, %v6374_v2  ;;  %v6317_v23 = vor.u32 %v7685_v4, %v6316_v26  ;;  %v6300_v49 = vld [vmem:[#allocation6 + $0x1a8] sm:$0xf]  ;;  %v6246_v14 = vld [vmem:[#allocation6 + $0x150] sm:$0xf0]  ;;  %v6174_v26 = vld [vmem:[#allocation6 + $0xb8] sm:$0xf0] }
 0x243   : > { %v7679_v4 = vld [vmem:[#allocation6 + $0x1ac] sm:$0xf] }
 0x244   : > { %3016 = vmatpush.bf16.msrb.mxu3 %v6441_v25  ;;  %v6313_v25 = vor.u32 %v7682_v62, %v6310_v9  ;;  %v6193_v62 = vor.u32 %v7651_v43, %v6190_v51  ;;  %v7666_v9 = vld [vmem:[#allocation6 + $0x144] sm:$0xf]  ;;  %v6126_v43 = vld [vmem:[#allocation6 + $0x58] sm:$0xf0]  ;;  %v7667_v51 = vld [vmem:[#allocation6 + $0x14c] sm:$0xf] }
 0x245   : > { %3029 = vmatpush.bf16.msrb.mxu0 %v6189_v46  ;;  %2955 = vmatpush.bf16.msra.mxu2 %v6117_v27  ;;  %v6294_v46 = vld [vmem:[#allocation6 + $0x1b0] sm:$0xf0]  ;;  %v7681_v27 = vld [vmem:[#allocation6 + $0x1b4] sm:$0xf0] }
 0x246   : > { %2994 = vmatpush.bf16.msra.mxu1 %v6121_v54  ;;  %v6297_v54 = vor.u32 %v7678_v28, %v6294_v46  ;;  %v6301_v18 = vor.u32 %v7681_v27, %v6300_v49  ;;  %v6177_v28 = vor.u32 %v7647_v16, %v6174_v26  ;;  %v7662_v46 = vld [vmem:[#allocation6 + $0x124] sm:$0xf]  ;;  %v6158_v49 = vld [vmem:[#allocation6 + $0x98] sm:$0xf0]  ;;  %v7675_v27 = vld [vmem:[#allocation6 + $0x18c] sm:$0xf] }
 0x247   : > { %v6110_v16 = vld [vmem:[#allocation6 + $0x38] sm:$0xf0]  ;;  %v7663_v26 = vld [vmem:[#allocation6 + $0x12c] sm:$0xf] }
 0x248   : > { %3017 = vmatpush.bf16.msrb.mxu3 %v6425_v34  ;;  %v7674_v34 = vld [vmem:[#allocation6 + $0x184] sm:$0xf] }
 0x249   : > { %3030 = vmatpush.bf16.msrb.mxu0 %v6173_v29  ;;  %2956 = vmatpush.bf16.msra.mxu2 %v6101_v12  ;;  %v7690_v29 = vld [vmem:[#allocation6 + $0x204] sm:$0xf]  ;;  %v7677_v12 = vld [vmem:[#allocation6 + $0x194] sm:$0xf0] }
 0x24a   : > { %2995 = vmatpush.bf16.msra.mxu1 %v6105_v63  ;;  %v6206_v63 = vld [vmem:[#allocation6 + $0xf8] sm:$0xf0]  ;;  %v6345_v20 = vor.u32 %v7690_v29, %v6342_v17  ;;  %v6285_v41 = vor.u32 %v7677_v12, %v6284_v44  ;;  %v6214_v29 = vld [vmem:[#allocation6 + $0x110] sm:$0xf0]  ;;  %v6220_v17 = vld [vmem:[#allocation6 + $0x108] sm:$0xf] }
 0x24b   : > { %v6209_v35 = vor.u32 %v7655_v22, %v6206_v63  ;;  %v7721_v44 = vld [vmem:[#allocation6 + $0x2f4] sm:$0xf0]  ;;  %v7639_v12 = vld [vmem:[#allocation6 + $0x6c] sm:$0xf]  ;;  %v6142_v22 = vld [vmem:[#allocation6 + $0x78] sm:$0xf0] }
 0x24c   : > { %3018 = vmatpush.bf16.msrb.mxu3 %v6409_v15  ;;  %v6281_v15 = vor.u32 %v7674_v34, %v6278_v24  ;;  %v6233_v34 = vor.u32 %v7662_v46, %v6230_v37  ;;  %v6161_v24 = vor.u32 %v7643_v61, %v6158_v49  ;;  %v7671_v63 = vld [vmem:[#allocation6 + $0x16c] sm:$0xf] }
 0x24d   : > { %3031 = vmatpush.bf16.msrb.mxu0 %v6157_v57  ;;  %2957 = vmatpush.bf16.msra.mxu2 %v6085_v42  ;;  %v6093_v57 = vor.u32 %v7629_v30, %v6092_v48  ;;  %v7673_v42 = vld [vmem:[#allocation6 + $0x174] sm:$0xf0]  ;;  %v6460_v30 = vld [vmem:[#allocation6 + $0x2e8] sm:$0xf]  ;;  %v7659_v49 = vld [vmem:[#allocation6 + $0x10c] sm:$0xf] }
 0x24e   : > { %2996 = vmatpush.bf16.msra.mxu1 %v6089_v59  ;;  %v7683_v59 = vld [vmem:[#allocation6 + $0x1cc] sm:$0xf] }
 0x250   : > { %3019 = vmatpush.bf16.msrb.mxu3 %v6393_v33  ;;  %2958 = vmatmul.bf16.vlgmr.msra.gmra.mxu2 %v8854_v45  ;;  %v6265_v33 = vor.u32 %v7670_v38, %v6262_v13  ;;  %v6444_v13 = vld [vmem:[#allocation6 + $0x2c8] sm:$0xf] }
 0x251   : > { %3002 = vmatpush.bf16.msrb.mxu2 %v6329_v7  ;;  %3032 = vmatpush.bf16.msrb.mxu0 %v6141_v39  ;;  %v6318_v7 = vld [vmem:[#allocation6 + $0x1d8] sm:$0xf0]  ;;  %v6269_v39 = vor.u32 %v7673_v42, %v6268_v8  ;;  %v7717_v8 = vld [vmem:[#allocation6 + $0x2d4] sm:$0xf0] }
 0x252   : > { %3041 = vmatpush.bf16.msrb.mxu1 %v6333_v5  ;;  %v6252_v5 = vld [vmem:[#allocation6 + $0x148] sm:$0xf]  ;;  %v6321_v2 = vor.u32 %v7683_v59, %v6318_v7  ;;  %v6254_v59 = vld [vmem:[#allocation6 + $0x158] sm:$0xf0]  ;;  %v7715_v7 = vld [vmem:[#allocation6 + $0x2cc] sm:$0xf] }
 0x253   : > { %2997 = vmatmul.bf16.vlgmr.msra.gmra.mxu1 %v8854_v45 }
 0x254   : > { %3020 = vmatpush.bf16.msrb.mxu3 %v6377_v10  ;;  %v6249_v10 = vor.u32 %v7666_v9, %v6246_v14  ;;  %v6257_v9 = vor.u32 %v7667_v51, %v6254_v59  ;;  %v6428_v14 = vld [vmem:[#allocation6 + $0x2a8] sm:$0xf]  ;;  %v6382_v51 = vld [vmem:[#allocation6 + $0x258] sm:$0xf0]  ;;  %v6676_v59 = vld [vmem:[#allocation6 + $0x7a0] sm:$0xf] }
 0x255   : > { %3003 = vmatpush.bf16.msrb.mxu2 %v6313_v25  ;;  %3033 = vmatpush.bf16.msrb.mxu0 %v6125_v58  ;;  %v6302_v25 = vld [vmem:[#allocation6 + $0x1b8] sm:$0xf0]  ;;  %v6253_v58 = vor.u32 %v7669_v52, %v6252_v5  ;;  %v7713_v5 = vld [vmem:[#allocation6 + $0x2b4] sm:$0xf0] }
 0x256   : > { %3042 = vmatpush.bf16.msrb.mxu1 %v6317_v23  ;;  %v6236_v23 = vld [vmem:[#allocation6 + $0x128] sm:$0xf]  ;;  %v6305_v32 = vor.u32 %v7679_v4, %v6302_v25  ;;  %v6238_v4 = vld [vmem:[#allocation6 + $0x138] sm:$0xf0]  ;;  %v7711_v25 = vld [vmem:[#allocation6 + $0x2ac] sm:$0xf] }
 0x257   : > { %v6241_v37 = vor.u32 %v7663_v26, %v6238_v4  ;;  %v6366_v4 = vld [vmem:[#allocation6 + $0x238] sm:$0xf0] }
 0x258   : > { %3021 = vmatpush.bf16.msrb.mxu3 %v6361_v0  ;;  %v7658_v0 = vld [vmem:[#allocation6 + $0x104] sm:$0xf] }
 0x259   : > { %3004 = vmatpush.bf16.msrb.mxu2 %v6297_v54  ;;  %3034 = vmatpush.bf16.msrb.mxu0 %v6109_v21  ;;  %v6286_v54 = vld [vmem:[#allocation6 + $0x198] sm:$0xf0]  ;;  %v6237_v21 = vor.u32 %v7665_v40, %v6236_v23  ;;  %v6217_v56 = vor.u32 %v7658_v0, %v6214_v29  ;;  %v7709_v23 = vld [vmem:[#allocation6 + $0x294] sm:$0xf0]  ;;  %v6708_v0 = vld [vmem:[#allocation6 + $0x7e0] sm:$0xf] }
 0x25a   : > { %3043 = vmatpush.bf16.msrb.mxu1 %v6301_v18  ;;  %v7661_v18 = vld [vmem:[#allocation6 + $0x114] sm:$0xf0]  ;;  %v6289_v48 = vor.u32 %v7675_v27, %v6286_v54  ;;  %v6094_v40 = vld [vmem:[#allocation6 + $0x18] sm:$0xf0]  ;;  %v7707_v54 = vld [vmem:[#allocation6 + $0x28c] sm:$0xf] }
 0x25b   : > { %v6222_v27 = vld [vmem:[#allocation6 + $0x118] sm:$0xf0]  ;;  %v6836_v29 = vld [vmem:[#allocation6 + $0x8e0] sm:$0xf] }
 0x25c   : > { %3022 = vmatpush.bf16.msrb.mxu3 %v6345_v20  ;;  %v6462_v20 = vld [vmem:[#allocation6 + $0x2f8] sm:$0xf0] }
 0x25d   : > { %3005 = vmatpush.bf16.msrb.mxu2 %v6281_v15  ;;  %3035 = vmatpush.bf16.msrb.mxu0 %v6093_v57  ;;  %v6270_v15 = vld [vmem:[#allocation6 + $0x178] sm:$0xf0]  ;;  %v6221_v57 = vor.u32 %v7661_v18, %v6220_v17  ;;  %v6465_v42 = vor.u32 %v7719_v60, %v6462_v20  ;;  %v7912_v17 = vld [vmem:[#allocation6 + $0x8ec] sm:$0xf0]  ;;  %v6692_v60 = vld [vmem:[#allocation6 + $0x7c0] sm:$0xf] }
 0x25e   : > { %3044 = vmatpush.bf16.msrb.mxu1 %v6285_v41  ;;  %v6461_v41 = vor.u32 %v7721_v44, %v6460_v30  ;;  %v6273_v38 = vor.u32 %v7671_v63, %v6270_v15  ;;  %v7703_v63 = vld [vmem:[#allocation6 + $0x26c] sm:$0xf]  ;;  %v6837_v15 = vor.u32 %v7912_v17, %v6836_v29  ;;  %v7876_v20 = vld [vmem:[#allocation6 + $0x7cc] sm:$0xf0]  ;;  %v7846_v17 = vld [vmem:[#allocation6 + $0x6e4] sm:$0xf] }
 0x25f   : > { %3023 = vmatmul.bf16.vlgmr.msrb.gmra.mxu3 %v8848_v11 }
 0x260   : > { %3067 = vmatpush.bf16.msra.mxu3 %v6209_v35  ;;  %3036 = vmatmul.bf16.vlgmr.msrb.gmra.mxu0 %v8854_v45  ;;  %v6145_v35 = vor.u32 %v7639_v12, %v6142_v22  ;;  %v6396_v12 = vld [vmem:[#allocation6 + $0x268] sm:$0xf]  ;;  %v7705_v22 = vld [vmem:[#allocation6 + $0x274] sm:$0xf0] }
 0x261   : > { %3080 = vmatpush.bf16.msra.mxu0 %v6337_v36  ;;  %3006 = vmatpush.bf16.msrb.mxu2 %v6265_v33  ;;  %v7635_v36 = vld [vmem:[#allocation6 + $0x4c] sm:$0xf]  ;;  %v6446_v33 = vld [vmem:[#allocation6 + $0x2d8] sm:$0xf0] }
 0x262   : > { %3045 = vmatpush.bf16.msrb.mxu1 %v6269_v39  ;;  %v6445_v39 = vor.u32 %v7717_v8, %v6444_v13  ;;  %v6449_v52 = vor.u32 %v7715_v7, %v6446_v33  ;;  %v6693_v13 = vor.u32 %v7876_v20, %v6692_v60  ;;  %v6380_v8 = vld [vmem:[#allocation6 + $0x248] sm:$0xf]  ;;  %v7872_v7 = vld [vmem:[#allocation6 + $0x7ac] sm:$0xf0]  ;;  %v6804_v33 = vld [vmem:[#allocation6 + $0x8a0] sm:$0xf] }
 0x263   : > { %v7860_v20 = vld [vmem:[#allocation6 + $0x74c] sm:$0xf0] }
 0x264   : > { %3068 = vmatpush.bf16.msra.mxu3 %v6193_v62  ;;  %v6129_v62 = vor.u32 %v7635_v36, %v6126_v43  ;;  %v7701_v36 = vld [vmem:[#allocation6 + $0x254] sm:$0xf0] }
 0x265   : > { %3081 = vmatpush.bf16.msra.mxu0 %v6321_v2  ;;  %3007 = vmatpush.bf16.msrb.mxu2 %v6249_v10  ;;  %v7631_v2 = vld [vmem:[#allocation6 + $0x2c] sm:$0xf]  ;;  %v6430_v10 = vld [vmem:[#allocation6 + $0x2b8] sm:$0xf0] }
 0x266   : > { %3046 = vmatpush.bf16.msrb.mxu1 %v6253_v58  ;;  %v6429_v58 = vor.u32 %v7713_v5, %v6428_v14  ;;  %v6113_v46 = vor.u32 %v7631_v2, %v6110_v16  ;;  %v6433_v61 = vor.u32 %v7711_v25, %v6430_v10  ;;  %v6677_v14 = vor.u32 %v7872_v7, %v6676_v59  ;;  %v6364_v5 = vld [vmem:[#allocation6 + $0x228] sm:$0xf]  ;;  %v7697_v2 = vld [vmem:[#allocation6 + $0x234] sm:$0xf0]  ;;  %v6660_v25 = vld [vmem:[#allocation6 + $0x780] sm:$0xf] }
 0x267   : > { %v6788_v10 = vld [vmem:[#allocation6 + $0x880] sm:$0xf] }
 0x268   : > { %3069 = vmatpush.bf16.msra.mxu3 %v6177_v28  ;;  %v6412_v28 = vld [vmem:[#allocation6 + $0x288] sm:$0xf] }
 0x269   : > { %3082 = vmatpush.bf16.msra.mxu0 %v6305_v32  ;;  %3008 = vmatpush.bf16.msrb.mxu2 %v6233_v34  ;;  %v7627_v32 = vld [vmem:[#allocation6 + $0xc] sm:$0xf]  ;;  %v6414_v34 = vld [vmem:[#allocation6 + $0x298] sm:$0xf0] }
 0x26a   : > { %3047 = vmatpush.bf16.msrb.mxu1 %v6237_v21  ;;  %v7880_v21 = vld [vmem:[#allocation6 + $0x7ec] sm:$0xf0]  ;;  %v6097_v18 = vor.u32 %v7627_v32, %v6094_v40  ;;  %v6417_v30 = vor.u32 %v7707_v54, %v6414_v34  ;;  %v7691_v32 = vld [vmem:[#allocation6 + $0x20c] sm:$0xf]  ;;  %v6350_v40 = vld [vmem:[#allocation6 + $0x218] sm:$0xf0] }
 0x26b   : > { %v6709_v44 = vor.u32 %v7880_v21, %v6708_v0  ;;  %v6644_v54 = vld [vmem:[#allocation6 + $0x760] sm:$0xf]  ;;  %v7864_v0 = vld [vmem:[#allocation6 + $0x76c] sm:$0xf0] }
 0x26c   : > { %3070 = vmatpush.bf16.msra.mxu3 %v6161_v24  ;;  %v6413_v24 = vor.u32 %v7709_v23, %v6412_v28  ;;  %v6348_v28 = vld [vmem:[#allocation6 + $0x208] sm:$0xf]  ;;  %v7693_v23 = vld [vmem:[#allocation6 + $0x214] sm:$0xf0]  ;;  %v6772_v21 = vld [vmem:[#allocation6 + $0x860] sm:$0xf] }
 0x26d   : > { %3083 = vmatpush.bf16.msra.mxu0 %v6289_v48  ;;  %3009 = vmatpush.bf16.msrb.mxu2 %v6217_v56  ;;  %v6225_v48 = vor.u32 %v7659_v49, %v6222_v27  ;;  %v6398_v56 = vld [vmem:[#allocation6 + $0x278] sm:$0xf0]  ;;  %v6580_v49 = vld [vmem:[#allocation6 + $0x6e0] sm:$0xf]  ;;  %v7848_v27 = vld [vmem:[#allocation6 + $0x6ec] sm:$0xf0]  ;;  %v6349_v29 = vor.u32 %v7693_v23, %v6348_v28 }
 0x26e   : > { %3048 = vmatpush.bf16.msrb.mxu1 %v6221_v57  ;;  %v6820_v57 = vld [vmem:[#allocation6 + $0x8c0] sm:$0xf]  ;;  %v7910_v23 = vld [vmem:[#allocation6 + $0x8e4] sm:$0xf] }
 0x26f   : > { %v6724_v28 = vld [vmem:[#allocation6 + $0x800] sm:$0xf] }
 0x270   : > { %3071 = vmatpush.bf16.msra.mxu3 %v6145_v35  ;;  %3010 = vmatmul.bf16.vlgmr.msrb.gmra.mxu2 %v8844_v19  ;;  %v6397_v35 = vor.u32 %v7705_v22, %v6396_v12 }
 0x271   : > { %3054 = vmatpush.bf16.msra.mxu2 %v6461_v41  ;;  %3084 = vmatpush.bf16.msra.mxu0 %v6273_v38  ;;  %v7908_v41 = vld [vmem:[#allocation6 + $0x8cc] sm:$0xf0]  ;;  %v6401_v38 = vor.u32 %v7703_v63, %v6398_v56  ;;  %v6564_v63 = vld [vmem:[#allocation6 + $0x6c0] sm:$0xf] }
 0x272   : > { %3093 = vmatpush.bf16.msra.mxu1 %v6465_v42  ;;  %v7699_v42 = vld [vmem:[#allocation6 + $0x24c] sm:$0xf]  ;;  %v6821_v43 = vor.u32 %v7908_v41, %v6820_v57  ;;  %v6628_v56 = vld [vmem:[#allocation6 + $0x740] sm:$0xf]  ;;  %v7892_v41 = vld [vmem:[#allocation6 + $0x84c] sm:$0xf0] }
 0x273   : > { %3049 = vmatmul.bf16.vlgmr.msrb.gmra.mxu1 %v8844_v19  ;;  %v6756_v57 = vld [vmem:[#allocation6 + $0x840] sm:$0xf] }
 0x274   : > { %3072 = vmatpush.bf16.msra.mxu3 %v6129_v62  ;;  %v6381_v62 = vor.u32 %v7701_v36, %v6380_v8  ;;  %v6629_v8 = vor.u32 %v7860_v20, %v6628_v56  ;;  %v6757_v36 = vor.u32 %v7892_v41, %v6756_v57  ;;  %v6572_v56 = vld [vmem:[#allocation6 + $0x6c8] sm:$0xf]  ;;  %v8878_v20 = vrot.slane %v8800_v47, 1 }
 0x275   : > { %3055 = vmatpush.bf16.msra.mxu2 %v6445_v39  ;;  %3085 = vmatpush.bf16.msra.mxu0 %v6257_v9  ;;  %v7904_v39 = vld [vmem:[#allocation6 + $0x8ac] sm:$0xf0]  ;;  %v6385_v9 = vor.u32 %v7699_v42, %v6382_v51  ;;  %v6548_v42 = vld [vmem:[#allocation6 + $0x6a0] sm:$0xf]  ;;  %v8881_v57 = vrot.slane %v8803_v55, 1 }
 0x276   : > { %3094 = vmatpush.bf16.msra.mxu1 %v6449_v52  ;;  %v7695_v52 = vld [vmem:[#allocation6 + $0x22c] sm:$0xf]  ;;  %v6805_v16 = vor.u32 %v7904_v39, %v6804_v33  ;;  %v6612_v51 = vld [vmem:[#allocation6 + $0x720] sm:$0xf]  ;;  %v7856_v33 = vld [vmem:[#allocation6 + $0x72c] sm:$0xf0] }
 0x277   : > { %v6740_v39 = vld [vmem:[#allocation6 + $0x820] sm:$0xf] }
 0x278   : > { %3073 = vmatpush.bf16.msra.mxu3 %v6113_v46  ;;  %v6369_v46 = vor.u32 %v7695_v52, %v6366_v4  ;;  %v6532_v52 = vld [vmem:[#allocation6 + $0x680] sm:$0xf] }
 0x279   : > { %3056 = vmatpush.bf16.msra.mxu2 %v6429_v58  ;;  %3086 = vmatpush.bf16.msra.mxu0 %v6241_v37  ;;  %v6365_v58 = vor.u32 %v7697_v2, %v6364_v5 }
 0x27a   : > { %3095 = vmatpush.bf16.msra.mxu1 %v6433_v61 }
 0x27b   : > { %v8864_v26 = vpop.f32.mrf.mxu0 }
 0x27c   : > { %3074 = vmatpush.bf16.msra.mxu3 %v6097_v18  ;;  %v6582_v18 = vld [vmem:[#allocation6 + $0x6f0] sm:$0xf0] }
 0x27d   : > { %3057 = vmatpush.bf16.msra.mxu2 %v6413_v24  ;;  %3087 = vmatpush.bf16.msra.mxu0 %v6225_v48  ;;  %v7896_v24 = vld [vmem:[#allocation6 + $0x86c] sm:$0xf0]  ;;  %v6353_v48 = vor.u32 %v7691_v32, %v6350_v40  ;;  %v6585_v60 = vor.u32 %v7846_v17, %v6582_v18  ;;  %v6838_v32 = vld [vmem:[#allocation6 + $0x8f0] sm:$0xf0]  ;;  %v7830_v18 = vld [vmem:[#allocation6 + $0x664] sm:$0xf] }
 0x27e   : > { %3096 = vmatpush.bf16.msra.mxu1 %v6417_v30  ;;  %v6581_v30 = vor.u32 %v7848_v27, %v6580_v49  ;;  %v6773_v12 = vor.u32 %v7896_v24, %v6772_v21  ;;  %v7849_v49 = vld [vmem:[#allocation6 + $0x6f4] sm:$0xf0]  ;;  %v6841_v21 = vor.u32 %v7910_v23, %v6838_v32  ;;  %v7832_v17 = vld [vmem:[#allocation6 + $0x66c] sm:$0xf0]  ;;  %v6468_v23 = vld [vmem:[#allocation6 + $0x600] sm:$0xf] }
 0x27f   : > { %3075 = vmatmul.bf16.vlgmr.msra.gmra.mxu3 %v8854_v45  ;;  %v7868_v45 = vld [vmem:[#allocation6 + $0x78c] sm:$0xf0] }
 0x280   : > { %3705 = vmatpush.bf16.msrb.mxu3 %v6709_v44  ;;  %3088 = vmatmul.bf16.vlgmr.msra.gmra.mxu0 %v8844_v19  ;;  %v7900_v19 = vld [vmem:[#allocation6 + $0x88c] sm:$0xf0]  ;;  %v6661_v37 = vor.u32 %v7868_v45, %v6660_v25  ;;  %v6645_v44 = vor.u32 %v7864_v0, %v6644_v54 }
 0x281   : > { %3718 = vmatpush.bf16.msrb.mxu0 %v6837_v15  ;;  %3058 = vmatpush.bf16.msra.mxu2 %v6397_v35  ;;  %v6789_v61 = vor.u32 %v7900_v19, %v6788_v10  ;;  %v8866_v34 = vpop.f32.mrf.mxu3  ;;  %v7844_v15 = vld [vmem:[#allocation6 + $0x6cc] sm:$0xf0]  ;;  %v7842_v35 = vld [vmem:[#allocation6 + $0x6c4] sm:$0xf]  ;;  %v6596_v10 = vld [vmem:[#allocation6 + $0x700] sm:$0xf] }
 0x282   : > { %3097 = vmatpush.bf16.msra.mxu1 %v6401_v38  ;;  %v6566_v38 = vld [vmem:[#allocation6 + $0x6d0] sm:$0xf0]  ;;  %v7836_v45 = vld [vmem:[#allocation6 + $0x68c] sm:$0xf0] }
 0x283   : > { %v2351_v22 = vpop.f32.mrf.mxu0  ;;  %v6569_v59 = vor.u32 %v7842_v35, %v6566_v38  ;;  %v7852_v19 = vld [vmem:[#allocation6 + $0x70c] sm:$0xf0]  ;;  %v6533_v40 = vor.u32 %v7836_v45, %v6532_v52 }
 0x284   : > { %3706 = vmatpush.bf16.msrb.mxu3 %v6693_v13  ;;  %v6565_v13 = vor.u32 %v7844_v15, %v6564_v63  ;;  %v6597_v27 = vor.u32 %v7852_v19, %v6596_v10  ;;  %v7906_v22 = vld [vmem:[#allocation6 + $0x8c4] sm:$0xf]  ;;  %v6822_v63 = vld [vmem:[#allocation6 + $0x8d0] sm:$0xf0]  ;;  %v7824_v52 = vld [vmem:[#allocation6 + $0x62c] sm:$0xf0] }
 0x285   : > { %3719 = vmatpush.bf16.msrb.mxu0 %v6821_v43  ;;  %3059 = vmatpush.bf16.msra.mxu2 %v6381_v62  ;;  %v7840_v43 = vld [vmem:[#allocation6 + $0x6ac] sm:$0xf0]  ;;  %v6486_v10 = vld [vmem:[#allocation6 + $0x630] sm:$0xf0]  ;;  %v7898_v19 = vld [vmem:[#allocation6 + $0x884] sm:$0xf] }
 0x286   : > { %3098 = vmatpush.bf16.msra.mxu1 %v6385_v9  ;;  %v7888_v62 = vld [vmem:[#allocation6 + $0x82c] sm:$0xf0]  ;;  %v7838_v9 = vld [vmem:[#allocation6 + $0x6a4] sm:$0xf]  ;;  %v6549_v5 = vor.u32 %v7840_v43, %v6548_v42 }
 0x287   : > { %v6741_v4 = vor.u32 %v7888_v62, %v6740_v39  ;;  %v7826_v42 = vld [vmem:[#allocation6 + $0x644] sm:$0xf] }
 0x288   : > { %3707 = vmatpush.bf16.msrb.mxu3 %v6677_v14  ;;  %v6550_v14 = vld [vmem:[#allocation6 + $0x6b0] sm:$0xf0] }
 0x289   : > { %3720 = vmatpush.bf16.msrb.mxu0 %v6805_v16  ;;  %3060 = vmatpush.bf16.msra.mxu2 %v6365_v58  ;;  %v2338_v7 = vpop.f32.mrf.mxu3  ;;  %v6613_v16 = vor.u32 %v7856_v33, %v6612_v51  ;;  %v6553_v58 = vor.u32 %v7838_v9, %v6550_v14  ;;  %v6502_v51 = vld [vmem:[#allocation6 + $0x650] sm:$0xf0]  ;;  %v7841_v33 = vld [vmem:[#allocation6 + $0x6b4] sm:$0xf0] }
 0x28a   : > { %3099 = vmatpush.bf16.msra.mxu1 %v6369_v46  ;;  %v7834_v46 = vld [vmem:[#allocation6 + $0x684] sm:$0xf]  ;;  %v6806_v7 = vld [vmem:[#allocation6 + $0x8b0] sm:$0xf0]  ;;  %v6505_v62 = vor.u32 %v7826_v42, %v6502_v51  ;;  %v6508_v51 = vld [vmem:[#allocation6 + $0x648] sm:$0xf] }
 0x28b   : > { %v8870_v2 = vpop.f32.mrf.mxu1 }
 0x28c   : > { %3708 = vmatpush.bf16.msrb.mxu3 %v6661_v37  ;;  %v8872_v25 = vpop.f32.mrf.mxu0  ;;  %v6534_v37 = vld [vmem:[#allocation6 + $0x690] sm:$0xf0] }
 0x28d   : > { %3721 = vmatpush.bf16.msrb.mxu0 %v6789_v61  ;;  %3061 = vmatpush.bf16.msra.mxu2 %v6349_v29  ;;  %v6588_v61 = vld [vmem:[#allocation6 + $0x6e8] sm:$0xf]  ;;  %v6537_v0 = vor.u32 %v7834_v46, %v6534_v37  ;;  %v6516_v29 = vld [vmem:[#allocation6 + $0x660] sm:$0xf] }
 0x28e   : > { %3100 = vmatpush.bf16.msra.mxu1 %v6353_v48  ;;  %v6589_v48 = vor.u32 %v7849_v49, %v6588_v61  ;;  %v7820_v49 = vld [vmem:[#allocation6 + $0x60c] sm:$0xf0] }
 0x290   : > { %3709 = vmatpush.bf16.msrb.mxu3 %v6645_v44  ;;  %3062 = vmatmul.bf16.vlgmr.msra.gmra.mxu2 %v8848_v11 }
 0x291   : > { %3692 = vmatpush.bf16.msrb.mxu2 %v6581_v30  ;;  %3722 = vmatpush.bf16.msrb.mxu0 %v6773_v12  ;;  %v2323_v24 = vpop.f32.mrf.mxu2  ;;  %v6518_v12 = vld [vmem:[#allocation6 + $0x670] sm:$0xf0] }
 0x292   : > { %3731 = vmatpush.bf16.msrb.mxu1 %v6585_v60  ;;  %v2337_v30 = vadd.f32 %v8866_v34, %v2323_v24  ;;  %v8875_v44 = vpop.f32.mrf.mxu3  ;;  %v7845_v60 = vld [vmem:[#allocation6 + $0x6d4] sm:$0xf0]  ;;  %v6517_v34 = vor.u32 %v7832_v17, %v6516_v29  ;;  %v6521_v38 = vor.u32 %v7830_v18, %v6518_v12  ;;  %v7878_v24 = vld [vmem:[#allocation6 + $0x7e4] sm:$0xf]  ;;  %v6710_v29 = vld [vmem:[#allocation6 + $0x7f0] sm:$0xf0]  ;;  %v6469_v12 = vor.u32 %v7820_v49, %v6468_v23 }
 0x293   : > { %3101 = vmatmul.bf16.vlgmr.msra.gmra.mxu1 %v8848_v11  ;;  %v7884_v11 = vld [vmem:[#allocation6 + $0x80c] sm:$0xf0]  ;;  %v2364_v15 = vpop.f32.mrf.mxu1  ;;  %v6573_v43 = vor.u32 %v7845_v60, %v6572_v56  ;;  %v7894_v17 = vld [vmem:[#allocation6 + $0x864] sm:$0xf]  ;;  %v6774_v18 = vld [vmem:[#allocation6 + $0x870] sm:$0xf0] }
 0x294   : > { %3710 = vmatpush.bf16.msrb.mxu3 %v6629_v8  ;;  %v6725_v54 = vor.u32 %v7884_v11, %v6724_v28  ;;  %v8884_v41 = vadd.f32 %v8864_v26, %v2337_v30  ;;  %v2403_v35 = vpop.f32.mrf.mxu0  ;;  %v6500_v8 = vld [vmem:[#allocation6 + $0x640] sm:$0xf]  ;;  %v6556_v26 = vld [vmem:[#allocation6 + $0x6a8] sm:$0xf]  ;;  %v7837_v11 = vld [vmem:[#allocation6 + $0x694] sm:$0xf0]  ;;  %v6713_v15 = vor.u32 %v7878_v24, %v6710_v29  ;;  %v6777_v56 = vor.u32 %v7894_v17, %v6774_v18 }
 0x295   : > { %3693 = vmatpush.bf16.msrb.mxu2 %v6565_v13  ;;  %3723 = vmatpush.bf16.msrb.mxu0 %v6757_v36  ;;  %v6825_v13 = vor.u32 %v7906_v22, %v6822_v63  ;;  %v7828_v36 = vld [vmem:[#allocation6 + $0x64c] sm:$0xf0]  ;;  %v6540_v28 = vld [vmem:[#allocation6 + $0x688] sm:$0xf]  ;;  %v7833_v30 = vld [vmem:[#allocation6 + $0x674] sm:$0xf0] }
 0x296   : > { %3732 = vmatpush.bf16.msrb.mxu1 %v6569_v59  ;;  %v7902_v59 = vld [vmem:[#allocation6 + $0x8a4] sm:$0xf]  ;;  %v6501_v39 = vor.u32 %v7828_v36, %v6500_v8  ;;  %v6716_v22 = vld [vmem:[#allocation6 + $0x7e8] sm:$0xf]  ;;  %v7881_v63 = vld [vmem:[#allocation6 + $0x7f4] sm:$0xf0] }
 0x297   : > { %v6809_v9 = vor.u32 %v7902_v59, %v6806_v7  ;;  %v7874_v35 = vld [vmem:[#allocation6 + $0x7c4] sm:$0xf]  ;;  %v6717_v8 = vor.u32 %v7881_v63, %v6716_v22  ;;  %v7829_v59 = vld [vmem:[#allocation6 + $0x654] sm:$0xf0]  ;;  %v6662_v49 = vld [vmem:[#allocation6 + $0x790] sm:$0xf0] }
 0x298   : > { %3711 = vmatpush.bf16.msrb.mxu3 %v6613_v16  ;;  %v7822_v16 = vld [vmem:[#allocation6 + $0x624] sm:$0xf]  ;;  %v6476_v24 = vld [vmem:[#allocation6 + $0x608] sm:$0xf]  ;;  %v7821_v29 = vld [vmem:[#allocation6 + $0x614] sm:$0xf0] }
 0x299   : > { %3694 = vmatpush.bf16.msrb.mxu2 %v6549_v5  ;;  %3724 = vmatpush.bf16.msrb.mxu0 %v6741_v4  ;;  %v2325_v14 = vpop.f32.mrf.mxu2  ;;  %v6484_v5 = vld [vmem:[#allocation6 + $0x620] sm:$0xf]  ;;  %v6557_v4 = vor.u32 %v7841_v33, %v6556_v26  ;;  %v6489_v32 = vor.u32 %v7822_v16, %v6486_v10  ;;  %v6700_v33 = vld [vmem:[#allocation6 + $0x7c8] sm:$0xf]  ;;  %v7870_v16 = vld [vmem:[#allocation6 + $0x7a4] sm:$0xf] }
 0x29a   : > { %3733 = vmatpush.bf16.msrb.mxu1 %v6553_v58  ;;  %v2390_v45 = vpop.f32.mrf.mxu3  ;;  %v6790_v58 = vld [vmem:[#allocation6 + $0x890] sm:$0xf0]  ;;  %v6485_v46 = vor.u32 %v7824_v52, %v6484_v5  ;;  %v6509_v52 = vor.u32 %v7829_v59, %v6508_v51  ;;  %v6668_v17 = vld [vmem:[#allocation6 + $0x788] sm:$0xf]  ;;  %v7869_v18 = vld [vmem:[#allocation6 + $0x794] sm:$0xf0] }
 0x29b   : > { %v2414_v37 = vpop.f32.mrf.mxu1  ;;  %v6793_v61 = vor.u32 %v7898_v19, %v6790_v58  ;;  %v7886_v45 = vld [vmem:[#allocation6 + $0x824] sm:$0xf]  ;;  %v6742_v19 = vld [vmem:[#allocation6 + $0x830] sm:$0xf0]  ;;  %v6492_v58 = vld [vmem:[#allocation6 + $0x628] sm:$0xf] }
 0x29c   : > { %3712 = vmatpush.bf16.msrb.mxu3 %v6597_v27  ;;  %v7818_v27 = vld [vmem:[#allocation6 + $0x604] sm:$0xf]  ;;  %v6745_v23 = vor.u32 %v7886_v45, %v6742_v19  ;;  %v7879_v63 = vld [vmem:[#allocation6 + $0x7ec] sm:$0xf]  ;;  %v6574_v51 = vld [vmem:[#allocation6 + $0x6d8] sm:$0xf0] }
 0x29d   : > { %3695 = vmatpush.bf16.msrb.mxu2 %v6533_v40  ;;  %3725 = vmatpush.bf16.msrb.mxu0 %v6725_v54  ;;  %v8889_v40 = vadd.f32 %v2414_v37, %v8872_v25  ;;  %v6470_v54 = vld [vmem:[#allocation6 + $0x610] sm:$0xf0]  ;;  %v7866_v37 = vld [vmem:[#allocation6 + $0x784] sm:$0xf]  ;;  %v7875_v59 = vld [vmem:[#allocation6 + $0x7cc] sm:$0xf] }
 0x29e   : > { %3734 = vmatpush.bf16.msrb.mxu1 %v6537_v0  ;;  %v6473_v25 = vor.u32 %v7818_v27, %v6470_v54  ;;  %v7882_v27 = vld [vmem:[#allocation6 + $0x804] sm:$0xf]  ;;  %v6726_v54 = vld [vmem:[#allocation6 + $0x810] sm:$0xf0]  ;;  %v6665_v22 = vor.u32 %v7866_v37, %v6662_v49  ;;  %v7861_v45 = vld [vmem:[#allocation6 + $0x754] sm:$0xf0] }
 0x29f   : > { %3713 = vmatmul.bf16.vlgmr.msrb.gmra.mxu3 %v8878_v20  ;;  %v2453_v0 = vpop.f32.mrf.mxu0  ;;  %v6558_v19 = vld [vmem:[#allocation6 + $0x6b8] sm:$0xf0]  ;;  %v7854_v37 = vld [vmem:[#allocation6 + $0x724] sm:$0xf]  ;;  %v7857_v49 = vld [vmem:[#allocation6 + $0x734] sm:$0xf0] }
 0x2a0   : > { %3757 = vmatpush.bf16.msra.mxu3 %v6841_v21  ;;  %3726 = vmatmul.bf16.vlgmr.msrb.gmra.mxu0 %v8881_v57  ;;  %v6541_v21 = vor.u32 %v7837_v11, %v6540_v28  ;;  %v7825_v28 = vld [vmem:[#allocation6 + $0x634] sm:$0xf0] }
 0x2a1   : > { %3770 = vmatpush.bf16.msra.mxu0 %v6589_v48  ;;  %3696 = vmatpush.bf16.msrb.mxu2 %v6517_v34  ;;  %v6524_v48 = vld [vmem:[#allocation6 + $0x668] sm:$0xf]  ;;  %v2375_v34 = vpop.f32.mrf.mxu2  ;;  %v7873_v11 = vld [vmem:[#allocation6 + $0x7b4] sm:$0xf0] }
 0x2a2   : > { %3735 = vmatpush.bf16.msrb.mxu1 %v6521_v38  ;;  %v6525_v60 = vor.u32 %v7833_v30, %v6524_v48  ;;  %v6694_v38 = vld [vmem:[#allocation6 + $0x7d0] sm:$0xf0]  ;;  %v2376_v36 = vadd.f32 %v2375_v34, %v8870_v2  ;;  %v2440_v42 = vpop.f32.mrf.mxu3  ;;  %v7847_v48 = vld [vmem:[#allocation6 + $0x6ec] sm:$0xf]  ;;  %v6590_v30 = vld [vmem:[#allocation6 + $0x6f8] sm:$0xf0]  ;;  %v6669_v34 = vor.u32 %v7869_v18, %v6668_v17 }
 0x2a3   : > { %v2454_v7 = vadd.f32 %v2453_v0, %v2440_v42  ;;  %v2416_v26 = vpop.f32.mrf.mxu1  ;;  %v6697_v14 = vor.u32 %v7874_v35, %v6694_v38  ;;  %v6593_v35 = vor.u32 %v7847_v48, %v6590_v30  ;;  %v7862_v38 = vld [vmem:[#allocation6 + $0x764] sm:$0xf]  ;;  %v7865_v42 = vld [vmem:[#allocation6 + $0x774] sm:$0xf0] }
 0x2a4   : > { %3758 = vmatpush.bf16.msra.mxu3 %v6825_v13  ;;  %v7890_v13 = vld [vmem:[#allocation6 + $0x844] sm:$0xf]  ;;  %v6702_v26 = vld [vmem:[#allocation6 + $0x7d8] sm:$0xf0] }
 0x2a5   : > { %3771 = vmatpush.bf16.msra.mxu0 %v6573_v43  ;;  %3697 = vmatpush.bf16.msrb.mxu2 %v6501_v39  ;;  %v6758_v43 = vld [vmem:[#allocation6 + $0x850] sm:$0xf0]  ;;  %v7877_v39 = vld [vmem:[#allocation6 + $0x7d4] sm:$0xf0]  ;;  %v7850_v18 = vld [vmem:[#allocation6 + $0x704] sm:$0xf] }
 0x2a6   : > { %3736 = vmatpush.bf16.msrb.mxu1 %v6505_v62  ;;  %v8893_v62 = vrot.slane %v8824_v3, 1  ;;  %v6761_v5 = vor.u32 %v7890_v13, %v6758_v43  ;;  %v6701_v10 = vor.u32 %v7877_v39, %v6700_v33  ;;  %v6646_v13 = vld [vmem:[#allocation6 + $0x770] sm:$0xf0]  ;;  %v7843_v43 = vld [vmem:[#allocation6 + $0x6cc] sm:$0xf] }
 0x2a7   : > { %v2455_v2 = vpop.f32.mrf.mxu0  ;;  %v6649_v33 = vor.u32 %v7862_v38, %v6646_v13  ;;  %v7863_v38 = vld [vmem:[#allocation6 + $0x76c] sm:$0xf]  ;;  %v6654_v13 = vld [vmem:[#allocation6 + $0x778] sm:$0xf0] }
 0x2a8   : > { %3759 = vmatpush.bf16.msra.mxu3 %v6809_v9  ;;  %v8896_v9 = vadd.f32 %v8875_v44, %v2376_v36  ;;  %v6684_v44 = vld [vmem:[#allocation6 + $0x7a8] sm:$0xf] }
 0x2a9   : > { %3772 = vmatpush.bf16.msra.mxu0 %v6557_v4  ;;  %3698 = vmatpush.bf16.msrb.mxu2 %v6485_v46  ;;  %v6678_v4 = vld [vmem:[#allocation6 + $0x7b0] sm:$0xf0]  ;;  %v6685_v0 = vor.u32 %v7873_v11, %v6684_v44  ;;  %v6686_v44 = vld [vmem:[#allocation6 + $0x7b8] sm:$0xf0] }
 0x2aa   : > { %3737 = vmatpush.bf16.msrb.mxu1 %v6489_v32  ;;  %v6681_v46 = vor.u32 %v7870_v16, %v6678_v4  ;;  %v6493_v32 = vor.u32 %v7825_v28, %v6492_v58  ;;  %v6636_v16 = vld [vmem:[#allocation6 + $0x748] sm:$0xf]  ;;  %v6705_v4 = vor.u32 %v7875_v59, %v6702_v26  ;;  %v7871_v28 = vld [vmem:[#allocation6 + $0x7ac] sm:$0xf]  ;;  %v6657_v26 = vor.u32 %v7863_v38, %v6654_v13  ;;  %v7220_v13 = vld [vmem:[#allocation6 + $0xbe0] sm:$0xf] }
 0x2ac   : > { %3760 = vmatpush.bf16.msra.mxu3 %v6793_v61  ;;  %v2377_v61 = vpop.f32.mrf.mxu2 }
 0x2ad   : > { %3773 = vmatpush.bf16.msra.mxu0 %v6541_v21  ;;  %3699 = vmatpush.bf16.msrb.mxu2 %v6469_v12  ;;  %v2442_v21 = vpop.f32.mrf.mxu3  ;;  %v6689_v61 = vor.u32 %v7871_v28, %v6686_v44 }
 0x2ae   : > { %3738 = vmatpush.bf16.msrb.mxu1 %v6473_v25  ;;  %v6718_v25 = vld [vmem:[#allocation6 + $0x7f8] sm:$0xf0] }
 0x2af   : > { %v2466_v12 = vpop.f32.mrf.mxu1  ;;  %v6721_v36 = vor.u32 %v7879_v63, %v6718_v25  ;;  %v6670_v21 = vld [vmem:[#allocation6 + $0x798] sm:$0xf0]  ;;  %v7853_v63 = vld [vmem:[#allocation6 + $0x714] sm:$0xf0] }
 0x2b0   : > { %3761 = vmatpush.bf16.msra.mxu3 %v6777_v56  ;;  %3700 = vmatmul.bf16.vlgmr.msrb.gmra.mxu2 %v8893_v62  ;;  %v6729_v56 = vor.u32 %v7882_v27, %v6726_v54  ;;  %v7835_v27 = vld [vmem:[#allocation6 + $0x68c] sm:$0xf]  ;;  %v6542_v54 = vld [vmem:[#allocation6 + $0x698] sm:$0xf0] }
 0x2b1   : > { %3744 = vmatpush.bf16.msra.mxu2 %v6713_v15  ;;  %3774 = vmatpush.bf16.msra.mxu0 %v6525_v60  ;;  %v8900_v15 = vadd.f32 %v2466_v12, %v2454_v7  ;;  %v6477_v60 = vor.u32 %v7821_v29, %v6476_v24  ;;  %v6545_v30 = vor.u32 %v7835_v27, %v6542_v54  ;;  %v6598_v12 = vld [vmem:[#allocation6 + $0x710] sm:$0xf0]  ;;  %v6814_v27 = vld [vmem:[#allocation6 + $0x8b8] sm:$0xf0] }
 0x2b2   : > { %3783 = vmatpush.bf16.msra.mxu1 %v6717_v8  ;;  %v6652_v8 = vld [vmem:[#allocation6 + $0x768] sm:$0xf] }
 0x2b3   : > { %3739 = vmatmul.bf16.vlgmr.msrb.gmra.mxu1 %v8893_v62  ;;  %v6653_v39 = vor.u32 %v7865_v42, %v6652_v8  ;;  %v6601_v8 = vor.u32 %v7850_v18, %v6598_v12  ;;  %v6846_v42 = vld [vmem:[#allocation6 + $0x8f8] sm:$0xf0]  ;;  %v7901_v18 = vld [vmem:[#allocation6 + $0x894] sm:$0xf0] }
 0x2b4   : > { %3762 = vmatpush.bf16.msra.mxu3 %v6761_v5  ;;  %v2427_v7 = vpop.f32.mrf.mxu2  ;;  %v7858_v5 = vld [vmem:[#allocation6 + $0x744] sm:$0xf] }
 0x2b5   : > { %3745 = vmatpush.bf16.msra.mxu2 %v6697_v14  ;;  %3775 = vmatpush.bf16.msra.mxu0 %v6509_v52  ;;  %v6577_v14 = vor.u32 %v7843_v43, %v6574_v51  ;;  %v8903_v2 = vadd.f32 %v2427_v7, %v8889_v40  ;;  %v6630_v52 = vld [vmem:[#allocation6 + $0x750] sm:$0xf0]  ;;  %v6637_v40 = vor.u32 %v7861_v45, %v6636_v16  ;;  %v6828_v7 = vld [vmem:[#allocation6 + $0x8c8] sm:$0xf]  ;;  %v7859_v16 = vld [vmem:[#allocation6 + $0x74c] sm:$0xf] }
 0x2b6   : > { %3784 = vmatpush.bf16.msra.mxu1 %v6701_v10  ;;  %v7839_v10 = vld [vmem:[#allocation6 + $0x6ac] sm:$0xf]  ;;  %v6633_v11 = vor.u32 %v7858_v5, %v6630_v52  ;;  %v6510_v52 = vld [vmem:[#allocation6 + $0x658] sm:$0xf0] }
 0x2b7   : > { %v2468_v58 = vpop.f32.mrf.mxu1 }
 0x2b8   : > { %3763 = vmatpush.bf16.msra.mxu3 %v6745_v23  ;;  %v6614_v23 = vld [vmem:[#allocation6 + $0x730] sm:$0xf0] }
 0x2b9   : > { %3746 = vmatpush.bf16.msra.mxu2 %v6681_v46  ;;  %3776 = vmatpush.bf16.msra.mxu0 %v6493_v32  ;;  %v6561_v46 = vor.u32 %v7839_v10, %v6558_v19  ;;  %v6620_v32 = vld [vmem:[#allocation6 + $0x728] sm:$0xf]  ;;  %v6617_v29 = vor.u32 %v7854_v37, %v6614_v23  ;;  %v7907_v10 = vld [vmem:[#allocation6 + $0x8cc] sm:$0xf]  ;;  %v6830_v19 = vld [vmem:[#allocation6 + $0x8d8] sm:$0xf0] }
 0x2ba   : > { %3785 = vmatpush.bf16.msra.mxu1 %v6685_v0  ;;  %v7867_v0 = vld [vmem:[#allocation6 + $0x78c] sm:$0xf]  ;;  %v6621_v48 = vor.u32 %v7857_v49, %v6620_v32  ;;  %v6833_v37 = vor.u32 %v7907_v10, %v6830_v19  ;;  %v6494_v23 = vld [vmem:[#allocation6 + $0x638] sm:$0xf0] }
 0x2bb   : > { %v6673_v25 = vor.u32 %v7867_v0, %v6670_v21  ;;  %v7855_v32 = vld [vmem:[#allocation6 + $0x72c] sm:$0xf]  ;;  %v6796_v0 = vld [vmem:[#allocation6 + $0x888] sm:$0xf] }
 0x2bc   : > { %3764 = vmatpush.bf16.msra.mxu3 %v6729_v56  ;;  %v2429_v17 = vpop.f32.mrf.mxu2  ;;  %v6844_v56 = vld [vmem:[#allocation6 + $0x8e8] sm:$0xf]  ;;  %v7903_v49 = vld [vmem:[#allocation6 + $0x8ac] sm:$0xf]  ;;  %v6797_v38 = vor.u32 %v7901_v18, %v6796_v0 }
 0x2bd   : > { %3747 = vmatpush.bf16.msra.mxu2 %v6665_v22  ;;  %3777 = vmatpush.bf16.msra.mxu0 %v6477_v60  ;;  %v8907_v24 = vpop.f32.mrf.mxu0  ;;  %v6604_v22 = vld [vmem:[#allocation6 + $0x708] sm:$0xf]  ;;  %v7913_v60 = vld [vmem:[#allocation6 + $0x8f4] sm:$0xf0]  ;;  %v6817_v12 = vor.u32 %v7903_v49, %v6814_v27  ;;  %v8000_v49 = vld [vmem:[#allocation6 + $0xbac] sm:$0xf0] }
 0x2be   : > { %3786 = vmatpush.bf16.msra.mxu1 %v6669_v34  ;;  %v7831_v34 = vld [vmem:[#allocation6 + $0x66c] sm:$0xf]  ;;  %v6605_v43 = vor.u32 %v7853_v63, %v6604_v22  ;;  %v6845_v51 = vor.u32 %v7913_v60, %v6844_v56  ;;  %v6606_v63 = vld [vmem:[#allocation6 + $0x718] sm:$0xf0]  ;;  %v7092_v60 = vld [vmem:[#allocation6 + $0xae0] sm:$0xf] }
 0x2bf   : > { %3765 = vmatmul.bf16.vlgmr.msra.gmra.mxu3 %v8881_v57  ;;  %v7851_v22 = vld [vmem:[#allocation6 + $0x70c] sm:$0xf]  ;;  %v6798_v56 = vld [vmem:[#allocation6 + $0x898] sm:$0xf0] }
 0x2c0   : > { %3809 = vmatpush.bf16.msrb.mxu3 %v6593_v35  ;;  %3778 = vmatmul.bf16.vlgmr.msra.gmra.mxu0 %v8893_v62  ;;  %v6526_v35 = vld [vmem:[#allocation6 + $0x678] sm:$0xf0] }
 0x2c1   : > { %3822 = vmatpush.bf16.msrb.mxu0 %v6721_v36  ;;  %3748 = vmatpush.bf16.msra.mxu2 %v6649_v33  ;;  %v7911_v36 = vld [vmem:[#allocation6 + $0x8ec] sm:$0xf]  ;;  %v6529_v59 = vor.u32 %v7831_v34, %v6526_v35  ;;  %v7976_v34 = vld [vmem:[#allocation6 + $0xaec] sm:$0xf0] }
 0x2c2   : > { %3787 = vmatpush.bf16.msra.mxu1 %v6653_v39  ;;  %v8909_v33 = vpop.f32.mrf.mxu3  ;;  %v7909_v39 = vld [vmem:[#allocation6 + $0x8d4] sm:$0xf0]  ;;  %v6849_v5 = vor.u32 %v7911_v36, %v6846_v42  ;;  %v6609_v42 = vor.u32 %v7851_v22, %v6606_v63  ;;  %v7996_v22 = vld [vmem:[#allocation6 + $0xb8c] sm:$0xf0] }
 0x2c3   : > { %v6829_v58 = vor.u32 %v7909_v39, %v6828_v7  ;;  %v7895_v7 = vld [vmem:[#allocation6 + $0x86c] sm:$0xf] }
 0x2c4   : > { %3810 = vmatpush.bf16.msrb.mxu3 %v6577_v14  ;;  %v7827_v14 = vld [vmem:[#allocation6 + $0x64c] sm:$0xf] }
 0x2c5   : > { %3823 = vmatpush.bf16.msrb.mxu0 %v6705_v4  ;;  %3749 = vmatpush.bf16.msra.mxu2 %v6633_v11  ;;  %v6638_v4 = vld [vmem:[#allocation6 + $0x758] sm:$0xf0]  ;;  %v2987_v45 = vpop.f32.mrf.mxu0  ;;  %v6513_v28 = vor.u32 %v7827_v14, %v6510_v52  ;;  %v6812_v11 = vld [vmem:[#allocation6 + $0x8a8] sm:$0xf]  ;;  %v7972_v52 = vld [vmem:[#allocation6 + $0xacc] sm:$0xf0] }
 0x2c6   : > { %3788 = vmatpush.bf16.msra.mxu1 %v6637_v40  ;;  %v6641_v44 = vor.u32 %v7859_v16, %v6638_v4  ;;  %v7905_v40 = vld [vmem:[#allocation6 + $0x8b4] sm:$0xf0]  ;;  %v6782_v14 = vld [vmem:[#allocation6 + $0x878] sm:$0xf0]  ;;  %v7204_v16 = vld [vmem:[#allocation6 + $0xbc0] sm:$0xf] }
 0x2c7   : > { %v6813_v54 = vor.u32 %v7905_v40, %v6812_v11  ;;  %v8004_v4 = vld [vmem:[#allocation6 + $0xbcc] sm:$0xf0]  ;;  %v6785_v19 = vor.u32 %v7895_v7, %v6782_v14  ;;  %v7891_v11 = vld [vmem:[#allocation6 + $0x84c] sm:$0xf]  ;;  %v7156_v7 = vld [vmem:[#allocation6 + $0xb60] sm:$0xf] }
 0x2c8   : > { %3811 = vmatpush.bf16.msrb.mxu3 %v6561_v46  ;;  %v7823_v46 = vld [vmem:[#allocation6 + $0x62c] sm:$0xf]  ;;  %v7205_v40 = vor.u32 %v8004_v4, %v7204_v16 }
 0x2c9   : > { %3824 = vmatpush.bf16.msrb.mxu0 %v6689_v61  ;;  %3750 = vmatpush.bf16.msra.mxu2 %v6617_v29  ;;  %v6622_v61 = vld [vmem:[#allocation6 + $0x738] sm:$0xf0]  ;;  %v6497_v21 = vor.u32 %v7823_v46, %v6494_v23  ;;  %v7968_v23 = vld [vmem:[#allocation6 + $0xaac] sm:$0xf0] }
 0x2ca   : > { %3789 = vmatpush.bf16.msra.mxu1 %v6621_v48  ;;  %v6625_v29 = vor.u32 %v7855_v32, %v6622_v61  ;;  %v2974_v17 = vpop.f32.mrf.mxu3  ;;  %v7819_v48 = vld [vmem:[#allocation6 + $0x60c] sm:$0xf]  ;;  %v6766_v46 = vld [vmem:[#allocation6 + $0x858] sm:$0xf0]  ;;  %v7188_v61 = vld [vmem:[#allocation6 + $0xba0] sm:$0xf] }
 0x2cb   : > { %v7887_v17 = vld [vmem:[#allocation6 + $0x82c] sm:$0xf]  ;;  %v7189_v18 = vor.u32 %v8000_v49, %v7188_v61  ;;  %v6950_v61 = vld [vmem:[#allocation6 + $0x9d0] sm:$0xf0] }
 0x2cc   : > { %3812 = vmatpush.bf16.msrb.mxu3 %v6545_v30  ;;  %v6478_v30 = vld [vmem:[#allocation6 + $0x618] sm:$0xf0] }
 0x2cd   : > { %3825 = vmatpush.bf16.msrb.mxu0 %v6673_v25  ;;  %3751 = vmatpush.bf16.msra.mxu2 %v6601_v8  ;;  %v7899_v25 = vld [vmem:[#allocation6 + $0x88c] sm:$0xf]  ;;  %v8008_v8 = vld [vmem:[#allocation6 + $0xbec] sm:$0xf0]  ;;  %v6481_v36 = vor.u32 %v7819_v48, %v6478_v30  ;;  %v6750_v48 = vld [vmem:[#allocation6 + $0x838] sm:$0xf0] }
 0x2ce   : > { %3790 = vmatpush.bf16.msra.mxu1 %v6605_v43  ;;  %v6801_v43 = vor.u32 %v7899_v25, %v6798_v56  ;;  %v7221_v39 = vor.u32 %v8008_v8, %v7220_v13  ;;  %v7044_v30 = vld [vmem:[#allocation6 + $0xa80] sm:$0xf]  ;;  %v6732_v56 = vld [vmem:[#allocation6 + $0x808] sm:$0xf]  ;;  %v7885_v13 = vld [vmem:[#allocation6 + $0x814] sm:$0xf0] }
 0x2cf   : > { %v7883_v8 = vld [vmem:[#allocation6 + $0x80c] sm:$0xf]  ;;  %v6733_v14 = vor.u32 %v7885_v13, %v6732_v56  ;;  %v7948_v13 = vld [vmem:[#allocation6 + $0xa0c] sm:$0xf0] }
 0x2d0   : > { %3813 = vmatpush.bf16.msrb.mxu3 %v6529_v59  ;;  %3752 = vmatmul.bf16.vlgmr.msra.gmra.mxu2 %v8878_v20  ;;  %v8913_v35 = vpop.f32.mrf.mxu1  ;;  %v6780_v59 = vld [vmem:[#allocation6 + $0x868] sm:$0xf] }
 0x2d1   : > { %3796 = vmatpush.bf16.msrb.mxu2 %v6845_v51  ;;  %3826 = vmatpush.bf16.msrb.mxu0 %v6657_v26  ;;  %v7093_v51 = vor.u32 %v7976_v34, %v7092_v60  ;;  %v7897_v26 = vld [vmem:[#allocation6 + $0x874] sm:$0xf0]  ;;  %v6753_v34 = vor.u32 %v7887_v17, %v6750_v48  ;;  %v7124_v48 = vld [vmem:[#allocation6 + $0xb20] sm:$0xf] }
 0x2d2   : > { %3835 = vmatpush.bf16.msrb.mxu1 %v6849_v5  ;;  %v7076_v5 = vld [vmem:[#allocation6 + $0xac0] sm:$0xf]  ;;  %v6781_v45 = vor.u32 %v7897_v26, %v6780_v59  ;;  %v7960_v26 = vld [vmem:[#allocation6 + $0xa6c] sm:$0xf0] }
 0x2d3   : > { %3791 = vmatmul.bf16.vlgmr.msra.gmra.mxu1 %v8878_v20  ;;  %v8915_v10 = vpop.f32.mrf.mxu2  ;;  %v7028_v59 = vld [vmem:[#allocation6 + $0xa60] sm:$0xf] }
 0x2d4   : > { %3814 = vmatpush.bf16.msrb.mxu3 %v6513_v28  ;;  %v6764_v28 = vld [vmem:[#allocation6 + $0x848] sm:$0xf]  ;;  %v7029_v4 = vor.u32 %v7960_v26, %v7028_v59  ;;  %v7222_v59 = vld [vmem:[#allocation6 + $0xbf0] sm:$0xf0] }
 0x2d5   : > { %3797 = vmatpush.bf16.msrb.mxu2 %v6829_v58  ;;  %3827 = vmatpush.bf16.msrb.mxu0 %v6641_v44  ;;  %v7077_v58 = vor.u32 %v7972_v52, %v7076_v5  ;;  %v7893_v44 = vld [vmem:[#allocation6 + $0x854] sm:$0xf0]  ;;  %v7942_v5 = vld [vmem:[#allocation6 + $0x9e4] sm:$0xf]  ;;  %v6966_v52 = vld [vmem:[#allocation6 + $0x9f0] sm:$0xf0] }
 0x2d6   : > { %3836 = vmatpush.bf16.msrb.mxu1 %v6833_v37  ;;  %v7060_v37 = vld [vmem:[#allocation6 + $0xaa0] sm:$0xf]  ;;  %v6765_v27 = vor.u32 %v7893_v44, %v6764_v28  ;;  %v7940_v28 = vld [vmem:[#allocation6 + $0x9cc] sm:$0xf0] }
 0x2d7   : > { %v7061_v0 = vor.u32 %v7968_v23, %v7060_v37  ;;  %v7012_v44 = vld [vmem:[#allocation6 + $0xa40] sm:$0xf]  ;;  %v7988_v37 = vld [vmem:[#allocation6 + $0xb4c] sm:$0xf0] }
 0x2d8   : > { %3815 = vmatpush.bf16.msrb.mxu3 %v6497_v21  ;;  %v3000_v32 = vpop.f32.mrf.mxu1  ;;  %v6748_v21 = vld [vmem:[#allocation6 + $0x828] sm:$0xf] }
 0x2d9   : > { %3798 = vmatpush.bf16.msrb.mxu2 %v6813_v54  ;;  %3828 = vmatpush.bf16.msrb.mxu0 %v6625_v29  ;;  %v6769_v54 = vor.u32 %v7891_v11, %v6766_v46  ;;  %v7889_v29 = vld [vmem:[#allocation6 + $0x834] sm:$0xf0]  ;;  %v6969_v11 = vor.u32 %v7942_v5, %v6966_v52  ;;  %v7140_v46 = vld [vmem:[#allocation6 + $0xb40] sm:$0xf]  ;;  %v7938_v32 = vld [vmem:[#allocation6 + $0x9c4] sm:$0xf] }
 0x2da   : > { %3837 = vmatpush.bf16.msrb.mxu1 %v6817_v12  ;;  %v7964_v12 = vld [vmem:[#allocation6 + $0xa8c] sm:$0xf0]  ;;  %v6749_v63 = vor.u32 %v7889_v29, %v6748_v21  ;;  %v6996_v29 = vld [vmem:[#allocation6 + $0xa20] sm:$0xf]  ;;  %v6953_v17 = vor.u32 %v7938_v32, %v6950_v61  ;;  %v7941_v32 = vld [vmem:[#allocation6 + $0x9d4] sm:$0xf0] }
 0x2db   : > { %v2961_v25 = vpop.f32.mrf.mxu2  ;;  %v7936_v21 = vld [vmem:[#allocation6 + $0x9ac] sm:$0xf0] }
 0x2dc   : > { %3816 = vmatpush.bf16.msrb.mxu3 %v6481_v36  ;;  %v6734_v36 = vld [vmem:[#allocation6 + $0x818] sm:$0xf0] }
 0x2dd   : > { %3799 = vmatpush.bf16.msrb.mxu2 %v6797_v38  ;;  %3829 = vmatpush.bf16.msrb.mxu0 %v6609_v42  ;;  %v7045_v38 = vor.u32 %v7964_v12, %v7044_v30  ;;  %v7984_v30 = vld [vmem:[#allocation6 + $0xb2c] sm:$0xf0]  ;;  %v7934_v12 = vld [vmem:[#allocation6 + $0x9a4] sm:$0xf] }
 0x2de   : > { %3838 = vmatpush.bf16.msrb.mxu1 %v6801_v43  ;;  %v6964_v43 = vld [vmem:[#allocation6 + $0x9e0] sm:$0xf]  ;;  %v7125_v25 = vor.u32 %v7984_v30, %v7124_v48  ;;  %v7998_v48 = vld [vmem:[#allocation6 + $0xba4] sm:$0xf] }
 0x2df   : > { %3817 = vmatmul.bf16.vlgmr.msrb.gmra.mxu3 %v8893_v62  ;;  %v7172_v62 = vld [vmem:[#allocation6 + $0xb80] sm:$0xf] }
 0x2e0   : > { %4454 = vmatpush.bf16.msra.mxu3 %v7093_v51  ;;  %3830 = vmatmul.bf16.vlgmr.msrb.gmra.mxu0 %v8878_v20  ;;  %v3037_v20 = vpop.f32.mrf.mxu0  ;;  %v7173_v42 = vor.u32 %v7996_v22, %v7172_v62  ;;  %v7944_v51 = vld [vmem:[#allocation6 + $0x9ec] sm:$0xf0]  ;;  %v6934_v62 = vld [vmem:[#allocation6 + $0x9b0] sm:$0xf0] }
 0x2e1   : > { %4467 = vmatpush.bf16.msra.mxu0 %v7221_v39  ;;  %3800 = vmatpush.bf16.msrb.mxu2 %v6781_v45  ;;  %v8920_v60 = vadd.f32 %v3037_v20, %v8903_v2  ;;  %v7992_v39 = vld [vmem:[#allocation6 + $0xb6c] sm:$0xf0]  ;;  %v6737_v2 = vor.u32 %v7883_v8, %v6734_v36  ;;  %v6965_v16 = vor.u32 %v7944_v51, %v6964_v43  ;;  %v6916_v20 = vld [vmem:[#allocation6 + $0x980] sm:$0xf]  ;;  %v7930_v43 = vld [vmem:[#allocation6 + $0x984] sm:$0xf] }
 0x2e2   : > { %3839 = vmatpush.bf16.msrb.mxu1 %v6785_v19  ;;  %v7157_v45 = vor.u32 %v7992_v39, %v7156_v7  ;;  %v8922_v19 = vpop.f32.mrf.mxu3  ;;  %v6937_v8 = vor.u32 %v7934_v12, %v6934_v62  ;;  %v7108_v36 = vld [vmem:[#allocation6 + $0xb00] sm:$0xf]  ;;  %v6918_v51 = vld [vmem:[#allocation6 + $0x990] sm:$0xf0]  ;;  %v6972_v39 = vld [vmem:[#allocation6 + $0x9e8] sm:$0xf] }
 0x2e3   : > { %v6940_v12 = vld [vmem:[#allocation6 + $0x9a8] sm:$0xf]  ;;  %v7937_v62 = vld [vmem:[#allocation6 + $0x9b4] sm:$0xf0] }
 0x2e4   : > { %4455 = vmatpush.bf16.msra.mxu3 %v7077_v58  ;;  %v6948_v58 = vld [vmem:[#allocation6 + $0x9c0] sm:$0xf] }
 0x2e5   : > { %4468 = vmatpush.bf16.msra.mxu0 %v7205_v40  ;;  %3801 = vmatpush.bf16.msrb.mxu2 %v6765_v27  ;;  %v7956_v40 = vld [vmem:[#allocation6 + $0xa4c] sm:$0xf0]  ;;  %v6949_v49 = vor.u32 %v7940_v28, %v6948_v58  ;;  %v7926_v28 = vld [vmem:[#allocation6 + $0x964] sm:$0xf] }
 0x2e6   : > { %3840 = vmatpush.bf16.msrb.mxu1 %v6769_v54  ;;  %v7013_v27 = vor.u32 %v7956_v40, %v7012_v44  ;;  %v7141_v54 = vor.u32 %v7988_v37, %v7140_v46  ;;  %v7928_v58 = vld [vmem:[#allocation6 + $0x96c] sm:$0xf0]  ;;  %v8002_v40 = vld [vmem:[#allocation6 + $0xbc4] sm:$0xf]  ;;  %v7206_v46 = vld [vmem:[#allocation6 + $0xbd0] sm:$0xf0]  ;;  %v2999_v37 = vadd.f32 %v8913_v35, %v8896_v9 }
 0x2e7   : > { %v7190_v9 = vld [vmem:[#allocation6 + $0xbb0] sm:$0xf0] }
 0x2e8   : > { %4456 = vmatpush.bf16.msra.mxu3 %v7061_v0  ;;  %v3039_v23 = vpop.f32.mrf.mxu0  ;;  %v6932_v0 = vld [vmem:[#allocation6 + $0x9a0] sm:$0xf] }
 0x2e9   : > { %4469 = vmatpush.bf16.msra.mxu0 %v7189_v18  ;;  %3802 = vmatpush.bf16.msrb.mxu2 %v6749_v63  ;;  %v7952_v18 = vld [vmem:[#allocation6 + $0xa2c] sm:$0xf0]  ;;  %v6933_v22 = vor.u32 %v7936_v21, %v6932_v0  ;;  %v6956_v23 = vld [vmem:[#allocation6 + $0x9c8] sm:$0xf]  ;;  %v6884_v0 = vld [vmem:[#allocation6 + $0x940] sm:$0xf] }
 0x2ea   : > { %3841 = vmatpush.bf16.msrb.mxu1 %v6753_v34  ;;  %v6997_v63 = vor.u32 %v7952_v18, %v6996_v29  ;;  %v3026_v56 = vpop.f32.mrf.mxu3  ;;  %v7932_v34 = vld [vmem:[#allocation6 + $0x98c] sm:$0xf0]  ;;  %v7922_v29 = vld [vmem:[#allocation6 + $0x944] sm:$0xf]  ;;  %v6886_v18 = vld [vmem:[#allocation6 + $0x950] sm:$0xf0] }
 0x2eb   : > { %v6917_v7 = vor.u32 %v7932_v34, %v6916_v20  ;;  %v7924_v21 = vld [vmem:[#allocation6 + $0x94c] sm:$0xf0]  ;;  %v6889_v20 = vor.u32 %v7922_v29, %v6886_v18  ;;  %v7918_v34 = vld [vmem:[#allocation6 + $0x924] sm:$0xf]  ;;  %v7142_v29 = vld [vmem:[#allocation6 + $0xb50] sm:$0xf0] }
 0x2ec   : > { %4457 = vmatpush.bf16.msra.mxu3 %v7045_v38  ;;  %v6980_v38 = vld [vmem:[#allocation6 + $0xa00] sm:$0xf]  ;;  %v7920_v56 = vld [vmem:[#allocation6 + $0x92c] sm:$0xf0]  ;;  %v7925_v18 = vld [vmem:[#allocation6 + $0x954] sm:$0xf0] }
 0x2ed   : > { %4470 = vmatpush.bf16.msra.mxu0 %v7173_v42  ;;  %3803 = vmatpush.bf16.msrb.mxu2 %v6733_v14  ;;  %v7980_v42 = vld [vmem:[#allocation6 + $0xb0c] sm:$0xf0]  ;;  %v7945_v14 = vld [vmem:[#allocation6 + $0x9f4] sm:$0xf0]  ;;  %v6981_v52 = vor.u32 %v7948_v13, %v6980_v38  ;;  %v6941_v38 = vor.u32 %v7937_v62, %v6940_v12  ;;  %v6870_v13 = vld [vmem:[#allocation6 + $0x930] sm:$0xf0] }
 0x2ee   : > { %3842 = vmatpush.bf16.msrb.mxu1 %v6737_v2  ;;  %v7109_v2 = vor.u32 %v7980_v42, %v7108_v36  ;;  %v6973_v44 = vor.u32 %v7945_v14, %v6972_v39  ;;  %v7174_v36 = vld [vmem:[#allocation6 + $0xb90] sm:$0xf0]  ;;  %v6924_v42 = vld [vmem:[#allocation6 + $0x988] sm:$0xf]  ;;  %v7916_v39 = vld [vmem:[#allocation6 + $0x90c] sm:$0xf0] }
 0x2ef   : > { %v7914_v14 = vld [vmem:[#allocation6 + $0x904] sm:$0xf] }
 0x2f0   : > { %4458 = vmatpush.bf16.msra.mxu3 %v7029_v4  ;;  %3804 = vmatmul.bf16.vlgmr.msrb.gmra.mxu2 %v8881_v57  ;;  %v3050_v26 = vpop.f32.mrf.mxu1 }
 0x2f1   : > { %4441 = vmatpush.bf16.msra.mxu2 %v6965_v16  ;;  %4471 = vmatpush.bf16.msra.mxu0 %v7157_v45  ;;  %v8927_v5 = vadd.f32 %v3050_v26, %v8920_v60  ;;  %v6921_v16 = vor.u32 %v7930_v43, %v6918_v51  ;;  %v6900_v45 = vld [vmem:[#allocation6 + $0x960] sm:$0xf]  ;;  %v6873_v26 = vor.u32 %v7918_v34, %v6870_v13  ;;  %v7126_v34 = vld [vmem:[#allocation6 + $0xb30] sm:$0xf0]  ;;  %v7921_v13 = vld [vmem:[#allocation6 + $0x934] sm:$0xf0] }
 0x2f2   : > { %4480 = vmatpush.bf16.msra.mxu1 %v6969_v11  ;;  %v6902_v11 = vld [vmem:[#allocation6 + $0x970] sm:$0xf0]  ;;  %v6901_v60 = vor.u32 %v7928_v58, %v6900_v45  ;;  %v7990_v45 = vld [vmem:[#allocation6 + $0xb64] sm:$0xf] }
 0x2f3   : > { %3843 = vmatmul.bf16.vlgmr.msrb.gmra.mxu1 %v8881_v57  ;;  %v8006_v57 = vld [vmem:[#allocation6 + $0xbe4] sm:$0xf]  ;;  %v3011_v61 = vpop.f32.mrf.mxu2  ;;  %v7158_v58 = vld [vmem:[#allocation6 + $0xb70] sm:$0xf0] }
 0x2f4   : > { %4459 = vmatpush.bf16.msra.mxu3 %v7013_v27  ;;  %v7225_v4 = vor.u32 %v8006_v57, %v7222_v59  ;;  %v3012_v27 = vadd.f32 %v3011_v61, %v2999_v37  ;;  %v6852_v59 = vld [vmem:[#allocation6 + $0x900] sm:$0xf] }
 0x2f5   : > { %4442 = vmatpush.bf16.msra.mxu2 %v6949_v49  ;;  %4472 = vmatpush.bf16.msra.mxu0 %v7141_v54  ;;  %v6905_v49 = vor.u32 %v7926_v28, %v6902_v11  ;;  %v7209_v54 = vor.u32 %v8002_v40, %v7206_v46  ;;  %v6908_v28 = vld [vmem:[#allocation6 + $0x968] sm:$0xf]  ;;  %v6853_v11 = vor.u32 %v7916_v39, %v6852_v59  ;;  %v7977_v46 = vld [vmem:[#allocation6 + $0xaf4] sm:$0xf0]  ;;  %v7046_v59 = vld [vmem:[#allocation6 + $0xa90] sm:$0xf0] }
 0x2f6   : > { %4481 = vmatpush.bf16.msra.mxu1 %v6953_v17  ;;  %v6957_v17 = vor.u32 %v7941_v32, %v6956_v23  ;;  %v8934_v35 = vadd.f32 %v8922_v19, %v3012_v27  ;;  %v7933_v19 = vld [vmem:[#allocation6 + $0x994] sm:$0xf0]  ;;  %v7100_v40 = vld [vmem:[#allocation6 + $0xae8] sm:$0xf]  ;;  %v7161_v32 = vor.u32 %v7990_v45, %v7158_v58  ;;  %v7078_v27 = vld [vmem:[#allocation6 + $0xad0] sm:$0xf0] }
 0x2f7   : > { %v6974_v45 = vld [vmem:[#allocation6 + $0x9f8] sm:$0xf0] }
 0x2f8   : > { %4460 = vmatpush.bf16.msra.mxu3 %v6997_v63  ;;  %v3052_v30 = vpop.f32.mrf.mxu1  ;;  %v7193_v63 = vor.u32 %v7998_v48, %v7190_v9  ;;  %v7084_v9 = vld [vmem:[#allocation6 + $0xac8] sm:$0xf] }
 0x2f9   : > { %4443 = vmatpush.bf16.msra.mxu2 %v6933_v22  ;;  %4473 = vmatpush.bf16.msra.mxu0 %v7125_v25  ;;  %v6885_v22 = vor.u32 %v7924_v21, %v6884_v0  ;;  %v6868_v25 = vld [vmem:[#allocation6 + $0x920] sm:$0xf]  ;;  %v7101_v0 = vor.u32 %v7977_v46, %v7100_v40  ;;  %v7973_v30 = vld [vmem:[#allocation6 + $0xad4] sm:$0xf0] }
 0x2fa   : > { %4482 = vmatpush.bf16.msra.mxu1 %v6937_v8  ;;  %v7994_v8 = vld [vmem:[#allocation6 + $0xb84] sm:$0xf]  ;;  %v6869_v51 = vor.u32 %v7920_v56, %v6868_v25  ;;  %v7062_v25 = vld [vmem:[#allocation6 + $0xab0] sm:$0xf0] }
 0x2fb   : > { %v3013_v57 = vpop.f32.mrf.mxu2  ;;  %v7982_v56 = vld [vmem:[#allocation6 + $0xb24] sm:$0xf] }
 0x2fc   : > { %4461 = vmatpush.bf16.msra.mxu3 %v6981_v52  ;;  %v6854_v52 = vld [vmem:[#allocation6 + $0x910] sm:$0xf0] }
 0x2fd   : > { %4444 = vmatpush.bf16.msra.mxu2 %v6917_v7  ;;  %4474 = vmatpush.bf16.msra.mxu0 %v7109_v2  ;;  %v3089_v43 = vpop.f32.mrf.mxu0  ;;  %v7177_v7 = vor.u32 %v7994_v8, %v7174_v36  ;;  %v6925_v2 = vor.u32 %v7933_v19, %v6924_v42  ;;  %v6857_v37 = vor.u32 %v7914_v14, %v6854_v52  ;;  %v7068_v8 = vld [vmem:[#allocation6 + $0xaa8] sm:$0xf]  ;;  %v7969_v36 = vld [vmem:[#allocation6 + $0xab4] sm:$0xf0]  ;;  %v7962_v19 = vld [vmem:[#allocation6 + $0xa84] sm:$0xf] }
 0x2fe   : > { %4483 = vmatpush.bf16.msra.mxu1 %v6921_v16  ;;  %v7974_v16 = vld [vmem:[#allocation6 + $0xae4] sm:$0xf]  ;;  %v7069_v39 = vor.u32 %v7969_v36, %v7068_v8  ;;  %v6860_v14 = vld [vmem:[#allocation6 + $0x908] sm:$0xf]  ;;  %v7917_v52 = vld [vmem:[#allocation6 + $0x914] sm:$0xf0] }
 0x2ff   : > { %4462 = vmatmul.bf16.vlgmr.msra.gmra.mxu3 %v8811_v53 }
 0x300   : > { %4506 = vmatpush.bf16.msrb.mxu3 %v7225_v4  ;;  %4475 = vmatmul.bf16.vlgmr.msra.gmra.mxu0 %v8815_v50  ;;  %v7094_v4 = vld [vmem:[#allocation6 + $0xaf0] sm:$0xf0] }
 0x301   : > { %4519 = vmatpush.bf16.msrb.mxu0 %v6973_v44  ;;  %4445 = vmatpush.bf16.msra.mxu2 %v6901_v60  ;;  %v7929_v44 = vld [vmem:[#allocation6 + $0x974] sm:$0xf0]  ;;  %v7097_v23 = vor.u32 %v7974_v16, %v7094_v4  ;;  %v7943_v4 = vld [vmem:[#allocation6 + $0x9ec] sm:$0xf] }
 0x302   : > { %4484 = vmatpush.bf16.msra.mxu1 %v6905_v49  ;;  %v6909_v60 = vor.u32 %v7929_v44, %v6908_v28  ;;  %v3076_v61 = vpop.f32.mrf.mxu3  ;;  %v7970_v49 = vld [vmem:[#allocation6 + $0xac4] sm:$0xf]  ;;  %v7965_v16 = vld [vmem:[#allocation6 + $0xa94] sm:$0xf0]  ;;  %v7049_v28 = vor.u32 %v7962_v19, %v7046_v59  ;;  %v7975_v44 = vld [vmem:[#allocation6 + $0xaec] sm:$0xf] }
 0x303   : > { %v3077_v21 = vadd.f32 %v3076_v61, %v8900_v15  ;;  %v7081_v12 = vor.u32 %v7970_v49, %v7078_v27  ;;  %v7085_v15 = vor.u32 %v7973_v30, %v7084_v9  ;;  %v7030_v61 = vld [vmem:[#allocation6 + $0xa70] sm:$0xf0]  ;;  %v7036_v49 = vld [vmem:[#allocation6 + $0xa68] sm:$0xf]  ;;  %v7931_v59 = vld [vmem:[#allocation6 + $0x98c] sm:$0xf] }
 0x304   : > { %4507 = vmatpush.bf16.msrb.mxu3 %v7209_v54  ;;  %v7986_v54 = vld [vmem:[#allocation6 + $0xb44] sm:$0xf]  ;;  %v6998_v19 = vld [vmem:[#allocation6 + $0xa30] sm:$0xf0] }
 0x305   : > { %4520 = vmatpush.bf16.msrb.mxu0 %v6957_v17  ;;  %4446 = vmatpush.bf16.msra.mxu2 %v6885_v22  ;;  %v6892_v17 = vld [vmem:[#allocation6 + $0x948] sm:$0xf]  ;;  %v3091_v48 = vpop.f32.mrf.mxu0  ;;  %v3090_v62 = vadd.f32 %v3089_v43, %v3077_v21  ;;  %v7145_v22 = vor.u32 %v7986_v54, %v7142_v29  ;;  %v7129_v43 = vor.u32 %v7982_v56, %v7126_v34  ;;  %v7961_v54 = vld [vmem:[#allocation6 + $0xa74] sm:$0xf0]  ;;  %v6958_v21 = vld [vmem:[#allocation6 + $0x9d8] sm:$0xf0] }
 0x306   : > { %4485 = vmatpush.bf16.msra.mxu1 %v6889_v20  ;;  %v6893_v20 = vor.u32 %v7925_v18, %v6892_v17  ;;  %v7971_v29 = vld [vmem:[#allocation6 + $0xacc] sm:$0xf]  ;;  %v7086_v17 = vld [vmem:[#allocation6 + $0xad8] sm:$0xf0]  ;;  %v7037_v9 = vor.u32 %v7961_v54, %v7036_v49 }
 0x307   : > { %v7935_v56 = vld [vmem:[#allocation6 + $0x9ac] sm:$0xf]  ;;  %v7230_v54 = vld [vmem:[#allocation6 + $0xbf8] sm:$0xf0] }
 0x308   : > { %4508 = vmatpush.bf16.msrb.mxu3 %v7193_v63  ;;  %v7966_v63 = vld [vmem:[#allocation6 + $0xaa4] sm:$0xf] }
 0x309   : > { %4521 = vmatpush.bf16.msrb.mxu0 %v6941_v38  ;;  %4447 = vmatpush.bf16.msra.mxu2 %v6869_v51  ;;  %v6876_v38 = vld [vmem:[#allocation6 + $0x928] sm:$0xf]  ;;  %v7065_v42 = vor.u32 %v7966_v63, %v7062_v25  ;;  %v7089_v63 = vor.u32 %v7971_v29, %v7086_v17  ;;  %v7957_v25 = vld [vmem:[#allocation6 + $0xa54] sm:$0xf0] }
 0x30a   : > { %4486 = vmatpush.bf16.msra.mxu1 %v6873_v26  ;;  %v6877_v51 = vor.u32 %v7921_v13, %v6876_v38  ;;  %v3078_v57 = vpop.f32.mrf.mxu3  ;;  %v7978_v26 = vld [vmem:[#allocation6 + $0xb04] sm:$0xf]  ;;  %v7967_v38 = vld [vmem:[#allocation6 + $0xaac] sm:$0xf]  ;;  %v7070_v13 = vld [vmem:[#allocation6 + $0xab8] sm:$0xf0] }
 0x30b   : > { %v7953_v57 = vld [vmem:[#allocation6 + $0xa34] sm:$0xf0] }
 0x30c   : > { %4509 = vmatpush.bf16.msrb.mxu3 %v7177_v7  ;;  %v7110_v7 = vld [vmem:[#allocation6 + $0xb10] sm:$0xf0] }
 0x30d   : > { %4522 = vmatpush.bf16.msrb.mxu0 %v6925_v2  ;;  %4448 = vmatpush.bf16.msra.mxu2 %v6853_v11  ;;  %v7052_v2 = vld [vmem:[#allocation6 + $0xa88] sm:$0xf]  ;;  %v7102_v11 = vld [vmem:[#allocation6 + $0xaf8] sm:$0xf0]  ;;  %v7113_v46 = vor.u32 %v7978_v26, %v7110_v7  ;;  %v7963_v7 = vld [vmem:[#allocation6 + $0xa8c] sm:$0xf] }
 0x30e   : > { %4487 = vmatpush.bf16.msra.mxu1 %v6857_v37  ;;  %v6861_v37 = vor.u32 %v7917_v52, %v6860_v14  ;;  %v7105_v27 = vor.u32 %v7975_v44, %v7102_v11  ;;  %v6926_v26 = vld [vmem:[#allocation6 + $0x998] sm:$0xf0]  ;;  %v7949_v44 = vld [vmem:[#allocation6 + $0xa14] sm:$0xf0] }
 0x310   : > { %4510 = vmatpush.bf16.msrb.mxu3 %v7161_v32  ;;  %4449 = vmatmul.bf16.vlgmr.msra.gmra.mxu2 %v8830_v6  ;;  %v3102_v58 = vpop.f32.mrf.mxu1  ;;  %v6977_v32 = vor.u32 %v7943_v4, %v6974_v45  ;;  %v6929_v45 = vor.u32 %v7931_v59, %v6926_v26  ;;  %v7198_v59 = vld [vmem:[#allocation6 + $0xbb8] sm:$0xf0] }
 0x311   : > { %4493 = vmatpush.bf16.msrb.mxu2 %v7097_v23  ;;  %4523 = vmatpush.bf16.msrb.mxu0 %v6909_v60  ;;  %v8939_v40 = vadd.f32 %v3102_v58, %v3090_v62  ;;  %v7053_v23 = vor.u32 %v7965_v16, %v7052_v2  ;;  %v7958_v60 = vld [vmem:[#allocation6 + $0xa64] sm:$0xf]  ;;  %v6982_v58 = vld [vmem:[#allocation6 + $0xa10] sm:$0xf0] }
 0x312   : > { %4532 = vmatpush.bf16.msrb.mxu1 %v7101_v0  ;;  %v7939_v0 = vld [vmem:[#allocation6 + $0x9cc] sm:$0xf]  ;;  %v7033_v18 = vor.u32 %v7958_v60, %v7030_v61  ;;  %v7954_v62 = vld [vmem:[#allocation6 + $0xa44] sm:$0xf]  ;;  %v7038_v61 = vld [vmem:[#allocation6 + $0xa78] sm:$0xf0] }
 0x313   : > { %4488 = vmatmul.bf16.vlgmr.msra.gmra.mxu1 %v8830_v6  ;;  %v3063_v48 = vpop.f32.mrf.mxu2  ;;  %v7946_v16 = vld [vmem:[#allocation6 + $0xa04] sm:$0xf]  ;;  %v7959_v60 = vld [vmem:[#allocation6 + $0xa6c] sm:$0xf] }
 0x314   : > { %4511 = vmatpush.bf16.msrb.mxu3 %v7145_v22  ;;  %v8942_v30 = vadd.f32 %v3063_v48, %v8927_v5  ;;  %v7014_v22 = vld [vmem:[#allocation6 + $0xa50] sm:$0xf0]  ;;  %v6985_v49 = vor.u32 %v7946_v16, %v6982_v58  ;;  %v7041_v17 = vor.u32 %v7959_v60, %v7038_v61  ;;  %v7212_v48 = vld [vmem:[#allocation6 + $0xbc8] sm:$0xf]  ;;  %v7997_v16 = vld [vmem:[#allocation6 + $0xb94] sm:$0xf0] }
 0x315   : > { %4494 = vmatpush.bf16.msrb.mxu2 %v7081_v12  ;;  %4524 = vmatpush.bf16.msrb.mxu0 %v6893_v20  ;;  %v6961_v12 = vor.u32 %v7939_v0, %v6958_v21  ;;  %v7020_v20 = vld [vmem:[#allocation6 + $0xa48] sm:$0xf]  ;;  %v7017_v8 = vor.u32 %v7954_v62, %v7014_v22  ;;  %v6894_v22 = vld [vmem:[#allocation6 + $0x958] sm:$0xf0] }
 0x316   : > { %4533 = vmatpush.bf16.msrb.mxu1 %v7085_v15  ;;  %v6942_v15 = vld [vmem:[#allocation6 + $0x9b8] sm:$0xf0]  ;;  %v7021_v5 = vor.u32 %v7957_v25, %v7020_v20  ;;  %v7955_v20 = vld [vmem:[#allocation6 + $0xa4c] sm:$0xf] }
 0x317   : > { %v6945_v36 = vor.u32 %v7935_v56, %v6942_v15  ;;  %v8003_v56 = vld [vmem:[#allocation6 + $0xbcc] sm:$0xf]  ;;  %v7214_v15 = vld [vmem:[#allocation6 + $0xbd8] sm:$0xf0] }
 0x318   : > { %4512 = vmatpush.bf16.msrb.mxu3 %v7129_v43  ;;  %v3104_v34 = vpop.f32.mrf.mxu1  ;;  %v7004_v43 = vld [vmem:[#allocation6 + $0xa28] sm:$0xf] }
 0x319   : > { %4495 = vmatpush.bf16.msrb.mxu2 %v7065_v42  ;;  %4525 = vmatpush.bf16.msrb.mxu0 %v6877_v51  ;;  %v7950_v42 = vld [vmem:[#allocation6 + $0xa24] sm:$0xf]  ;;  %v7073_v51 = vor.u32 %v7967_v38, %v7070_v13  ;;  %v7005_v4 = vor.u32 %v7953_v57, %v7004_v43  ;;  %v7951_v43 = vld [vmem:[#allocation6 + $0xa2c] sm:$0xf] }
 0x31a   : > { %4534 = vmatpush.bf16.msrb.mxu1 %v7069_v39  ;;  %v7054_v39 = vld [vmem:[#allocation6 + $0xa98] sm:$0xf0]  ;;  %v7001_v52 = vor.u32 %v7950_v42, %v6998_v19  ;;  %v7217_v42 = vor.u32 %v8003_v56, %v7214_v15  ;;  %v7999_v57 = vld [vmem:[#allocation6 + $0xbac] sm:$0xf] }
 0x31b   : > { %v3065_v2 = vpop.f32.mrf.mxu2  ;;  %v7057_v11 = vor.u32 %v7963_v7, %v7054_v39  ;;  %v6878_v19 = vld [vmem:[#allocation6 + $0x938] sm:$0xf0]  ;;  %v7180_v7 = vld [vmem:[#allocation6 + $0xb88] sm:$0xf]  ;;  %v7201_v58 = vor.u32 %v7999_v57, %v7198_v59  ;;  %v7572_v59 = vld [vmem:[#allocation6 + $0xea0] sm:$0xf] }
 0x31c   : > { %4513 = vmatpush.bf16.msrb.mxu3 %v7113_v46  ;;  %v7228_v46 = vld [vmem:[#allocation6 + $0xbe8] sm:$0xf]  ;;  %v7181_v61 = vor.u32 %v7997_v16, %v7180_v7  ;;  %v7985_v16 = vld [vmem:[#allocation6 + $0xb34] sm:$0xf0] }
 0x31d   : > { %4496 = vmatpush.bf16.msrb.mxu2 %v7049_v28  ;;  %4526 = vmatpush.bf16.msrb.mxu0 %v6861_v37  ;;  %v8946_v14 = vpop.f32.mrf.mxu0  ;;  %v6988_v28 = vld [vmem:[#allocation6 + $0xa08] sm:$0xf]  ;;  %v8009_v37 = vld [vmem:[#allocation6 + $0xbf4] sm:$0xf0] }
 0x31e   : > { %4535 = vmatpush.bf16.msrb.mxu1 %v7053_v23  ;;  %v7927_v23 = vld [vmem:[#allocation6 + $0x96c] sm:$0xf]  ;;  %v6989_v0 = vor.u32 %v7949_v44, %v6988_v28  ;;  %v7229_v21 = vor.u32 %v8009_v37, %v7228_v46  ;;  %v6990_v44 = vld [vmem:[#allocation6 + $0xa18] sm:$0xf0]  ;;  %v7476_v37 = vld [vmem:[#allocation6 + $0xde0] sm:$0xf] }
 0x31f   : > { %4514 = vmatmul.bf16.vlgmr.msrb.gmra.mxu3 %v8815_v50  ;;  %v7947_v28 = vld [vmem:[#allocation6 + $0xa0c] sm:$0xf]  ;;  %v7182_v46 = vld [vmem:[#allocation6 + $0xb98] sm:$0xf0] }
 0x320   : > { %4558 = vmatpush.bf16.msra.mxu3 %v6977_v32  ;;  %4527 = vmatmul.bf16.vlgmr.msrb.gmra.mxu0 %v8830_v6  ;;  %v6910_v32 = vld [vmem:[#allocation6 + $0x978] sm:$0xf0] }
 0x321   : > { %4571 = vmatpush.bf16.msra.mxu0 %v7105_v27  ;;  %4497 = vmatpush.bf16.msrb.mxu2 %v7033_v18  ;;  %v8007_v27 = vld [vmem:[#allocation6 + $0xbec] sm:$0xf]  ;;  %v6913_v29 = vor.u32 %v7927_v23, %v6910_v32  ;;  %v8072_v23 = vld [vmem:[#allocation6 + $0xdec] sm:$0xf0]  ;;  %v2960_v32 = vadd.f32 %v8915_v10, %v8884_v41 }
 0x322   : > { %4536 = vmatpush.bf16.msrb.mxu1 %v7037_v9  ;;  %v8948_v18 = vpop.f32.mrf.mxu3  ;;  %v8005_v9 = vld [vmem:[#allocation6 + $0xbd4] sm:$0xf0]  ;;  %v7233_v62 = vor.u32 %v8007_v27, %v7230_v54  ;;  %v8104_v27 = vld [vmem:[#allocation6 + $0xeec] sm:$0xf0] }
 0x323   : > { %v7213_v34 = vor.u32 %v8005_v9, %v7212_v48  ;;  %v7993_v48 = vld [vmem:[#allocation6 + $0xb74] sm:$0xf0]  ;;  %v7991_v9 = vld [vmem:[#allocation6 + $0xb6c] sm:$0xf]  ;;  %v8068_v41 = vld [vmem:[#allocation6 + $0xdcc] sm:$0xf0]  ;;  %v2973_v10 = vadd.f32 %v8909_v33, %v2960_v32 }
 0x324   : > { %4559 = vmatpush.bf16.msra.mxu3 %v6961_v12  ;;  %v7923_v12 = vld [vmem:[#allocation6 + $0x94c] sm:$0xf]  ;;  %v7444_v33 = vld [vmem:[#allocation6 + $0xda0] sm:$0xf]  ;;  %v7981_v32 = vld [vmem:[#allocation6 + $0xb14] sm:$0xf0] }
 0x325   : > { %4572 = vmatpush.bf16.msra.mxu0 %v7089_v63  ;;  %4498 = vmatpush.bf16.msrb.mxu2 %v7017_v8  ;;  %v7022_v63 = vld [vmem:[#allocation6 + $0xa58] sm:$0xf0]  ;;  %v3729_v25 = vpop.f32.mrf.mxu0  ;;  %v6897_v38 = vor.u32 %v7923_v12, %v6894_v22  ;;  %v7196_v8 = vld [vmem:[#allocation6 + $0xba8] sm:$0xf]  ;;  %v7460_v22 = vld [vmem:[#allocation6 + $0xdc0] sm:$0xf] }
 0x326   : > { %4537 = vmatpush.bf16.msrb.mxu1 %v7021_v5  ;;  %v7025_v13 = vor.u32 %v7955_v20, %v7022_v63  ;;  %v8001_v5 = vld [vmem:[#allocation6 + $0xbb4] sm:$0xf0]  ;;  %v7588_v20 = vld [vmem:[#allocation6 + $0xec0] sm:$0xf]  ;;  %v8100_v63 = vld [vmem:[#allocation6 + $0xecc] sm:$0xf0] }
 0x327   : > { %v7197_v26 = vor.u32 %v8001_v5, %v7196_v8  ;;  %v7989_v8 = vld [vmem:[#allocation6 + $0xb54] sm:$0xf0]  ;;  %v7987_v5 = vld [vmem:[#allocation6 + $0xb4c] sm:$0xf] }
 0x328   : > { %4560 = vmatpush.bf16.msra.mxu3 %v6945_v36  ;;  %v7919_v36 = vld [vmem:[#allocation6 + $0x92c] sm:$0xf] }
 0x329   : > { %4573 = vmatpush.bf16.msra.mxu0 %v7073_v51  ;;  %4499 = vmatpush.bf16.msrb.mxu2 %v7001_v52  ;;  %v7006_v51 = vld [vmem:[#allocation6 + $0xa38] sm:$0xf0]  ;;  %v6881_v39 = vor.u32 %v7919_v36, %v6878_v19  ;;  %v7589_v36 = vor.u32 %v8100_v63, %v7588_v20  ;;  %v8064_v19 = vld [vmem:[#allocation6 + $0xdac] sm:$0xf0] }
 0x32a   : > { %4538 = vmatpush.bf16.msrb.mxu1 %v7005_v4  ;;  %v7009_v52 = vor.u32 %v7951_v43, %v7006_v51  ;;  %v3716_v2 = vpop.f32.mrf.mxu3  ;;  %v7915_v4 = vld [vmem:[#allocation6 + $0x90c] sm:$0xf]  ;;  %v2986_v43 = vadd.f32 %v8907_v24, %v2973_v10 }
 0x32b   : > { %v7132_v2 = vld [vmem:[#allocation6 + $0xb28] sm:$0xf]  ;;  %v7983_v24 = vld [vmem:[#allocation6 + $0xb2c] sm:$0xf] }
 0x32c   : > { %4561 = vmatpush.bf16.msra.mxu3 %v6929_v45  ;;  %v6862_v45 = vld [vmem:[#allocation6 + $0x918] sm:$0xf0] }
 0x32d   : > { %4574 = vmatpush.bf16.msra.mxu0 %v7057_v11  ;;  %4500 = vmatpush.bf16.msrb.mxu2 %v6985_v49  ;;  %v7995_v11 = vld [vmem:[#allocation6 + $0xb8c] sm:$0xf]  ;;  %v7604_v49 = vld [vmem:[#allocation6 + $0xee0] sm:$0xf]  ;;  %v6865_v54 = vor.u32 %v7915_v4, %v6862_v45  ;;  %v7134_v4 = vld [vmem:[#allocation6 + $0xb38] sm:$0xf0] }
 0x32e   : > { %4539 = vmatpush.bf16.msrb.mxu1 %v6989_v0  ;;  %v6993_v0 = vor.u32 %v7947_v28, %v6990_v44  ;;  %v7605_v12 = vor.u32 %v8104_v27, %v7604_v49  ;;  %v8060_v45 = vld [vmem:[#allocation6 + $0xd8c] sm:$0xf0]  ;;  %v7133_v44 = vor.u32 %v7985_v16, %v7132_v2  ;;  %v7118_v49 = vld [vmem:[#allocation6 + $0xb18] sm:$0xf0]  ;;  %v8030_v2 = vld [vmem:[#allocation6 + $0xca4] sm:$0xf] }
 0x32f   : > { %v7318_v16 = vld [vmem:[#allocation6 + $0xcb0] sm:$0xf0] }
 0x330   : > { %4562 = vmatpush.bf16.msra.mxu3 %v6913_v29  ;;  %4501 = vmatmul.bf16.vlgmr.msrb.gmra.mxu2 %v8811_v53  ;;  %v8954_v60 = vpop.f32.mrf.mxu1  ;;  %v7477_v29 = vor.u32 %v8072_v23, %v7476_v37  ;;  %v7137_v37 = vor.u32 %v7983_v24, %v7134_v4 }
 0x331   : > { %4545 = vmatpush.bf16.msra.mxu2 %v7229_v21  ;;  %4575 = vmatpush.bf16.msra.mxu0 %v7041_v17  ;;  %v7185_v21 = vor.u32 %v7995_v11, %v7182_v46  ;;  %v7164_v17 = vld [vmem:[#allocation6 + $0xb68] sm:$0xf] }
 0x332   : > { %4584 = vmatpush.bf16.msra.mxu1 %v7233_v62  ;;  %v7166_v62 = vld [vmem:[#allocation6 + $0xb78] sm:$0xf0]  ;;  %v7165_v25 = vor.u32 %v7993_v48, %v7164_v17  ;;  %v7116_v46 = vld [vmem:[#allocation6 + $0xb08] sm:$0xf]  ;;  %v7540_v17 = vld [vmem:[#allocation6 + $0xe60] sm:$0xf] }
 0x333   : > { %4540 = vmatmul.bf16.vlgmr.msrb.gmra.mxu1 %v8811_v53  ;;  %v3701_v56 = vpop.f32.mrf.mxu2  ;;  %v7169_v15 = vor.u32 %v7991_v9, %v7166_v62  ;;  %v8088_v48 = vld [vmem:[#allocation6 + $0xe6c] sm:$0xf0]  ;;  %v7117_v9 = vor.u32 %v7981_v32, %v7116_v46  ;;  %v7350_v62 = vld [vmem:[#allocation6 + $0xcf0] sm:$0xf0]  ;;  %v7492_v46 = vld [vmem:[#allocation6 + $0xe00] sm:$0xf] }
 0x334   : > { %4563 = vmatpush.bf16.msra.mxu3 %v6897_v38  ;;  %v7461_v38 = vor.u32 %v8068_v41, %v7460_v22  ;;  %v7541_v20 = vor.u32 %v8088_v48, %v7540_v17  ;;  %v7302_v32 = vld [vmem:[#allocation6 + $0xc90] sm:$0xf0] }
 0x335   : > { %4546 = vmatpush.bf16.msra.mxu2 %v7213_v34  ;;  %4576 = vmatpush.bf16.msra.mxu0 %v7025_v13  ;;  %v3715_v34 = vadd.f32 %v8948_v18, %v3701_v56  ;;  %v7148_v13 = vld [vmem:[#allocation6 + $0xb48] sm:$0xf]  ;;  %v8096_v18 = vld [vmem:[#allocation6 + $0xeac] sm:$0xf0] }
 0x336   : > { %4585 = vmatpush.bf16.msra.mxu1 %v7217_v42  ;;  %v7150_v42 = vld [vmem:[#allocation6 + $0xb58] sm:$0xf0]  ;;  %v8036_v56 = vld [vmem:[#allocation6 + $0xccc] sm:$0xf0] }
 0x337   : > { %v3728_v51 = vadd.f32 %v8946_v14, %v3715_v34  ;;  %v7556_v14 = vld [vmem:[#allocation6 + $0xe80] sm:$0xf] }
 0x338   : > { %4564 = vmatpush.bf16.msra.mxu3 %v6881_v39  ;;  %v3742_v57 = vpop.f32.mrf.mxu1  ;;  %v7153_v39 = vor.u32 %v7987_v5, %v7150_v42  ;;  %v7334_v42 = vld [vmem:[#allocation6 + $0xcd0] sm:$0xf0] }
 0x339   : > { %4547 = vmatpush.bf16.msra.mxu2 %v7197_v26  ;;  %4577 = vmatpush.bf16.msra.mxu0 %v7009_v52  ;;  %v7149_v26 = vor.u32 %v7989_v8, %v7148_v13  ;;  %v8962_v7 = vadd.f32 %v3728_v51, %v2986_v43  ;;  %v7445_v52 = vor.u32 %v8064_v19, %v7444_v33  ;;  %v7524_v13 = vld [vmem:[#allocation6 + $0xe40] sm:$0xf]  ;;  %v8084_v8 = vld [vmem:[#allocation6 + $0xe4c] sm:$0xf0] }
 0x33a   : > { %4586 = vmatpush.bf16.msra.mxu1 %v7201_v58  ;;  %v8092_v58 = vld [vmem:[#allocation6 + $0xe8c] sm:$0xf0]  ;;  %v7525_v43 = vor.u32 %v8084_v8, %v7524_v13  ;;  %v7316_v51 = vld [vmem:[#allocation6 + $0xca0] sm:$0xf] }
 0x33b   : > { %v3703_v11 = vpop.f32.mrf.mxu2  ;;  %v7557_v27 = vor.u32 %v8092_v58, %v7556_v14  ;;  %v8032_v57 = vld [vmem:[#allocation6 + $0xcac] sm:$0xf0]  ;;  %v7364_v58 = vld [vmem:[#allocation6 + $0xd00] sm:$0xf] }
 0x33c   : > { %4565 = vmatpush.bf16.msra.mxu3 %v6865_v54  ;;  %v7348_v54 = vld [vmem:[#allocation6 + $0xce0] sm:$0xf]  ;;  %v7317_v24 = vor.u32 %v8032_v57, %v7316_v51  ;;  %v8028_v14 = vld [vmem:[#allocation6 + $0xc8c] sm:$0xf0]  ;;  %v7321_v11 = vor.u32 %v8030_v2, %v7318_v16  ;;  %v8094_v51 = vld [vmem:[#allocation6 + $0xea4] sm:$0xf] }
 0x33d   : > { %4548 = vmatpush.bf16.msra.mxu2 %v7181_v61  ;;  %4578 = vmatpush.bf16.msra.mxu0 %v6993_v0  ;;  %v8964_v28 = vpop.f32.mrf.mxu0  ;;  %v7979_v61 = vld [vmem:[#allocation6 + $0xb0c] sm:$0xf]  ;;  %v8040_v0 = vld [vmem:[#allocation6 + $0xcec] sm:$0xf0]  ;;  %v7574_v57 = vld [vmem:[#allocation6 + $0xeb0] sm:$0xf0] }
 0x33e   : > { %4587 = vmatpush.bf16.msra.mxu1 %v7185_v21  ;;  %v7412_v21 = vld [vmem:[#allocation6 + $0xd60] sm:$0xf]  ;;  %v7121_v22 = vor.u32 %v7979_v61, %v7118_v49  ;;  %v7349_v41 = vor.u32 %v8040_v0, %v7348_v54  ;;  %v7606_v61 = vld [vmem:[#allocation6 + $0xef0] sm:$0xf0]  ;;  %v7356_v54 = vld [vmem:[#allocation6 + $0xce8] sm:$0xf]  ;;  %v7577_v2 = vor.u32 %v8094_v51, %v7574_v57 }
 0x33f   : > { %4566 = vmatmul.bf16.vlgmr.msra.gmra.mxu3 %v8830_v6  ;;  %v7573_v6 = vor.u32 %v8096_v18, %v7572_v59  ;;  %v7380_v59 = vld [vmem:[#allocation6 + $0xd20] sm:$0xf]  ;;  %v8041_v0 = vld [vmem:[#allocation6 + $0xcf4] sm:$0xf0] }
 0x340   : > { %5197 = vmatpush.bf16.msrb.mxu3 %v7477_v29  ;;  %4579 = vmatmul.bf16.vlgmr.msra.gmra.mxu0 %v8811_v53  ;;  %v7428_v53 = vld [vmem:[#allocation6 + $0xd80] sm:$0xf]  ;;  %v8056_v29 = vld [vmem:[#allocation6 + $0xd6c] sm:$0xf0] }
 0x341   : > { %5210 = vmatpush.bf16.msrb.mxu0 %v7605_v12  ;;  %4549 = vmatpush.bf16.msra.mxu2 %v7165_v25  ;;  %v7429_v23 = vor.u32 %v8060_v45, %v7428_v53  ;;  %v8038_v12 = vld [vmem:[#allocation6 + $0xce4] sm:$0xf]  ;;  %v7413_v10 = vor.u32 %v8056_v29, %v7412_v21  ;;  %v7332_v25 = vld [vmem:[#allocation6 + $0xcc0] sm:$0xf] }
 0x342   : > { %4588 = vmatpush.bf16.msra.mxu1 %v7169_v15  ;;  %v8966_v63 = vpop.f32.mrf.mxu3  ;;  %v7396_v15 = vld [vmem:[#allocation6 + $0xd40] sm:$0xf]  ;;  %v7353_v34 = vor.u32 %v8038_v12, %v7350_v62  ;;  %v7333_v33 = vor.u32 %v8036_v56, %v7332_v25  ;;  %v8024_v62 = vld [vmem:[#allocation6 + $0xc6c] sm:$0xf0]  ;;  %v7590_v25 = vld [vmem:[#allocation6 + $0xed0] sm:$0xf0] }
 0x343   : > { %v7284_v12 = vld [vmem:[#allocation6 + $0xc60] sm:$0xf]  ;;  %v7340_v56 = vld [vmem:[#allocation6 + $0xcc8] sm:$0xf] }
 0x344   : > { %5198 = vmatpush.bf16.msrb.mxu3 %v7461_v38  ;;  %v8052_v38 = vld [vmem:[#allocation6 + $0xd4c] sm:$0xf0]  ;;  %v7252_v16 = vld [vmem:[#allocation6 + $0xc20] sm:$0xf] }
 0x345   : > { %5211 = vmatpush.bf16.msrb.mxu0 %v7589_v36  ;;  %4550 = vmatpush.bf16.msra.mxu2 %v7149_v26  ;;  %v3781_v5 = vpop.f32.mrf.mxu0  ;;  %v8034_v36 = vld [vmem:[#allocation6 + $0xcc4] sm:$0xf]  ;;  %v7397_v19 = vor.u32 %v8052_v38, %v7396_v15  ;;  %v8048_v26 = vld [vmem:[#allocation6 + $0xd2c] sm:$0xf0]  ;;  %v8037_v15 = vld [vmem:[#allocation6 + $0xcd4] sm:$0xf0]  ;;  %v7285_v38 = vor.u32 %v8024_v62, %v7284_v12 }
 0x346   : > { %4589 = vmatpush.bf16.msra.mxu1 %v7153_v39  ;;  %v7337_v18 = vor.u32 %v8034_v36, %v7334_v42  ;;  %v7508_v39 = vld [vmem:[#allocation6 + $0xe20] sm:$0xf]  ;;  %v7381_v4 = vor.u32 %v8048_v26, %v7380_v59  ;;  %v8033_v26 = vld [vmem:[#allocation6 + $0xcb4] sm:$0xf0]  ;;  %v7484_v12 = vld [vmem:[#allocation6 + $0xde8] sm:$0xf] }
 0x347   : > { %v7268_v42 = vld [vmem:[#allocation6 + $0xc40] sm:$0xf]  ;;  %v8073_v62 = vld [vmem:[#allocation6 + $0xdf4] sm:$0xf0] }
 0x348   : > { %5199 = vmatpush.bf16.msrb.mxu3 %v7445_v52  ;;  %v8080_v52 = vld [vmem:[#allocation6 + $0xe2c] sm:$0xf0] }
 0x349   : > { %5212 = vmatpush.bf16.msrb.mxu0 %v7573_v6  ;;  %4551 = vmatpush.bf16.msra.mxu2 %v7133_v44  ;;  %v7300_v6 = vld [vmem:[#allocation6 + $0xc80] sm:$0xf]  ;;  %v7509_v53 = vor.u32 %v8080_v52, %v7508_v39  ;;  %v8044_v44 = vld [vmem:[#allocation6 + $0xd0c] sm:$0xf0] }
 0x34a   : > { %4590 = vmatpush.bf16.msra.mxu1 %v7137_v37  ;;  %v3768_v45 = vpop.f32.mrf.mxu3  ;;  %v8076_v37 = vld [vmem:[#allocation6 + $0xe0c] sm:$0xf0]  ;;  %v7365_v29 = vor.u32 %v8044_v44, %v7364_v58  ;;  %v8029_v58 = vld [vmem:[#allocation6 + $0xc94] sm:$0xf0] }
 0x34b   : > { %v7493_v17 = vor.u32 %v8076_v37, %v7492_v46  ;;  %v8090_v45 = vld [vmem:[#allocation6 + $0xe84] sm:$0xf]  ;;  %v7236_v37 = vld [vmem:[#allocation6 + $0xc00] sm:$0xf] }
 0x34c   : > { %5200 = vmatpush.bf16.msrb.mxu3 %v7429_v23  ;;  %v8026_v23 = vld [vmem:[#allocation6 + $0xc84] sm:$0xf] }
 0x34d   : > { %5213 = vmatpush.bf16.msrb.mxu0 %v7557_v27  ;;  %4552 = vmatpush.bf16.msra.mxu2 %v7117_v9  ;;  %v7301_v27 = vor.u32 %v8028_v14, %v7300_v6  ;;  %v7305_v48 = vor.u32 %v8026_v23, %v7302_v32  ;;  %v8014_v6 = vld [vmem:[#allocation6 + $0xc24] sm:$0xf]  ;;  %v7308_v14 = vld [vmem:[#allocation6 + $0xc88] sm:$0xf]  ;;  %v8012_v32 = vld [vmem:[#allocation6 + $0xc0c] sm:$0xf0] }
 0x34e   : > { %4591 = vmatpush.bf16.msra.mxu1 %v7121_v22  ;;  %v8022_v22 = vld [vmem:[#allocation6 + $0xc64] sm:$0xf] }
 0x350   : > { %5201 = vmatpush.bf16.msrb.mxu3 %v7413_v10  ;;  %4553 = vmatmul.bf16.vlgmr.msra.gmra.mxu2 %v8815_v50  ;;  %v3792_v49 = vpop.f32.mrf.mxu1  ;;  %v7286_v10 = vld [vmem:[#allocation6 + $0xc70] sm:$0xf0] }
 0x351   : > { %5184 = vmatpush.bf16.msrb.mxu2 %v7349_v41  ;;  %5214 = vmatpush.bf16.msrb.mxu0 %v7541_v20  ;;  %v8971_v21 = vadd.f32 %v3792_v49, %v8964_v28  ;;  %v7357_v41 = vor.u32 %v8041_v0, %v7356_v54  ;;  %v8098_v20 = vld [vmem:[#allocation6 + $0xec4] sm:$0xf]  ;;  %v8977_v28 = vrot.slane %v8803_v55, 2  ;;  %v7289_v8 = vor.u32 %v8022_v22, %v7286_v10  ;;  %v7478_v54 = vld [vmem:[#allocation6 + $0xdf0] sm:$0xf0] }
 0x352   : > { %5223 = vmatpush.bf16.msrb.mxu1 %v7353_v34  ;;  %v8974_v34 = vrot.slane %v8800_v47, 2  ;;  %v7593_v36 = vor.u32 %v8098_v20, %v7590_v25  ;;  %v7270_v47 = vld [vmem:[#allocation6 + $0xc50] sm:$0xf0]  ;;  %v7309_v49 = vor.u32 %v8029_v58, %v7308_v14  ;;  %v8086_v0 = vld [vmem:[#allocation6 + $0xe64] sm:$0xf] }
 0x353   : > { %4592 = vmatmul.bf16.vlgmr.msra.gmra.mxu1 %v8815_v50  ;;  %v8102_v50 = vld [vmem:[#allocation6 + $0xee4] sm:$0xf]  ;;  %v3753_v13 = vpop.f32.mrf.mxu2  ;;  %v7430_v14 = vld [vmem:[#allocation6 + $0xd90] sm:$0xf0] }
 0x354   : > { %5202 = vmatpush.bf16.msrb.mxu3 %v7397_v19  ;;  %v7609_v9 = vor.u32 %v8102_v50, %v7606_v61  ;;  %v3754_v5 = vadd.f32 %v3753_v13, %v8954_v60  ;;  %v8018_v19 = vld [vmem:[#allocation6 + $0xc44] sm:$0xf]  ;;  %v7238_v61 = vld [vmem:[#allocation6 + $0xc10] sm:$0xf0]  ;;  %v7485_v13 = vor.u32 %v8073_v62, %v7484_v12 }
 0x355   : > { %5185 = vmatpush.bf16.msrb.mxu2 %v7333_v33  ;;  %5215 = vmatpush.bf16.msrb.mxu0 %v7525_v43  ;;  %v8020_v33 = vld [vmem:[#allocation6 + $0xc4c] sm:$0xf0]  ;;  %v7341_v43 = vor.u32 %v8037_v15, %v7340_v56  ;;  %v7273_v52 = vor.u32 %v8018_v19, %v7270_v47  ;;  %v8010_v50 = vld [vmem:[#allocation6 + $0xc04] sm:$0xf]  ;;  %v7462_v15 = vld [vmem:[#allocation6 + $0xdd0] sm:$0xf0] }
 0x356   : > { %5224 = vmatpush.bf16.msrb.mxu1 %v7337_v18  ;;  %v3767_v55 = vadd.f32 %v8966_v63, %v3754_v5  ;;  %v7324_v18 = vld [vmem:[#allocation6 + $0xca8] sm:$0xf]  ;;  %v7269_v60 = vor.u32 %v8020_v33, %v7268_v42  ;;  %v7558_v63 = vld [vmem:[#allocation6 + $0xe90] sm:$0xf0]  ;;  %v7241_v22 = vor.u32 %v8010_v50, %v7238_v61  ;;  %v8066_v56 = vld [vmem:[#allocation6 + $0xdc4] sm:$0xf] }
 0x357   : > { %v7561_v23 = vor.u32 %v8090_v45, %v7558_v63  ;;  %v7526_v5 = vld [vmem:[#allocation6 + $0xe50] sm:$0xf0]  ;;  %v8021_v42 = vld [vmem:[#allocation6 + $0xc54] sm:$0xf0]  ;;  %v7468_v19 = vld [vmem:[#allocation6 + $0xdc8] sm:$0xf]  ;;  %v7465_v51 = vor.u32 %v8066_v56, %v7462_v15 }
 0x358   : > { %5203 = vmatpush.bf16.msrb.mxu3 %v7381_v4  ;;  %v3794_v59 = vpop.f32.mrf.mxu1  ;;  %v8984_v39 = vadd.f32 %v3767_v55, %v8934_v35  ;;  %v7325_v4 = vor.u32 %v8033_v26, %v7324_v18  ;;  %v8987_v47 = vrot.slane %v8824_v3, 2  ;;  %v7446_v18 = vld [vmem:[#allocation6 + $0xdb0] sm:$0xf0]  ;;  %v8078_v26 = vld [vmem:[#allocation6 + $0xe24] sm:$0xf] }
 0x359   : > { %5186 = vmatpush.bf16.msrb.mxu2 %v7317_v24  ;;  %5216 = vmatpush.bf16.msrb.mxu0 %v7509_v53  ;;  %v8016_v24 = vld [vmem:[#allocation6 + $0xc2c] sm:$0xf0]  ;;  %v7254_v53 = vld [vmem:[#allocation6 + $0xc30] sm:$0xf0]  ;;  %v8062_v59 = vld [vmem:[#allocation6 + $0xda4] sm:$0xf] }
 0x35a   : > { %5225 = vmatpush.bf16.msrb.mxu1 %v7321_v11  ;;  %v7253_v11 = vor.u32 %v8016_v24, %v7252_v16  ;;  %v7257_v35 = vor.u32 %v8014_v6, %v7254_v53  ;;  %v8017_v16 = vld [vmem:[#allocation6 + $0xc34] sm:$0xf0]  ;;  %v7452_v3 = vld [vmem:[#allocation6 + $0xda8] sm:$0xf]  ;;  %v7449_v6 = vor.u32 %v8062_v59, %v7446_v18  ;;  %v8074_v58 = vld [vmem:[#allocation6 + $0xe04] sm:$0xf] }
 0x35b   : > { %v3755_v46 = vpop.f32.mrf.mxu2  ;;  %v8065_v24 = vld [vmem:[#allocation6 + $0xdb4] sm:$0xf0]  ;;  %v7358_v50 = vld [vmem:[#allocation6 + $0xcf8] sm:$0xf0]  ;;  %v8054_v12 = vld [vmem:[#allocation6 + $0xd64] sm:$0xf] }
 0x35c   : > { %5204 = vmatpush.bf16.msrb.mxu3 %v7365_v29  ;;  %v7542_v29 = vld [vmem:[#allocation6 + $0xe70] sm:$0xf0]  ;;  %v7244_v46 = vld [vmem:[#allocation6 + $0xc08] sm:$0xf]  ;;  %v7342_v56 = vld [vmem:[#allocation6 + $0xcd8] sm:$0xf0] }
 0x35d   : > { %5187 = vmatpush.bf16.msrb.mxu2 %v7301_v27  ;;  %5217 = vmatpush.bf16.msrb.mxu0 %v7493_v17  ;;  %v3831_v44 = vpop.f32.mrf.mxu0  ;;  %v8070_v27 = vld [vmem:[#allocation6 + $0xde4] sm:$0xf]  ;;  %v7292_v17 = vld [vmem:[#allocation6 + $0xc68] sm:$0xf]  ;;  %v7545_v10 = vor.u32 %v8086_v0, %v7542_v29  ;;  %v7414_v62 = vld [vmem:[#allocation6 + $0xd70] sm:$0xf0] }
 0x35e   : > { %5226 = vmatpush.bf16.msrb.mxu1 %v7305_v48  ;;  %v8025_v48 = vld [vmem:[#allocation6 + $0xc74] sm:$0xf0]  ;;  %v8067_v15 = vld [vmem:[#allocation6 + $0xdcc] sm:$0xf] }
 0x35f   : > { %5205 = vmatmul.bf16.vlgmr.msrb.gmra.mxu3 %v8974_v34  ;;  %v7293_v20 = vor.u32 %v8025_v48, %v7292_v17 }
 0x360   : > { %5249 = vmatpush.bf16.msra.mxu3 %v7609_v9  ;;  %5218 = vmatmul.bf16.vlgmr.msrb.gmra.mxu0 %v8977_v28  ;;  %v7237_v9 = vor.u32 %v8012_v32, %v7236_v37  ;;  %v8013_v37 = vld [vmem:[#allocation6 + $0xc14] sm:$0xf0]  ;;  %v8039_v32 = vld [vmem:[#allocation6 + $0xcec] sm:$0xf] }
 0x361   : > { %5262 = vmatpush.bf16.msra.mxu0 %v7357_v41  ;;  %5188 = vmatpush.bf16.msrb.mxu2 %v7285_v38  ;;  %v7481_v41 = vor.u32 %v8070_v27, %v7478_v54  ;;  %v8082_v38 = vld [vmem:[#allocation6 + $0xe44] sm:$0xf]  ;;  %v8071_v27 = vld [vmem:[#allocation6 + $0xdec] sm:$0xf]  ;;  %v7486_v54 = vld [vmem:[#allocation6 + $0xdf8] sm:$0xf0]  ;;  %v7245_v17 = vor.u32 %v8013_v37, %v7244_v46 }
 0x362   : > { %5227 = vmatpush.bf16.msrb.mxu1 %v7289_v8  ;;  %v3818_v25 = vpop.f32.mrf.mxu3  ;;  %v7529_v57 = vor.u32 %v8082_v38, %v7526_v5  ;;  %v7470_v38 = vld [vmem:[#allocation6 + $0xdd8] sm:$0xf0] }
 0x363   : > { %v3832_v8 = vadd.f32 %v3831_v44, %v3818_v25  ;;  %v7494_v44 = vld [vmem:[#allocation6 + $0xe10] sm:$0xf0]  ;;  %v8035_v25 = vld [vmem:[#allocation6 + $0xccc] sm:$0xf] }
 0x364   : > { %5250 = vmatpush.bf16.msra.mxu3 %v7593_v36  ;;  %v7276_v36 = vld [vmem:[#allocation6 + $0xc48] sm:$0xf]  ;;  %v7497_v29 = vor.u32 %v8074_v58, %v7494_v44 }
 0x365   : > { %5263 = vmatpush.bf16.msra.mxu0 %v7341_v43  ;;  %5189 = vmatpush.bf16.msrb.mxu2 %v7269_v60  ;;  %v3833_v33 = vpop.f32.mrf.mxu0  ;;  %v8069_v43 = vld [vmem:[#allocation6 + $0xdd4] sm:$0xf0]  ;;  %v7277_v55 = vor.u32 %v8021_v42, %v7276_v36  ;;  %v7345_v42 = vor.u32 %v8035_v25, %v7342_v56  ;;  %v7596_v25 = vld [vmem:[#allocation6 + $0xec8] sm:$0xf] }
 0x366   : > { %5228 = vmatpush.bf16.msrb.mxu1 %v7273_v52  ;;  %v7469_v60 = vor.u32 %v8069_v43, %v7468_v19  ;;  %v7510_v52 = vld [vmem:[#allocation6 + $0xe30] sm:$0xf0]  ;;  %v8050_v33 = vld [vmem:[#allocation6 + $0xd44] sm:$0xf]  ;;  %v7404_v19 = vld [vmem:[#allocation6 + $0xd48] sm:$0xf]  ;;  %v7473_v43 = vor.u32 %v8067_v15, %v7470_v38 }
 0x367   : > { %v7513_v53 = vor.u32 %v8078_v26, %v7510_v52  ;;  %v8063_v26 = vld [vmem:[#allocation6 + $0xdac] sm:$0xf]  ;;  %v8101_v56 = vld [vmem:[#allocation6 + $0xed4] sm:$0xf0] }
 0x368   : > { %5251 = vmatpush.bf16.msra.mxu3 %v7577_v2  ;;  %v7260_v2 = vld [vmem:[#allocation6 + $0xc28] sm:$0xf]  ;;  %v8019_v15 = vld [vmem:[#allocation6 + $0xc4c] sm:$0xf] }
 0x369   : > { %5264 = vmatpush.bf16.msra.mxu0 %v7325_v4  ;;  %5190 = vmatpush.bf16.msrb.mxu2 %v7253_v11  ;;  %v8058_v4 = vld [vmem:[#allocation6 + $0xd84] sm:$0xf]  ;;  %v7261_v45 = vor.u32 %v8017_v16, %v7260_v2  ;;  %v7453_v11 = vor.u32 %v8065_v24, %v7452_v3  ;;  %v7382_v3 = vld [vmem:[#allocation6 + $0xd30] sm:$0xf0]  ;;  %v7388_v24 = vld [vmem:[#allocation6 + $0xd28] sm:$0xf] }
 0x36a   : > { %5229 = vmatpush.bf16.msrb.mxu1 %v7257_v35  ;;  %v3820_v63 = vpop.f32.mrf.mxu3  ;;  %v7436_v35 = vld [vmem:[#allocation6 + $0xd88] sm:$0xf]  ;;  %v8046_v16 = vld [vmem:[#allocation6 + $0xd24] sm:$0xf] }
 0x36b   : > { %v8059_v63 = vld [vmem:[#allocation6 + $0xd8c] sm:$0xf]  ;;  %v7385_v58 = vor.u32 %v8046_v16, %v7382_v3 }
 0x36c   : > { %5252 = vmatpush.bf16.msra.mxu3 %v7561_v23  ;;  %v8061_v23 = vld [vmem:[#allocation6 + $0xd94] sm:$0xf0] }
 0x36d   : > { %5265 = vmatpush.bf16.msra.mxu0 %v7309_v49  ;;  %5191 = vmatpush.bf16.msrb.mxu2 %v7237_v9  ;;  %v7433_v49 = vor.u32 %v8058_v4, %v7430_v14  ;;  %v7437_v48 = vor.u32 %v8061_v23, %v7436_v35  ;;  %v7361_v9 = vor.u32 %v8039_v32, %v7358_v50  ;;  %v8049_v4 = vld [vmem:[#allocation6 + $0xd34] sm:$0xf0]  ;;  %v7366_v35 = vld [vmem:[#allocation6 + $0xd10] sm:$0xf0]  ;;  %v7372_v23 = vld [vmem:[#allocation6 + $0xd08] sm:$0xf] }
 0x36e   : > { %5230 = vmatpush.bf16.msrb.mxu1 %v7241_v22  ;;  %v7420_v22 = vld [vmem:[#allocation6 + $0xd68] sm:$0xf]  ;;  %v7389_v46 = vor.u32 %v8049_v4, %v7388_v24  ;;  %v8045_v32 = vld [vmem:[#allocation6 + $0xd14] sm:$0xf0] }
 0x36f   : > { %v7564_v4 = vld [vmem:[#allocation6 + $0xe88] sm:$0xf] }
 0x370   : > { %5253 = vmatpush.bf16.msra.mxu3 %v7545_v10  ;;  %5192 = vmatmul.bf16.vlgmr.msrb.gmra.mxu2 %v8987_v47  ;;  %v3844_v61 = vpop.f32.mrf.mxu1  ;;  %v7489_v10 = vor.u32 %v8071_v27, %v7486_v54  ;;  %v8023_v27 = vld [vmem:[#allocation6 + $0xc6c] sm:$0xf]  ;;  %v7294_v54 = vld [vmem:[#allocation6 + $0xc78] sm:$0xf0] }
 0x371   : > { %5236 = vmatpush.bf16.msra.mxu2 %v7481_v41  ;;  %5266 = vmatpush.bf16.msra.mxu0 %v7293_v20  ;;  %v3845_v0 = vadd.f32 %v3844_v61, %v3832_v8  ;;  %v8057_v20 = vld [vmem:[#allocation6 + $0xd74] sm:$0xf0]  ;;  %v7612_v61 = vld [vmem:[#allocation6 + $0xee8] sm:$0xf] }
 0x372   : > { %5275 = vmatpush.bf16.msra.mxu1 %v7485_v13  ;;  %v7417_v13 = vor.u32 %v8054_v12, %v7414_v62  ;;  %v7421_v5 = vor.u32 %v8057_v20, %v7420_v22  ;;  %v7373_v12 = vor.u32 %v8045_v32, %v7372_v23  ;;  %v7297_v22 = vor.u32 %v8023_v27, %v7294_v54  ;;  %v8087_v27 = vld [vmem:[#allocation6 + $0xe6c] sm:$0xf]  ;;  %v7550_v54 = vld [vmem:[#allocation6 + $0xe78] sm:$0xf0] }
 0x373   : > { %5231 = vmatmul.bf16.vlgmr.msrb.gmra.mxu1 %v8987_v47  ;;  %v8992_v41 = vadd.f32 %v3845_v0, %v8939_v40  ;;  %v3805_v8 = vpop.f32.mrf.mxu2  ;;  %v7398_v40 = vld [vmem:[#allocation6 + $0xd50] sm:$0xf0]  ;;  %v8055_v0 = vld [vmem:[#allocation6 + $0xd6c] sm:$0xf] }
 0x374   : > { %5254 = vmatpush.bf16.msra.mxu3 %v7529_v57  ;;  %v3806_v36 = vadd.f32 %v3805_v8, %v8971_v21  ;;  %v8031_v57 = vld [vmem:[#allocation6 + $0xcac] sm:$0xf]  ;;  %v7401_v21 = vor.u32 %v8050_v33, %v7398_v40  ;;  %v7598_v33 = vld [vmem:[#allocation6 + $0xed8] sm:$0xf0]  ;;  %v7597_v40 = vor.u32 %v8101_v56, %v7596_v25 }
 0x375   : > { %5237 = vmatpush.bf16.msra.mxu2 %v7465_v51  ;;  %5267 = vmatpush.bf16.msra.mxu0 %v7277_v55  ;;  %v8053_v51 = vld [vmem:[#allocation6 + $0xd54] sm:$0xf0]  ;;  %v7326_v55 = vld [vmem:[#allocation6 + $0xcb8] sm:$0xf0]  ;;  %v8051_v8 = vld [vmem:[#allocation6 + $0xd4c] sm:$0xf] }
 0x376   : > { %5276 = vmatpush.bf16.msra.mxu1 %v7469_v60  ;;  %v8998_v59 = vadd.f32 %v3806_v36, %v8942_v30  ;;  %v7454_v60 = vld [vmem:[#allocation6 + $0xdb8] sm:$0xf0]  ;;  %v7405_v52 = vor.u32 %v8053_v51, %v7404_v19  ;;  %v7329_v2 = vor.u32 %v8031_v57, %v7326_v55  ;;  %v7580_v51 = vld [vmem:[#allocation6 + $0xea8] sm:$0xf]  ;;  %v8097_v57 = vld [vmem:[#allocation6 + $0xeb4] sm:$0xf0] }
 0x377   : > { %v7438_v30 = vld [vmem:[#allocation6 + $0xd98] sm:$0xf0]  ;;  %v8015_v55 = vld [vmem:[#allocation6 + $0xc2c] sm:$0xf]  ;;  %v7581_v16 = vor.u32 %v8097_v57, %v7580_v51 }
 0x378   : > { %5255 = vmatpush.bf16.msra.mxu3 %v7513_v53  ;;  %v3846_v18 = vpop.f32.mrf.mxu1  ;;  %v8027_v53 = vld [vmem:[#allocation6 + $0xc8c] sm:$0xf]  ;;  %v7441_v50 = vor.u32 %v8059_v63, %v7438_v30  ;;  %v7246_v30 = vld [vmem:[#allocation6 + $0xc18] sm:$0xf0] }
 0x379   : > { %5238 = vmatpush.bf16.msra.mxu2 %v7449_v6  ;;  %5268 = vmatpush.bf16.msra.mxu0 %v7261_v45  ;;  %v7457_v6 = vor.u32 %v8063_v26, %v7454_v60  ;;  %v7310_v45 = vld [vmem:[#allocation6 + $0xc98] sm:$0xf0]  ;;  %v8047_v60 = vld [vmem:[#allocation6 + $0xd2c] sm:$0xf] }
 0x37a   : > { %5277 = vmatpush.bf16.msra.mxu1 %v7453_v11  ;;  %v8042_v11 = vld [vmem:[#allocation6 + $0xd04] sm:$0xf]  ;;  %v7313_v37 = vor.u32 %v8027_v53, %v7310_v45  ;;  %v7262_v26 = vld [vmem:[#allocation6 + $0xc38] sm:$0xf0]  ;;  %v8093_v53 = vld [vmem:[#allocation6 + $0xe94] sm:$0xf0] }
 0x37b   : > { %v3807_v44 = vpop.f32.mrf.mxu2  ;;  %v7265_v3 = vor.u32 %v8015_v55, %v7262_v26  ;;  %v8011_v45 = vld [vmem:[#allocation6 + $0xc0c] sm:$0xf] }
 0x37c   : > { %5256 = vmatpush.bf16.msra.mxu3 %v7497_v29  ;;  %v7422_v29 = vld [vmem:[#allocation6 + $0xd78] sm:$0xf0]  ;;  %v7249_v23 = vor.u32 %v8011_v45, %v7246_v30 }
 0x37d   : > { %5239 = vmatpush.bf16.msra.mxu2 %v7433_v49  ;;  %5269 = vmatpush.bf16.msra.mxu0 %v7245_v17  ;;  %v9000_v14 = vpop.f32.mrf.mxu0  ;;  %v8105_v49 = vld [vmem:[#allocation6 + $0xef4] sm:$0xf0]  ;;  %v7369_v17 = vor.u32 %v8042_v11, %v7366_v35  ;;  %v7374_v44 = vld [vmem:[#allocation6 + $0xd18] sm:$0xf0]  ;;  %v8091_v11 = vld [vmem:[#allocation6 + $0xe8c] sm:$0xf]  ;;  %v7565_v35 = vor.u32 %v8093_v53, %v7564_v4 }
 0x37e   : > { %5278 = vmatpush.bf16.msra.mxu1 %v7437_v48  ;;  %v8103_v48 = vld [vmem:[#allocation6 + $0xeec] sm:$0xf]  ;;  %v7613_v62 = vor.u32 %v8105_v49, %v7612_v61  ;;  %v7548_v61 = vld [vmem:[#allocation6 + $0xe68] sm:$0xf]  ;;  %v8089_v49 = vld [vmem:[#allocation6 + $0xe74] sm:$0xf0] }
 0x37f   : > { %5257 = vmatmul.bf16.vlgmr.msra.gmra.mxu3 %v8977_v28 }
 0x380   : > { %5301 = vmatpush.bf16.msrb.mxu3 %v7361_v9  ;;  %5270 = vmatmul.bf16.vlgmr.msra.gmra.mxu0 %v8987_v47  ;;  %v7614_v9 = vld [vmem:[#allocation6 + $0xef8] sm:$0xf0] }
 0x381   : > { %5314 = vmatpush.bf16.msrb.mxu0 %v7489_v10  ;;  %5240 = vmatpush.bf16.msra.mxu2 %v7417_v13  ;;  %v7425_v10 = vor.u32 %v8055_v0, %v7422_v29  ;;  %v7617_v38 = vor.u32 %v8103_v48, %v7614_v9  ;;  %v7278_v13 = vld [vmem:[#allocation6 + $0xc58] sm:$0xf0]  ;;  %v7549_v0 = vor.u32 %v8089_v49, %v7548_v61  ;;  %v7532_v9 = vld [vmem:[#allocation6 + $0xe48] sm:$0xf] }
 0x382   : > { %5279 = vmatpush.bf16.msra.mxu1 %v7421_v5  ;;  %v9002_v20 = vpop.f32.mrf.mxu3  ;;  %v7406_v5 = vld [vmem:[#allocation6 + $0xd58] sm:$0xf0]  ;;  %v7281_v19 = vor.u32 %v8019_v15, %v7278_v13  ;;  %v7516_v13 = vld [vmem:[#allocation6 + $0xe28] sm:$0xf] }
 0x384   : > { %5302 = vmatpush.bf16.msrb.mxu3 %v7345_v42  ;;  %v8099_v42 = vld [vmem:[#allocation6 + $0xecc] sm:$0xf] }
 0x385   : > { %5315 = vmatpush.bf16.msrb.mxu0 %v7473_v43  ;;  %5241 = vmatpush.bf16.msra.mxu2 %v7401_v21  ;;  %v4478_v36 = vpop.f32.mrf.mxu0  ;;  %v7409_v43 = vor.u32 %v8051_v8, %v7406_v5  ;;  %v7601_v18 = vor.u32 %v8099_v42, %v7598_v33  ;;  %v7390_v21 = vld [vmem:[#allocation6 + $0xd38] sm:$0xf0]  ;;  %v8081_v8 = vld [vmem:[#allocation6 + $0xe34] sm:$0xf0] }
 0x386   : > { %5280 = vmatpush.bf16.msra.mxu1 %v7405_v52  ;;  %v8095_v52 = vld [vmem:[#allocation6 + $0xeac] sm:$0xf]  ;;  %v7393_v24 = vor.u32 %v8047_v60, %v7390_v21  ;;  %v7518_v5 = vld [vmem:[#allocation6 + $0xe38] sm:$0xf0]  ;;  %v7517_v42 = vor.u32 %v8081_v8, %v7516_v13 }
 0x388   : > { %5303 = vmatpush.bf16.msrb.mxu3 %v7329_v2  ;;  %v7582_v2 = vld [vmem:[#allocation6 + $0xeb8] sm:$0xf0] }
 0x389   : > { %5316 = vmatpush.bf16.msrb.mxu0 %v7457_v6  ;;  %5242 = vmatpush.bf16.msra.mxu2 %v7385_v58  ;;  %v7585_v63 = vor.u32 %v8095_v52, %v7582_v2  ;;  %v8043_v58 = vld [vmem:[#allocation6 + $0xd0c] sm:$0xf] }
 0x38a   : > { %5281 = vmatpush.bf16.msra.mxu1 %v7389_v46  ;;  %v4465_v6 = vpop.f32.mrf.mxu3  ;;  %v7566_v46 = vld [vmem:[#allocation6 + $0xe98] sm:$0xf0]  ;;  %v7377_v32 = vor.u32 %v8043_v58, %v7374_v44 }
 0x38c   : > { %5304 = vmatpush.bf16.msrb.mxu3 %v7313_v37 }
 0x38d   : > { %5317 = vmatpush.bf16.msrb.mxu0 %v7441_v50  ;;  %5243 = vmatpush.bf16.msra.mxu2 %v7369_v17  ;;  %v7569_v50 = vor.u32 %v8091_v11, %v7566_v46  ;;  %v7553_v17 = vor.u32 %v8087_v27, %v7550_v54 }
 0x38e   : > { %5282 = vmatpush.bf16.msra.mxu1 %v7373_v12  ;;  %v8085_v12 = vld [vmem:[#allocation6 + $0xe54] sm:$0xf0] }
 0x38f   : > { %v7533_v56 = vor.u32 %v8085_v12, %v7532_v9 }
 0x390   : > { %5305 = vmatpush.bf16.msrb.mxu3 %v7297_v22  ;;  %5244 = vmatmul.bf16.vlgmr.msra.gmra.mxu2 %v8974_v34  ;;  %v4489_v37 = vpop.f32.mrf.mxu1  ;;  %v7534_v22 = vld [vmem:[#allocation6 + $0xe58] sm:$0xf0] }
 0x391   : > { %5288 = vmatpush.bf16.msrb.mxu2 %v7613_v62  ;;  %5318 = vmatpush.bf16.msrb.mxu0 %v7425_v10  ;;  %v8083_v62 = vld [vmem:[#allocation6 + $0xe4c] sm:$0xf] }
 0x392   : > { %5327 = vmatpush.bf16.msrb.mxu1 %v7617_v38  ;;  %v7537_v38 = vor.u32 %v8083_v62, %v7534_v22 }
 0x393   : > { %5283 = vmatmul.bf16.vlgmr.msra.gmra.mxu1 %v8974_v34  ;;  %v4450_v29 = vpop.f32.mrf.mxu2 }
 0x394   : > { %5306 = vmatpush.bf16.msrb.mxu3 %v7281_v19  ;;  %v4464_v48 = vadd.f32 %v9002_v20, %v4450_v29  ;;  %v8079_v20 = vld [vmem:[#allocation6 + $0xe2c] sm:$0xf]  ;;  %v7502_v19 = vld [vmem:[#allocation6 + $0xe18] sm:$0xf0] }
 0x395   : > { %5289 = vmatpush.bf16.msrb.mxu2 %v7597_v40  ;;  %5319 = vmatpush.bf16.msrb.mxu0 %v7409_v43  ;;  %v8077_v40 = vld [vmem:[#allocation6 + $0xe14] sm:$0xf0] }
 0x396   : > { %5328 = vmatpush.bf16.msrb.mxu1 %v7601_v18  ;;  %v4477_v10 = vadd.f32 %v9000_v14, %v4464_v48  ;;  %v8075_v14 = vld [vmem:[#allocation6 + $0xe0c] sm:$0xf] }
 0x397   : > { %v7505_v51 = vor.u32 %v8075_v14, %v7502_v19 }
 0x398   : > { %5307 = vmatpush.bf16.msrb.mxu3 %v7265_v3  ;;  %v4491_v25 = vpop.f32.mrf.mxu1  ;;  %v4597_v15 = vadd.f32 %v4477_v10, %v8962_v7 }
 0x399   : > { %5290 = vmatpush.bf16.msrb.mxu2 %v7581_v16  ;;  %5320 = vmatpush.bf16.msrb.mxu0 %v7393_v24 }
 0x39a   : > { %5329 = vmatpush.bf16.msrb.mxu1 %v7585_v63 }
 0x39b   : > { %v4452_v33 = vpop.f32.mrf.mxu2 }
 0x39c   : > { %5308 = vmatpush.bf16.msrb.mxu3 %v7249_v23 }
 0x39d   : > { %5291 = vmatpush.bf16.msrb.mxu2 %v7565_v35  ;;  %5321 = vmatpush.bf16.msrb.mxu0 %v7377_v32  ;;  %v4528_v36 = vpop.f32.mrf.mxu0 }
 0x39e   : > { %5330 = vmatpush.bf16.msrb.mxu1 %v7569_v50 }
 0x39f   : > { %5309 = vmatmul.bf16.vlgmr.msrb.gmra.mxu3 %v8987_v47  ;;  %v7521_v47 = vor.u32 %v8079_v20, %v7518_v5 }
 0x3a0   : > { %5322 = vmatmul.bf16.vlgmr.msrb.gmra.mxu0 %v8974_v34  ;;  %v7500_v34 = vld [vmem:[#allocation6 + $0xe08] sm:$0xf] }
 0x3a1   : > { %5292 = vmatpush.bf16.msrb.mxu2 %v7549_v0  ;;  %v7501_v43 = vor.u32 %v8077_v40, %v7500_v34 }
 0x3a2   : > { %5331 = vmatpush.bf16.msrb.mxu1 %v7553_v17  ;;  %v4515_v7 = vpop.f32.mrf.mxu3 }
 0x3a5   : > { %5293 = vmatpush.bf16.msrb.mxu2 %v7533_v56  ;;  %v4530_v57 = vpop.f32.mrf.mxu0 }
 0x3a6   : > { %5332 = vmatpush.bf16.msrb.mxu1 %v7537_v38 }
 0x3a9   : > { %5294 = vmatpush.bf16.msrb.mxu2 %v7517_v42 }
 0x3aa   : > { %5333 = vmatpush.bf16.msrb.mxu1 %v7521_v47  ;;  %v4517_v55 = vpop.f32.mrf.mxu3 }
 0x3ad   : > { %5295 = vmatpush.bf16.msrb.mxu2 %v7501_v43 }
 0x3ae   : > { %5334 = vmatpush.bf16.msrb.mxu1 %v7505_v51 }
 0x3b0   : > { %5296 = vmatmul.bf16.vlgmr.msrb.gmra.mxu2 %v8977_v28  ;;  %v4541_v18 = vpop.f32.mrf.mxu1 }
 0x3b1   : > { %5335 = vmatmul.bf16.vlgmr.msrb.gmra.mxu1 %v8977_v28  ;;  %v4542_v26 = vadd.f32 %v4541_v18, %v4528_v36  ;;  %v5346_v36 = vld [vmem:[#allocation7] sm:$0x3] }
 0x3b2   : > { %v5349_v47 = vperm.slane %v5346_v36, 1 }
 0x3b3   : > { %v4502_v60 = vpop.f32.mrf.mxu2 }
 0x3b4   : > { %v4503_v21 = vadd.f32 %v4502_v60, %v4489_v37 }
 0x3b6   : > { %v4516_v52 = vadd.f32 %v4515_v7, %v4503_v21  ;;  %v5348_v7 = vperm.slane %v5346_v36, 0 }
 0x3b8   : > { %v4543_v2 = vpop.f32.mrf.mxu1  ;;  %v4598_v16 = vadd.f32 %v4516_v52, %v8984_v39 }
 0x3bb   : > { %v4504_v24 = vpop.f32.mrf.mxu2 }
 0x3bd   : > { %v4580_v3 = vpop.f32.mrf.mxu0 }
 0x3c2   : > { %v4567_v6 = vpop.f32.mrf.mxu3 }
 0x3c3   : > { %v4581_v4 = vadd.f32 %v4580_v3, %v4567_v6 }
 0x3c5   : > { %v4582_v53 = vpop.f32.mrf.mxu0 }
 0x3ca   : > { %v4569_v45 = vpop.f32.mrf.mxu3 }
 0x3d0   : > { %v4593_v63 = vpop.f32.mrf.mxu1 }
 0x3d1   : > { %v4594_v30 = vadd.f32 %v4593_v63, %v4581_v4 }
 0x3d3   : > { %v4600_v58 = vadd.f32 %v4594_v30, %v8992_v41  ;;  %v4554_v28 = vpop.f32.mrf.mxu2 }
 0x3d4   : > { %v4555_v44 = vadd.f32 %v4554_v28, %v4542_v26 }
 0x3d6   : > { %v4599_v11 = vadd.f32 %v4555_v44, %v8998_v59 }
 0x3d8   : > { %v4595_v46 = vpop.f32.mrf.mxu1 }
 0x3db   : > { %v4556_v35 = vpop.f32.mrf.mxu2 }
 0x3dd   : > { %v5219_v37 = vpop.f32.mrf.mxu0 }
 0x3e2   : > { %v5206_v23 = vpop.f32.mrf.mxu3 }
 0x3e5   : > { %v5221_v32 = vpop.f32.mrf.mxu0 }
 0x3ea   : > { %v5208_v39 = vpop.f32.mrf.mxu3 }
 0x3f0   : > { %v5232_v50 = vpop.f32.mrf.mxu1 }
 0x3f3   : > { %v5193_v61 = vpop.f32.mrf.mxu2 }
 0x3f4   : > { %v5207_v49 = vadd.f32 %v5206_v23, %v5193_v61 }
 0x3f6   : > { %v5220_v27 = vadd.f32 %v5219_v37, %v5207_v49 }
 0x3f8   : > { %v5234_v54 = vpop.f32.mrf.mxu1  ;;  %v5340_v0 = vadd.f32 %v5220_v27, %v4597_v15 }
 0x3fb   : > { %v5195_v17 = vpop.f32.mrf.mxu2 }
 0x3fd   : > { %v5271_v29 = vpop.f32.mrf.mxu0 }
 0x402   : > { %v5258_v48 = vpop.f32.mrf.mxu3 }
 0x405   : > { %v5273_v41 = vpop.f32.mrf.mxu0 }
 0x40a   : > { %v5260_v9 = vpop.f32.mrf.mxu3 }
 0x410   : > { %v5284_v12 = vpop.f32.mrf.mxu1 }
 0x411   : > { %v5285_v34 = vadd.f32 %v5284_v12, %v5271_v29 }
 0x413   : > { %v5245_v62 = vpop.f32.mrf.mxu2 }
 0x414   : > { %v5246_v38 = vadd.f32 %v5245_v62, %v5232_v50 }
 0x416   : > { %v5259_v8 = vadd.f32 %v5258_v48, %v5246_v38 }
 0x418   : > { %v5286_v59 = vpop.f32.mrf.mxu1  ;;  %v5341_v15 = vadd.f32 %v5259_v8, %v4598_v16 }
 0x41b   : > { %v5247_v10 = vpop.f32.mrf.mxu2 }
 0x41d   : > { %v5323_v22 = vpop.f32.mrf.mxu0 }
 0x422   : > { %v5310_v25 = vpop.f32.mrf.mxu3 }
 0x423   : > { %v5324_v20 = vadd.f32 %v5323_v22, %v5310_v25 }
 0x425   : > { %v5325_v56 = vpop.f32.mrf.mxu0 }
 0x42a   : > { %v5312_v13 = vpop.f32.mrf.mxu3 }
 0x42e   : > { %v5336_v5 = vpop.f32.mrf.mxu1 }
 0x42f   : > { %v5337_v42 = vadd.f32 %v5336_v5, %v5324_v20 }
 0x431   : > { %v5343_v33 = vadd.f32 %v5337_v42, %v4600_v58 }
 0x433   : > { %v5345_v40 = vmax.f32 %v5341_v15, %v5343_v33  ;;  %v5297_v14 = vpop.f32.mrf.mxu2 }
 0x434   : > { %v5298_v19 = vadd.f32 %v5297_v14, %v5285_v34 }
 0x435   : > { %v5353_v43 = vadd.f32 %v5349_v47, %v5345_v40 }
 0x436   : > { %v5342_v51 = vadd.f32 %v5298_v19, %v4599_v11  ;;  %v5338_v57 = vpop.f32.mrf.mxu1 }
 0x437   : > { %v5355_v55 = vmax.f32 %v5353_v43, 0.0 }
 0x438   : > { %v5344_v18 = vmax.f32 %v5340_v0, %v5342_v51 }
 0x439   : > { %5394 = vmatpush.msra.mxu3 %v5355_v55  ;;  %5436 = vmatpush.msra.mxu1 %v5355_v55 }
 0x43a   : > { %v5352_v26 = vadd.f32 %v5348_v7, %v5344_v18  ;;  %7619 = vmatmul.msk.f32.vlgmr.msra.gmra.mxu3 %vm5356_vm7, %v8729_v1  ;;  %7621 = vmatmul.msk.f32.vlgmr.msra.gmra.mxu1 %vm5356_vm7, %v8764_v31 }
 0x43b   : > { %v5299_v60 = vpop.f32.mrf.mxu2 }
 0x43c   : > { %v5354_v21 = vmax.f32 %v5352_v26, 0.0 }
 0x43e   : > { %5374 = vmatpush.msra.mxu2 %v5354_v21  ;;  %5416 = vmatpush.msra.mxu0 %v5354_v21 }
 0x43f   : > { %7618 = vmatmul.msk.f32.vlgmr.msra.gmra.mxu2 %vm5356_vm7, %v8729_v1  ;;  %7620 = vmatmul.msk.f32.vlgmr.msra.gmra.mxu0 %vm5356_vm7, %v8764_v31 }
 0x4b7   : > { %v5438_v52 = vpop.f32.mrf.mxu1 }
 0x4bc   : > { %v5418_v3 = vpop.f32.mrf.mxu0 }
 0x4bd   : > { %v5396_v2 = vpop.f32.mrf.mxu3 }
 0x4be   : > { %v5442_v16 = vmax.f32 %v5396_v2, %v5438_v52 }
 0x4c0   : > { %v5445_v24 = vrot.slane %v5442_v16, 4 }
 0x4c2   : > { %v5376_v6 = vpop.f32.mrf.mxu2 }
 0x4c3   : > { %v5441_v4 = vmax.f32 %v5376_v6, %v5418_v3 }
 0x4c5   : > { %v5446_v53 = vsel %vm353_vm0, %v5441_v4, %v5445_v24 }
 0x4c6   : > { %5448 = vst [vmem:[%s287_s30] sm:$0xff] %v5446_v53 }
 0x4c7 PF: > { %s18_s18 = sadd.s32 1, %s8298_s18  }
 0x4c8   : > { %p15_p7 = scmp.ge.s32.totalorder %s18_s18, 4  }
 0x4ca   :  { %17 = sbr.rel (!%p15_p7) target bundleno = 3 (0x3), region = 95 }
 0x4cf   :  { %5470 = vsyncpa [#allocation3], 1 }
 0x4d0   :  { %5472 = vsyncpa [#allocation3 + $0x1], 1 }
 0x4d1   :  { %5473 = vsyncpa [#allocation5], 1 }
 0x4d2   :  { %5474 = vsyncpa [#allocation8], 1 }

</bundles_post_ra>
